<compile_context>
chip_gen: v7x
topology: tpu7x:2x2x1
jax: 0.10.0
libtpu: 0.0.40
codegen_flags: <defaults>
</compile_context>

<pallas_src>
import functools

import jax
import jax.numpy as jnp
from jax.experimental import pallas as pl
from jax.experimental.pallas import tpu as pltpu

LEAKY_SLOPE = 0.1
BN_EPS = 1e-5


def _bn_leaky(h2, gamma, beta):
    """Fused BatchNorm2d (training batch stats, biased var) + LeakyReLU(0.1).

    Two-pass mean / centered-sum-of-squares variance for numerical stability.
    h2: (M, C) f32 with M = N*H*W.  gamma/beta: (1, C) f32.
    """
    inv_m = jnp.float32(1.0 / h2.shape[0])
    mean = jnp.sum(h2, axis=0, keepdims=True) * inv_m          # (1, C)
    d = h2 - mean
    var = jnp.sum(d * d, axis=0, keepdims=True) * inv_m        # biased variance
    scale = gamma * jax.lax.rsqrt(var + BN_EPS)
    z = d * scale + beta
    return jnp.maximum(z, LEAKY_SLOPE * z)                     # LeakyReLU(0.1)


def _res_block_kernel(x_hbm, w1_ref, g1_ref, b1_ref, w3_ref, g2_ref, b2_ref,
                      o_ref, copy_sem, *, use_residual):
    r = pl.program_id(0)
    n, hh, ww, c = o_ref.shape
    cmid = w1_ref.shape[2]
    k3 = 3 * cmid
    m = n * hh * ww

    # Bring the input feature map into the resident output block exactly once.
    @pl.when(r == 0)
    def _():
        cp = pltpu.make_async_copy(x_hbm, o_ref, copy_sem)
        cp.start()
        cp.wait()

    x = o_ref[...]                                   # (N, H, W, C) f32, resident

    # ---- CNN_Block 1: 1x1 conv (bf16 MXU, f32 acc) -> BN -> LeakyReLU -------
    xb = x.reshape(m, c).astype(jnp.bfloat16)
    h = jnp.dot(xb, w1_ref[0], preferred_element_type=jnp.float32)   # (M, Cmid)
    h = _bn_leaky(h, g1_ref[0], b1_ref[0])                           # f32

    # ---- CNN_Block 2: 3x3 conv, padding=1 ------------------------------------
    # W-direction im2col built directly in bf16 (cast once, then shift):
    #   him[..., x, :] = [ h[x-1] | h[x] | h[x+1] ]   (zero outside [0, W-1])
    h4b = h.astype(jnp.bfloat16).reshape(n, hh, ww, cmid)
    zc = jnp.zeros((n, hh, 1, cmid), jnp.bfloat16)
    him = jnp.concatenate(
        [jnp.concatenate([zc, h4b[:, :, :ww - 1, :]], axis=2),   # dx = 0 tap
         h4b,                                                    # dx = 1 tap
         jnp.concatenate([h4b[:, :, 1:, :], zc], axis=2)],       # dx = 2 tap
        axis=-1)                                                 # (N,H,W,3*Cmid) bf16
    # TODO(synk): for production layouts (Cmid a multiple of 128) build the taps
    # with pltpu.roll(..., axis=2) + a column mask so the shifts ride the XLU slot.

    # Accumulate the three dy taps into ONE (M, C) f32 buffer by shifting the
    # matmul *inputs* along H (zero boundary rows), instead of shifting and
    # summing three full-size results.  Weight layout: w3_ref[0] is
    # (dy, dx*Cmid, C), flattened from the HWIO (3, 3, Cmid, C) kernel, so the
    # (dx, ci) packing matches `him` exactly (asserted in the wrapper).
    w3 = w3_ref[0]                                               # (3, 3*Cmid, C) bf16
    acc = jnp.dot(him.reshape(m, k3), w3[1],
                  preferred_element_type=jnp.float32)            # dy = 1 (center)
    zr = jnp.zeros((n, 1, ww, k3), jnp.bfloat16)
    acc = acc + jnp.dot(                                         # dy = 0: uses h[y-1]
        jnp.concatenate([zr, him[:, :hh - 1]], axis=1).reshape(m, k3),
        w3[0], preferred_element_type=jnp.float32)
    acc = acc + jnp.dot(                                         # dy = 2: uses h[y+1]
        jnp.concatenate([him[:, 1:], zr], axis=1).reshape(m, k3),
        w3[2], preferred_element_type=jnp.float32)
    # TODO(synk): on v6e, when VMEM allows, fold dy into K too (one
    # (M, 9*Cmid) x (9*Cmid, C) matmul) to better fill the 256-deep MXU.

    y = _bn_leaky(acc, g2_ref[0], b2_ref[0]).reshape(n, hh, ww, c)

    o_ref[...] = (x + y) if use_residual else y


def _vmem_limit_bytes(n, hh, ww, c):
    """Explicit scoped-VMEM request: resident map + bf16 im2col temps + headroom."""
    fm_f32 = n * hh * ww * c * 4
    need = int(5 * fm_f32) + (2 << 20)
    try:
        cap = int(pltpu.get_tpu_info().vmem_capacity_bytes)
    except Exception:
        cap = 64 << 20                             # v7x per-core floor
    return max(32 << 20, min(need, (cap * 3) // 4))


def residual_block(x_nchw, params, use_residual=True):
    """Pallas version of Residual_Block.forward.  Input/output are NCHW f32."""
    x = jnp.transpose(x_nchw, (0, 2, 3, 1)).astype(jnp.float32)   # NCHW -> NHWC
    n, hh, ww, c = x.shape
    cmid = c // 2
    r = len(params)

    # Stack per-repeat weights along a leading R axis; pre-cast conv weights to
    # bf16 once.  NOTE: p[3] must be HWIO (dy, dx, Cin=Cmid, Cout=C) — the
    # kernel's dy/dx tap packing silently depends on this layout.
    for p in params:
        assert p[0].shape == (c, cmid), p[0].shape
        assert p[3].shape == (3, 3, cmid, c), p[3].shape
    w1s = jnp.stack([p[0] for p in params]).astype(jnp.bfloat16)              # (R, C, Cmid)
    g1s = jnp.stack([p[1] for p in params]).astype(jnp.float32)               # (R, 1, Cmid)
    b1s = jnp.stack([p[2] for p in params]).astype(jnp.float32)               # (R, 1, Cmid)
    w3s = jnp.stack([p[3].reshape(3, 3 * cmid, c) for p in params]
                    ).astype(jnp.bfloat16)                                    # (R, 3, 3*Cmid, C)
    g2s = jnp.stack([p[4] for p in params]).astype(jnp.float32)               # (R, 1, C)
    b2s = jnp.stack([p[5] for p in params]).astype(jnp.float32)               # (R, 1, C)

    kernel = functools.partial(_res_block_kernel, use_residual=use_residual)
    out = pl.pallas_call(
        kernel,
        out_shape=jax.ShapeDtypeStruct((n, hh, ww, c), jnp.float32),
        grid_spec=pltpu.PrefetchScalarGridSpec(
            num_scalar_prefetch=0,
            grid=(r,),
            in_specs=[
                # x stays in HBM; DMA'd once at r == 0 (no pipelined double buffer).
                pl.BlockSpec(memory_space=pl.ANY),
                pl.BlockSpec((1, c, cmid), lambda i: (i, 0, 0)),           # w1[r]
                pl.BlockSpec((1, 1, cmid), lambda i: (i, 0, 0)),           # gamma1[r]
                pl.BlockSpec((1, 1, cmid), lambda i: (i, 0, 0)),           # beta1[r]
                pl.BlockSpec((1, 3, 3 * cmid, c), lambda i: (i, 0, 0, 0)), # w3[r]
                pl.BlockSpec((1, 1, c), lambda i: (i, 0, 0)),              # gamma2[r]
                pl.BlockSpec((1, 1, c), lambda i: (i, 0, 0)),              # beta2[r]
            ],
            # Constant block index -> output is the VMEM-resident running feature
            # map across repeats; written back to HBM once at the end.
            out_specs=pl.BlockSpec((n, hh, ww, c), lambda i: (0, 0, 0, 0)),
            scratch_shapes=[pltpu.SemaphoreType.DMA(())],
        ),
        compiler_params=pltpu.CompilerParams(
            dimension_semantics=("arbitrary",),
            vmem_limit_bytes=_vmem_limit_bytes(n, hh, ww, c)),
        # TODO(synk): add input_output_aliases={0: 0} when the caller no longer
        # needs x (reuses the HBM feature-map buffer).
    )(x, w1s, g1s, b1s, w3s, g2s, b2s)
    return jnp.transpose(out, (0, 3, 1, 2))                       # NHWC -> NCHW


# ---------------- deterministic parameter init (synthetic, no checkpoint) ----
def init_params(key, channels, num_repeats):
    cmid = channels // 2
    params = []
    for _ in range(num_repeats):
        key, *ks = jax.random.split(key, 7)
        w1 = jax.random.normal(ks[0], (channels, cmid), jnp.float32) / jnp.sqrt(
            jnp.float32(channels))
        g1 = 1.0 + 0.1 * jax.random.normal(ks[1], (1, cmid), jnp.float32)
        b1 = 0.1 * jax.random.normal(ks[2], (1, cmid), jnp.float32)
        w3 = jax.random.normal(ks[3], (3, 3, cmid, channels),
                               jnp.float32) / jnp.sqrt(jnp.float32(9 * cmid))
        g2 = 1.0 + 0.1 * jax.random.normal(ks[4], (1, channels), jnp.float32)
        b2 = 0.1 * jax.random.normal(ks[5], (1, channels), jnp.float32)
        params.append((w1, g1, b1, w3, g2, b2))
    return params


# ---------------- pure-JAX reference (for correctness check) ----------------
def _ref_bn_leaky(h, gamma, beta):
    mean = jnp.mean(h, axis=(0, 1, 2), keepdims=True)
    var = jnp.mean((h - mean) ** 2, axis=(0, 1, 2), keepdims=True)
    z = (h - mean) * jax.lax.rsqrt(var + BN_EPS)
    z = z * gamma.reshape(1, 1, 1, -1) + beta.reshape(1, 1, 1, -1)
    return jnp.where(z > 0, z, LEAKY_SLOPE * z)


def residual_block_ref(x_nchw, params, use_residual=True,
                       conv_dtype=jnp.float32):
    """lax.conv reference. conv_dtype=bfloat16 mirrors the kernel's MXU precision."""
    x = jnp.transpose(x_nchw, (0, 2, 3, 1)).astype(jnp.float32)
    dn = ('NHWC', 'HWIO', 'NHWC')
    for (w1, g1, b1, w3, g2, b2) in params:
        h = jax.lax.conv_general_dilated(
            x.astype(conv_dtype), w1.reshape(1, 1, *w1.shape).astype(conv_dtype),
            (1, 1), 'VALID', dimension_numbers=dn,
            preferred_element_type=jnp.float32)
        h = _ref_bn_leaky(h, g1, b1)
        y = jax.lax.conv_general_dilated(
            h.astype(conv_dtype), w3.astype(conv_dtype), (1, 1),
            ((1, 1), (1, 1)), dimension_numbers=dn,
            preferred_element_type=jnp.float32)
        y = _ref_bn_leaky(y, g2, b2)
        x = (x + y) if use_residual else y
    return jnp.transpose(x, (0, 3, 1, 2))


if __name__ == "__main__":
    key = jax.random.PRNGKey(0)
    k_x, k_p = jax.random.split(key)

    N, C, H, W = 2, 4, 16, 16                  # NCHW, as the PyTorch module expects
    num_repeats = 2
    x = jax.random.normal(k_x, (N, C, H, W), jnp.float32)
    params = init_params(k_p, C, num_repeats)

    out = residual_block(x, params, use_residual=True)
    out = jax.block_until_ready(out)
    assert out.shape == x.shape, (out.shape, x.shape)

    # Correctness vs a lax.conv reference using the same (bf16-input, f32-acc)
    # matmul precision as the kernel's MXU path.
    ref_bf16 = residual_block_ref(x, params, use_residual=True,
                                  conv_dtype=jnp.bfloat16)
    err_bf16 = float(jnp.max(jnp.abs(out - ref_bf16)))
    assert jnp.allclose(out, ref_bf16, atol=5e-2, rtol=5e-2), (
        f"max abs err vs bf16-precision reference: {err_bf16}")

    # Informational: deviation from the full-f32 reference (bf16 MXU rounding).
    ref_f32 = residual_block_ref(x, params, use_residual=True,
                                 conv_dtype=jnp.float32)
    err_f32 = float(jnp.max(jnp.abs(out - ref_f32)))
    print(f"max|kernel - bf16_ref| = {err_bf16:.3e}   "
          f"max|kernel - f32_ref| = {err_f32:.3e}")

    print("KERNEL_OK")
</pallas_src>

<mosaic_0001>
module attributes {stable_mosaic.version = 11 : i64} {
  func.func @_res_block_kernel(%arg0: i32, %arg1: memref<2x16x16x4xf32, #tpu.memory_space<any>>, %arg2: memref<1x4x2xbf16, #tpu.memory_space<vmem>>, %arg3: memref<1x1x2xf32, #tpu.memory_space<vmem>>, %arg4: memref<1x1x2xf32, #tpu.memory_space<vmem>>, %arg5: memref<1x3x6x4xbf16, #tpu.memory_space<vmem>>, %arg6: memref<1x1x4xf32, #tpu.memory_space<vmem>>, %arg7: memref<1x1x4xf32, #tpu.memory_space<vmem>>, %arg8: memref<2x16x16x4xf32, #tpu.memory_space<vmem>>, %arg9: memref<!tpu.dma_semaphore, #tpu.memory_space<semaphore_mem>>) attributes {dimension_semantics = [#tpu.dimension_semantics<arbitrary>], iteration_bounds = array<i64: 2>, scalar_prefetch = 0 : i64, scratch_operands = 1 : i64, tpu.core_type = #tpu.core_type<tc>, window_params = [{}, {transform_indices = @transform_1, window_bounds = array<i64: 1, 4, 2>}, {transform_indices = @transform_2, window_bounds = array<i64: 1, 1, 2>}, {transform_indices = @transform_3, window_bounds = array<i64: 1, 1, 2>}, {transform_indices = @transform_4, window_bounds = array<i64: 1, 3, 6, 4>}, {transform_indices = @transform_5, window_bounds = array<i64: 1, 1, 4>}, {transform_indices = @transform_6, window_bounds = array<i64: 1, 1, 4>}, {pipeline_mode = #tpu.pipeline_mode<synchronous>, transform_indices = @transform_7, window_bounds = array<i64: 2, 16, 16, 4>}]} {
    %c0_i32 = arith.constant 0 : i32
    %0 = arith.cmpi eq, %arg0, %c0_i32 : i32
    %1 = arith.extui %0 : i1 to i32
    %c0_i32_0 = arith.constant 0 : i32
    %2 = arith.cmpi ne, %1, %c0_i32_0 : i32
    scf.if %2 {
      tpu.enqueue_dma source(%arg1 : memref<2x16x16x4xf32, #tpu.memory_space<any>>) target(%arg8 : memref<2x16x16x4xf32, #tpu.memory_space<vmem>>) target_semaphore(%arg9 : memref<!tpu.dma_semaphore, #tpu.memory_space<semaphore_mem>>)
      tpu.wait_dma2 semaphore(%arg9 : memref<!tpu.dma_semaphore, #tpu.memory_space<semaphore_mem>>) src(%arg1 : memref<2x16x16x4xf32, #tpu.memory_space<any>>) dst(%arg8 : memref<2x16x16x4xf32, #tpu.memory_space<vmem>>)
    } else {
    }
    %c0 = arith.constant 0 : index
    %c0_1 = arith.constant 0 : index
    %c0_2 = arith.constant 0 : index
    %c0_3 = arith.constant 0 : index
    %3 = vector.load %arg8[%c0, %c0_1, %c0_2, %c0_3] : memref<2x16x16x4xf32, #tpu.memory_space<vmem>>, vector<2x16x16x4xf32>
    %4 = vector.shape_cast %3 : vector<2x16x16x4xf32> to vector<512x4xf32>
    %5 = arith.truncf %4 : vector<512x4xf32> to vector<512x4xbf16>
    %c0_4 = arith.constant 0 : index
    %c0_5 = arith.constant 0 : index
    %c0_6 = arith.constant 0 : index
    %6 = vector.load %arg2[%c0_4, %c0_5, %c0_6] : memref<1x4x2xbf16, #tpu.memory_space<vmem>>, vector<1x4x2xbf16>
    %7 = vector.shape_cast %6 : vector<1x4x2xbf16> to vector<4x2xbf16>
    %cst = arith.constant dense<0.000000e+00> : vector<512x2xf32>
    %8 = tpu.matmul %5, %7, %cst {dimension_numbers = #tpu.dot_dimension_numbers<[1], [0], [0], [1], [0, 0, 1, 1], [], []>} : vector<512x4xbf16>, vector<4x2xbf16>, vector<512x2xf32> -> vector<512x2xf32>
    %c0_7 = arith.constant 0 : index
    %c0_8 = arith.constant 0 : index
    %c0_9 = arith.constant 0 : index
    %9 = vector.load %arg3[%c0_7, %c0_8, %c0_9] : memref<1x1x2xf32, #tpu.memory_space<vmem>>, vector<1x1x2xf32>
    %10 = vector.shape_cast %9 : vector<1x1x2xf32> to vector<1x2xf32>
    %c0_10 = arith.constant 0 : index
    %c0_11 = arith.constant 0 : index
    %c0_12 = arith.constant 0 : index
    %11 = vector.load %arg4[%c0_10, %c0_11, %c0_12] : memref<1x1x2xf32, #tpu.memory_space<vmem>>, vector<1x1x2xf32>
    %12 = vector.shape_cast %11 : vector<1x1x2xf32> to vector<1x2xf32>
    %cst_13 = arith.constant dense<0.000000e+00> : vector<2xf32>
    %13 = vector.multi_reduction <add>, %8, %cst_13 [0] : vector<512x2xf32> to vector<2xf32>
    %14 = vector.shape_cast %13 : vector<2xf32> to vector<1x2xf32>
    %cst_14 = arith.constant 0.001953125 : f32
    %15 = vector.broadcast %cst_14 : f32 to vector<1x2xf32>
    %16 = arith.mulf %14, %15 : vector<1x2xf32>
    %17 = vector.broadcast %16 : vector<1x2xf32> to vector<512x2xf32>
    %18 = arith.subf %8, %17 : vector<512x2xf32>
    %19 = arith.mulf %18, %18 : vector<512x2xf32>
    %cst_15 = arith.constant dense<0.000000e+00> : vector<2xf32>
    %20 = vector.multi_reduction <add>, %19, %cst_15 [0] : vector<512x2xf32> to vector<2xf32>
    %21 = vector.shape_cast %20 : vector<2xf32> to vector<1x2xf32>
    %cst_16 = arith.constant 0.001953125 : f32
    %22 = vector.broadcast %cst_16 : f32 to vector<1x2xf32>
    %23 = arith.mulf %21, %22 : vector<1x2xf32>
    %cst_17 = arith.constant 9.99999974E-6 : f32
    %24 = vector.broadcast %cst_17 : f32 to vector<1x2xf32>
    %25 = arith.addf %23, %24 : vector<1x2xf32>
    %26 = math.rsqrt %25 : vector<1x2xf32>
    %27 = arith.mulf %10, %26 : vector<1x2xf32>
    %28 = vector.broadcast %27 : vector<1x2xf32> to vector<512x2xf32>
    %29 = arith.mulf %18, %28 : vector<512x2xf32>
    %30 = vector.broadcast %12 : vector<1x2xf32> to vector<512x2xf32>
    %31 = arith.addf %29, %30 : vector<512x2xf32>
    %cst_18 = arith.constant 1.000000e-01 : f32
    %32 = vector.broadcast %cst_18 : f32 to vector<512x2xf32>
    %33 = arith.mulf %32, %31 : vector<512x2xf32>
    %34 = arith.maximumf %31, %33 : vector<512x2xf32>
    %35 = arith.truncf %34 : vector<512x2xf32> to vector<512x2xbf16>
    %36 = vector.shape_cast %35 : vector<512x2xbf16> to vector<2x16x16x2xbf16>
    %cst_19 = arith.constant 0.000000e+00 : bf16
    %37 = vector.broadcast %cst_19 : bf16 to vector<2x16x1x2xbf16>
    %38 = vector.extract_strided_slice %36 {offsets = [0, 0, 0, 0], sizes = [2, 16, 15, 2], strides = [1, 1, 1, 1]} : vector<2x16x16x2xbf16> to vector<2x16x15x2xbf16>
    %39 = tpu.concatenate %37, %38 in 2 : vector<2x16x1x2xbf16>, vector<2x16x15x2xbf16> -> vector<2x16x16x2xbf16>
    %40 = vector.extract_strided_slice %36 {offsets = [0, 0, 1, 0], sizes = [2, 16, 15, 2], strides = [1, 1, 1, 1]} : vector<2x16x16x2xbf16> to vector<2x16x15x2xbf16>
    %41 = tpu.concatenate %40, %37 in 2 : vector<2x16x15x2xbf16>, vector<2x16x1x2xbf16> -> vector<2x16x16x2xbf16>
    %42 = tpu.concatenate %39, %36, %41 in 3 : vector<2x16x16x2xbf16>, vector<2x16x16x2xbf16>, vector<2x16x16x2xbf16> -> vector<2x16x16x6xbf16>
    %c0_20 = arith.constant 0 : index
    %c0_21 = arith.constant 0 : index
    %c0_22 = arith.constant 0 : index
    %c0_23 = arith.constant 0 : index
    %43 = vector.load %arg5[%c0_20, %c0_21, %c0_22, %c0_23] : memref<1x3x6x4xbf16, #tpu.memory_space<vmem>>, vector<1x3x6x4xbf16>
    %44 = vector.shape_cast %43 : vector<1x3x6x4xbf16> to vector<3x6x4xbf16>
    %45 = vector.shape_cast %42 : vector<2x16x16x6xbf16> to vector<512x6xbf16>
    %46 = vector.extract_strided_slice %44 {offsets = [1, 0, 0], sizes = [1, 6, 4], strides = [1, 1, 1]} : vector<3x6x4xbf16> to vector<1x6x4xbf16>
    %47 = vector.shape_cast %46 : vector<1x6x4xbf16> to vector<6x4xbf16>
    %cst_24 = arith.constant dense<0.000000e+00> : vector<512x4xf32>
    %48 = tpu.matmul %45, %47, %cst_24 {dimension_numbers = #tpu.dot_dimension_numbers<[1], [0], [0], [1], [0, 0, 1, 1], [], []>} : vector<512x6xbf16>, vector<6x4xbf16>, vector<512x4xf32> -> vector<512x4xf32>
    %cst_25 = arith.constant 0.000000e+00 : bf16
    %49 = vector.broadcast %cst_25 : bf16 to vector<2x1x16x6xbf16>
    %50 = vector.extract_strided_slice %42 {offsets = [0, 0, 0, 0], sizes = [2, 15, 16, 6], strides = [1, 1, 1, 1]} : vector<2x16x16x6xbf16> to vector<2x15x16x6xbf16>
    %51 = tpu.concatenate %49, %50 in 1 : vector<2x1x16x6xbf16>, vector<2x15x16x6xbf16> -> vector<2x16x16x6xbf16>
    %52 = vector.shape_cast %51 : vector<2x16x16x6xbf16> to vector<512x6xbf16>
    %53 = vector.extract_strided_slice %44 {offsets = [0, 0, 0], sizes = [1, 6, 4], strides = [1, 1, 1]} : vector<3x6x4xbf16> to vector<1x6x4xbf16>
    %54 = vector.shape_cast %53 : vector<1x6x4xbf16> to vector<6x4xbf16>
    %cst_26 = arith.constant dense<0.000000e+00> : vector<512x4xf32>
    %55 = tpu.matmul %52, %54, %cst_26 {dimension_numbers = #tpu.dot_dimension_numbers<[1], [0], [0], [1], [0, 0, 1, 1], [], []>} : vector<512x6xbf16>, vector<6x4xbf16>, vector<512x4xf32> -> vector<512x4xf32>
    %56 = arith.addf %48, %55 : vector<512x4xf32>
    %57 = vector.extract_strided_slice %42 {offsets = [0, 1, 0, 0], sizes = [2, 15, 16, 6], strides = [1, 1, 1, 1]} : vector<2x16x16x6xbf16> to vector<2x15x16x6xbf16>
    %58 = tpu.concatenate %57, %49 in 1 : vector<2x15x16x6xbf16>, vector<2x1x16x6xbf16> -> vector<2x16x16x6xbf16>
    %59 = vector.shape_cast %58 : vector<2x16x16x6xbf16> to vector<512x6xbf16>
    %60 = vector.extract_strided_slice %44 {offsets = [2, 0, 0], sizes = [1, 6, 4], strides = [1, 1, 1]} : vector<3x6x4xbf16> to vector<1x6x4xbf16>
    %61 = vector.shape_cast %60 : vector<1x6x4xbf16> to vector<6x4xbf16>
    %cst_27 = arith.constant dense<0.000000e+00> : vector<512x4xf32>
    %62 = tpu.matmul %59, %61, %cst_27 {dimension_numbers = #tpu.dot_dimension_numbers<[1], [0], [0], [1], [0, 0, 1, 1], [], []>} : vector<512x6xbf16>, vector<6x4xbf16>, vector<512x4xf32> -> vector<512x4xf32>
    %63 = arith.addf %56, %62 : vector<512x4xf32>
    %c0_28 = arith.constant 0 : index
    %c0_29 = arith.constant 0 : index
    %c0_30 = arith.constant 0 : index
    %64 = vector.load %arg6[%c0_28, %c0_29, %c0_30] : memref<1x1x4xf32, #tpu.memory_space<vmem>>, vector<1x1x4xf32>
    %65 = vector.shape_cast %64 : vector<1x1x4xf32> to vector<1x4xf32>
    %c0_31 = arith.constant 0 : index
    %c0_32 = arith.constant 0 : index
    %c0_33 = arith.constant 0 : index
    %66 = vector.load %arg7[%c0_31, %c0_32, %c0_33] : memref<1x1x4xf32, #tpu.memory_space<vmem>>, vector<1x1x4xf32>
    %67 = vector.shape_cast %66 : vector<1x1x4xf32> to vector<1x4xf32>
    %cst_34 = arith.constant dense<0.000000e+00> : vector<4xf32>
    %68 = vector.multi_reduction <add>, %63, %cst_34 [0] : vector<512x4xf32> to vector<4xf32>
    %69 = vector.shape_cast %68 : vector<4xf32> to vector<1x4xf32>
    %cst_35 = arith.constant 0.001953125 : f32
    %70 = vector.broadcast %cst_35 : f32 to vector<1x4xf32>
    %71 = arith.mulf %69, %70 : vector<1x4xf32>
    %72 = vector.broadcast %71 : vector<1x4xf32> to vector<512x4xf32>
    %73 = arith.subf %63, %72 : vector<512x4xf32>
    %74 = arith.mulf %73, %73 : vector<512x4xf32>
    %cst_36 = arith.constant dense<0.000000e+00> : vector<4xf32>
    %75 = vector.multi_reduction <add>, %74, %cst_36 [0] : vector<512x4xf32> to vector<4xf32>
    %76 = vector.shape_cast %75 : vector<4xf32> to vector<1x4xf32>
    %cst_37 = arith.constant 0.001953125 : f32
    %77 = vector.broadcast %cst_37 : f32 to vector<1x4xf32>
    %78 = arith.mulf %76, %77 : vector<1x4xf32>
    %cst_38 = arith.constant 9.99999974E-6 : f32
    %79 = vector.broadcast %cst_38 : f32 to vector<1x4xf32>
    %80 = arith.addf %78, %79 : vector<1x4xf32>
    %81 = math.rsqrt %80 : vector<1x4xf32>
    %82 = arith.mulf %65, %81 : vector<1x4xf32>
    %83 = vector.broadcast %82 : vector<1x4xf32> to vector<512x4xf32>
    %84 = arith.mulf %73, %83 : vector<512x4xf32>
    %85 = vector.broadcast %67 : vector<1x4xf32> to vector<512x4xf32>
    %86 = arith.addf %84, %85 : vector<512x4xf32>
    %cst_39 = arith.constant 1.000000e-01 : f32
    %87 = vector.broadcast %cst_39 : f32 to vector<512x4xf32>
    %88 = arith.mulf %87, %86 : vector<512x4xf32>
    %89 = arith.maximumf %86, %88 : vector<512x4xf32>
    %90 = vector.shape_cast %89 : vector<512x4xf32> to vector<2x16x16x4xf32>
    %91 = arith.addf %3, %90 : vector<2x16x16x4xf32>
    %c0_40 = arith.constant 0 : index
    %c0_41 = arith.constant 0 : index
    %c0_42 = arith.constant 0 : index
    %c0_43 = arith.constant 0 : index
    %92 = vector.load %arg8[%c0_40, %c0_41, %c0_42, %c0_43] : memref<2x16x16x4xf32, #tpu.memory_space<vmem>>, vector<2x16x16x4xf32>
    tpu.vector_store %arg8[%c0_40, %c0_41, %c0_42, %c0_43], %91 {strides = array<i32>} : memref<2x16x16x4xf32, #tpu.memory_space<vmem>>, vector<2x16x16x4xf32>,
    return
  }
  func.func @transform_1(%arg0: i32) -> (i32, i32, i32) {
    %c0_i32 = arith.constant 0 : i32
    %c0_i32_0 = arith.constant 0 : i32
    %c0_i32_1 = arith.constant 0 : i32
    return %arg0, %c0_i32, %c0_i32_0 : i32, i32, i32
  }
  func.func @transform_2(%arg0: i32) -> (i32, i32, i32) {
    %c0_i32 = arith.constant 0 : i32
    %c0_i32_0 = arith.constant 0 : i32
    %c0_i32_1 = arith.constant 0 : i32
    return %arg0, %c0_i32, %c0_i32_0 : i32, i32, i32
  }
  func.func @transform_3(%arg0: i32) -> (i32, i32, i32) {
    %c0_i32 = arith.constant 0 : i32
    %c0_i32_0 = arith.constant 0 : i32
    %c0_i32_1 = arith.constant 0 : i32
    return %arg0, %c0_i32, %c0_i32_0 : i32, i32, i32
  }
  func.func @transform_4(%arg0: i32) -> (i32, i32, i32, i32) {
    %c0_i32 = arith.constant 0 : i32
    %c0_i32_0 = arith.constant 0 : i32
    %c0_i32_1 = arith.constant 0 : i32
    %c0_i32_2 = arith.constant 0 : i32
    return %arg0, %c0_i32, %c0_i32_0, %c0_i32_1 : i32, i32, i32, i32
  }
  func.func @transform_5(%arg0: i32) -> (i32, i32, i32) {
    %c0_i32 = arith.constant 0 : i32
    %c0_i32_0 = arith.constant 0 : i32
    %c0_i32_1 = arith.constant 0 : i32
    return %arg0, %c0_i32, %c0_i32_0 : i32, i32, i32
  }
  func.func @transform_6(%arg0: i32) -> (i32, i32, i32) {
    %c0_i32 = arith.constant 0 : i32
    %c0_i32_0 = arith.constant 0 : i32
    %c0_i32_1 = arith.constant 0 : i32
    return %arg0, %c0_i32, %c0_i32_0 : i32, i32, i32
  }
  func.func @transform_7(%arg0: i32) -> (i32, i32, i32, i32) {
    %c0_i32 = arith.constant 0 : i32
    %c0_i32_0 = arith.constant 0 : i32
    %c0_i32_1 = arith.constant 0 : i32
    %c0_i32_2 = arith.constant 0 : i32
    %c0_i32_3 = arith.constant 0 : i32
    return %c0_i32, %c0_i32_0, %c0_i32_1, %c0_i32_2 : i32, i32, i32, i32
  }
}

</mosaic_0001>

<bundles_post_ra>
// kernel: tpu_custom_call.1
= control target key start
LH: loop header
LB: loop body
LE: loop exit
PB: predicated region body
PF: predicated region fallthrough
CT: control target
= control target key end

     0   :  { %s5148_s24 = smov 0   ;;  %s10552_s0 = inlined_call_operand.vmem [shape: f32[2,16,16,4], index: 0, kind: input, shape index: {}]   ;;  %s10553_s1 = inlined_call_operand.vmem [shape: bf16[2,4,2], index: 1, kind: input, shape index: {}]   ;;  %s10554_s2 = inlined_call_operand.vmem [shape: f32[2,1,2], index: 2, kind: input, shape index: {}]   ;;  %s10555_s3 = inlined_call_operand.vmem [shape: f32[2,1,2], index: 3, kind: input, shape index: {}]   ;;  %s10556_s4 = inlined_call_operand.vmem [shape: bf16[2,3,6,4], index: 4, kind: input, shape index: {}]   ;;  %s10557_s5 = inlined_call_operand.vmem [shape: f32[2,1,4], index: 5, kind: input, shape index: {}]   ;;  %s10558_s6 = inlined_call_operand.vmem [shape: f32[2,1,4], index: 6, kind: input, shape index: {}]   ;;  %s10559_s7 = inlined_call_operand.vmem [shape: f32[2,16,16,4], index: 7, kind: output, shape index: {}]  }
   0x1 LB: > { %s4351_s25 = sadd.s32 4294967295, %s5103_s24   ;;  %p4354_p0 = scmp.ge.s32.totalorder %s5103_s24, 1  ;;  %s5103_s24 = sphi %s5148_s24, %s17_s24  }
   0x2   : > { %p249_p1 = scmp.lt.s32.totalorder %s5103_s24, 3 }
   0x4   : > { %p250_p2 = pnand %p4354_p0, %p249_p1 }
   0x6   : > { %253 = sbr.rel (%p250_p2) target bundleno = 1560 (0x618), region = 44 }
   0xd   : > { %p290_p3 = scmp.lt.s32.totalorder %s4351_s25, 1  ;;  %p4357_p4 = scmp.ne.s32.totalorder %s4351_s25, 0 }
   0xe   : > { %v348_v0 = vld [vmem:[%s10552_s0] sm:$0xff] (!%p4357_p4)  ;;  %v350_v1 = vld [vmem:[%s10552_s0 + $0x8] sm:$0xff] (!%p4357_p4)  ;;  %v352_v2 = vld [vmem:[%s10552_s0 + $0x10] sm:$0xff] (!%p4357_p4) }
   0xf   : > { %s5156_s26 = scalar_select %p290_p3, %s4351_s25, 1 }
  0x10   : > { %315 = sbr.rel (%p4357_p4) target bundleno = 51 (0x33), region = 48  ;;  %349 = vst [vmem:[%s10559_s7] sm:$0xff] (!%p4357_p4), %v348_v0  ;;  %351 = vst [vmem:[%s10559_s7 + $0x8] sm:$0xff] (!%p4357_p4), %v350_v1  ;;  %v354_v3 = vld [vmem:[%s10552_s0 + $0x18] sm:$0xff] (!%p4357_p4)  ;;  %v356_v4 = vld [vmem:[%s10552_s0 + $0x20] sm:$0xff] (!%p4357_p4) }
  0x11   : > { %s4355_s27 = sshll.u32 %s5156_s26, 1  ;;  %s296_s30 = scalar_lea.vmem %s10554_s2, %s5156_s26  ;;  %353 = vst [vmem:[%s10559_s7 + $0x10] sm:$0xff] (!%p4357_p4), %v352_v2  ;;  %v358_v5 = vld [vmem:[%s10552_s0 + $0x28] sm:$0xff] (!%p4357_p4)  ;;  %355 = vst [vmem:[%s10559_s7 + $0x18] sm:$0xff] (!%p4357_p4), %v354_v3  ;;  %v360_v6 = vld [vmem:[%s10552_s0 + $0x30] sm:$0xff] (!%p4357_p4) }
  0x12   : > { %s5166_s10 = scalar_lea.vmem %s10553_s1, %s4355_s27  ;;  %s299_s13 = scalar_lea.vmem %s10555_s3, %s5156_s26  ;;  %357 = vst [vmem:[%s10559_s7 + $0x20] sm:$0xff] (!%p4357_p4), %v356_v4  ;;  %359 = vst [vmem:[%s10559_s7 + $0x28] sm:$0xff] (!%p4357_p4), %v358_v5  ;;  %v362_v7 = vld [vmem:[%s10552_s0 + $0x38] sm:$0xff] (!%p4357_p4)  ;;  %v364_v8 = vld [vmem:[%s10552_s0 + $0x40] sm:$0xff] (!%p4357_p4) }
  0x13   : > { %s5015_s14 = smul.u32 12, %s5156_s26  ;;  %s307_s17 = scalar_lea.vmem %s10557_s5, %s5156_s26  ;;  %361 = vst [vmem:[%s10559_s7 + $0x30] sm:$0xff] (!%p4357_p4), %v360_v6  ;;  %363 = vst [vmem:[%s10559_s7 + $0x38] sm:$0xff] (!%p4357_p4), %v362_v7  ;;  %v366_v9 = vld [vmem:[%s10552_s0 + $0x48] sm:$0xff] (!%p4357_p4)  ;;  %v368_v10 = vld [vmem:[%s10552_s0 + $0x50] sm:$0xff] (!%p4357_p4) }
  0x14   : > { %s310_s20 = scalar_lea.vmem %s10558_s6, %s5156_s26  ;;  %365 = vst [vmem:[%s10559_s7 + $0x40] sm:$0xff] (!%p4357_p4), %v364_v8  ;;  %v370_v11 = vld [vmem:[%s10552_s0 + $0x58] sm:$0xff] (!%p4357_p4)  ;;  %367 = vst [vmem:[%s10559_s7 + $0x48] sm:$0xff] (!%p4357_p4), %v366_v9  ;;  %v372_v12 = vld [vmem:[%s10552_s0 + $0x60] sm:$0xff] (!%p4357_p4) }
  0x15   : > { %s5184_s23 = scalar_lea.vmem %s10556_s4, %s5015_s14  ;;  %369 = vst [vmem:[%s10559_s7 + $0x50] sm:$0xff] (!%p4357_p4), %v368_v10  ;;  %371 = vst [vmem:[%s10559_s7 + $0x58] sm:$0xff] (!%p4357_p4), %v370_v11  ;;  %v374_v13 = vld [vmem:[%s10552_s0 + $0x68] sm:$0xff] (!%p4357_p4)  ;;  %v376_v14 = vld [vmem:[%s10552_s0 + $0x70] sm:$0xff] (!%p4357_p4) }
  0x16   : > { %373 = vst [vmem:[%s10559_s7 + $0x60] sm:$0xff] (!%p4357_p4), %v372_v12  ;;  %375 = vst [vmem:[%s10559_s7 + $0x68] sm:$0xff] (!%p4357_p4), %v374_v13  ;;  %v378_v15 = vld [vmem:[%s10552_s0 + $0x78] sm:$0xff] (!%p4357_p4)  ;;  %v380_v16 = vld [vmem:[%s10552_s0 + $0x80] sm:$0xff] (!%p4357_p4) }
  0x17   : > { %377 = vst [vmem:[%s10559_s7 + $0x70] sm:$0xff] %v376_v14  ;;  %v382_v17 = vld [vmem:[%s10552_s0 + $0x88] sm:$0xff]  ;;  %379 = vst [vmem:[%s10559_s7 + $0x78] sm:$0xff] %v378_v15  ;;  %v384_v18 = vld [vmem:[%s10552_s0 + $0x90] sm:$0xff] }
  0x18   : > { %381 = vst [vmem:[%s10559_s7 + $0x80] sm:$0xff] %v380_v16  ;;  %383 = vst [vmem:[%s10559_s7 + $0x88] sm:$0xff] %v382_v17  ;;  %v386_v19 = vld [vmem:[%s10552_s0 + $0x98] sm:$0xff]  ;;  %v388_v20 = vld [vmem:[%s10552_s0 + $0xa0] sm:$0xff] }
  0x19   : > { %385 = vst [vmem:[%s10559_s7 + $0x90] sm:$0xff] %v384_v18  ;;  %387 = vst [vmem:[%s10559_s7 + $0x98] sm:$0xff] %v386_v19  ;;  %v390_v21 = vld [vmem:[%s10552_s0 + $0xa8] sm:$0xff]  ;;  %v392_v22 = vld [vmem:[%s10552_s0 + $0xb0] sm:$0xff] }
  0x1a   : > { %389 = vst [vmem:[%s10559_s7 + $0xa0] sm:$0xff] %v388_v20  ;;  %v394_v23 = vld [vmem:[%s10552_s0 + $0xb8] sm:$0xff]  ;;  %391 = vst [vmem:[%s10559_s7 + $0xa8] sm:$0xff] %v390_v21  ;;  %v396_v24 = vld [vmem:[%s10552_s0 + $0xc0] sm:$0xff] }
  0x1b   : > { %393 = vst [vmem:[%s10559_s7 + $0xb0] sm:$0xff] %v392_v22  ;;  %395 = vst [vmem:[%s10559_s7 + $0xb8] sm:$0xff] %v394_v23  ;;  %v398_v25 = vld [vmem:[%s10552_s0 + $0xc8] sm:$0xff]  ;;  %v400_v26 = vld [vmem:[%s10552_s0 + $0xd0] sm:$0xff] }
  0x1c   : > { %397 = vst [vmem:[%s10559_s7 + $0xc0] sm:$0xff] %v396_v24  ;;  %399 = vst [vmem:[%s10559_s7 + $0xc8] sm:$0xff] %v398_v25  ;;  %v402_v27 = vld [vmem:[%s10552_s0 + $0xd8] sm:$0xff]  ;;  %v404_v28 = vld [vmem:[%s10552_s0 + $0xe0] sm:$0xff] }
  0x1d   : > { %401 = vst [vmem:[%s10559_s7 + $0xd0] sm:$0xff] %v400_v26  ;;  %v406_v29 = vld [vmem:[%s10552_s0 + $0xe8] sm:$0xff]  ;;  %403 = vst [vmem:[%s10559_s7 + $0xd8] sm:$0xff] %v402_v27  ;;  %v408_v30 = vld [vmem:[%s10552_s0 + $0xf0] sm:$0xff] }
  0x1e   : > { %405 = vst [vmem:[%s10559_s7 + $0xe0] sm:$0xff] %v404_v28  ;;  %407 = vst [vmem:[%s10559_s7 + $0xe8] sm:$0xff] %v406_v29  ;;  %v410_v31 = vld [vmem:[%s10552_s0 + $0xf8] sm:$0xff]  ;;  %v412_v32 = vld [vmem:[%s10552_s0 + $0x100] sm:$0xff] }
  0x1f   : > { %409 = vst [vmem:[%s10559_s7 + $0xf0] sm:$0xff] %v408_v30  ;;  %411 = vst [vmem:[%s10559_s7 + $0xf8] sm:$0xff] %v410_v31  ;;  %v414_v33 = vld [vmem:[%s10552_s0 + $0x108] sm:$0xff]  ;;  %v416_v34 = vld [vmem:[%s10552_s0 + $0x110] sm:$0xff] }
  0x20   : > { %413 = vst [vmem:[%s10559_s7 + $0x100] sm:$0xff] %v412_v32  ;;  %v418_v35 = vld [vmem:[%s10552_s0 + $0x118] sm:$0xff]  ;;  %415 = vst [vmem:[%s10559_s7 + $0x108] sm:$0xff] %v414_v33  ;;  %v420_v36 = vld [vmem:[%s10552_s0 + $0x120] sm:$0xff] }
  0x21   : > { %417 = vst [vmem:[%s10559_s7 + $0x110] sm:$0xff] %v416_v34  ;;  %419 = vst [vmem:[%s10559_s7 + $0x118] sm:$0xff] %v418_v35  ;;  %v422_v37 = vld [vmem:[%s10552_s0 + $0x128] sm:$0xff]  ;;  %v424_v38 = vld [vmem:[%s10552_s0 + $0x130] sm:$0xff] }
  0x22   : > { %421 = vst [vmem:[%s10559_s7 + $0x120] sm:$0xff] %v420_v36  ;;  %423 = vst [vmem:[%s10559_s7 + $0x128] sm:$0xff] %v422_v37  ;;  %v426_v39 = vld [vmem:[%s10552_s0 + $0x138] sm:$0xff]  ;;  %v428_v40 = vld [vmem:[%s10552_s0 + $0x140] sm:$0xff] }
  0x23   : > { %425 = vst [vmem:[%s10559_s7 + $0x130] sm:$0xff] %v424_v38  ;;  %v430_v41 = vld [vmem:[%s10552_s0 + $0x148] sm:$0xff]  ;;  %427 = vst [vmem:[%s10559_s7 + $0x138] sm:$0xff] %v426_v39  ;;  %v432_v42 = vld [vmem:[%s10552_s0 + $0x150] sm:$0xff] }
  0x24   : > { %429 = vst [vmem:[%s10559_s7 + $0x140] sm:$0xff] %v428_v40  ;;  %431 = vst [vmem:[%s10559_s7 + $0x148] sm:$0xff] %v430_v41  ;;  %v434_v43 = vld [vmem:[%s10552_s0 + $0x158] sm:$0xff]  ;;  %v436_v44 = vld [vmem:[%s10552_s0 + $0x160] sm:$0xff] }
  0x25   : > { %433 = vst [vmem:[%s10559_s7 + $0x150] sm:$0xff] %v432_v42  ;;  %435 = vst [vmem:[%s10559_s7 + $0x158] sm:$0xff] %v434_v43  ;;  %v438_v45 = vld [vmem:[%s10552_s0 + $0x168] sm:$0xff]  ;;  %v440_v46 = vld [vmem:[%s10552_s0 + $0x170] sm:$0xff] }
  0x26   : > { %437 = vst [vmem:[%s10559_s7 + $0x160] sm:$0xff] %v436_v44  ;;  %v442_v47 = vld [vmem:[%s10552_s0 + $0x178] sm:$0xff]  ;;  %439 = vst [vmem:[%s10559_s7 + $0x168] sm:$0xff] %v438_v45  ;;  %v444_v48 = vld [vmem:[%s10552_s0 + $0x180] sm:$0xff] }
  0x27   : > { %441 = vst [vmem:[%s10559_s7 + $0x170] sm:$0xff] %v440_v46  ;;  %443 = vst [vmem:[%s10559_s7 + $0x178] sm:$0xff] %v442_v47  ;;  %v446_v49 = vld [vmem:[%s10552_s0 + $0x188] sm:$0xff]  ;;  %v448_v50 = vld [vmem:[%s10552_s0 + $0x190] sm:$0xff] }
  0x28   : > { %445 = vst [vmem:[%s10559_s7 + $0x180] sm:$0xff] %v444_v48  ;;  %447 = vst [vmem:[%s10559_s7 + $0x188] sm:$0xff] %v446_v49  ;;  %v450_v51 = vld [vmem:[%s10552_s0 + $0x198] sm:$0xff]  ;;  %v452_v52 = vld [vmem:[%s10552_s0 + $0x1a0] sm:$0xff] }
  0x29   : > { %449 = vst [vmem:[%s10559_s7 + $0x190] sm:$0xff] %v448_v50  ;;  %v454_v53 = vld [vmem:[%s10552_s0 + $0x1a8] sm:$0xff]  ;;  %451 = vst [vmem:[%s10559_s7 + $0x198] sm:$0xff] %v450_v51  ;;  %v456_v54 = vld [vmem:[%s10552_s0 + $0x1b0] sm:$0xff] }
  0x2a   : > { %453 = vst [vmem:[%s10559_s7 + $0x1a0] sm:$0xff] %v452_v52  ;;  %455 = vst [vmem:[%s10559_s7 + $0x1a8] sm:$0xff] %v454_v53  ;;  %v458_v55 = vld [vmem:[%s10552_s0 + $0x1b8] sm:$0xff]  ;;  %v460_v56 = vld [vmem:[%s10552_s0 + $0x1c0] sm:$0xff] }
  0x2b   : > { %457 = vst [vmem:[%s10559_s7 + $0x1b0] sm:$0xff] %v456_v54  ;;  %459 = vst [vmem:[%s10559_s7 + $0x1b8] sm:$0xff] %v458_v55  ;;  %v462_v57 = vld [vmem:[%s10552_s0 + $0x1c8] sm:$0xff]  ;;  %v464_v58 = vld [vmem:[%s10552_s0 + $0x1d0] sm:$0xff] }
  0x2c   : > { %461 = vst [vmem:[%s10559_s7 + $0x1c0] sm:$0xff] %v460_v56  ;;  %v466_v59 = vld [vmem:[%s10552_s0 + $0x1d8] sm:$0xff]  ;;  %463 = vst [vmem:[%s10559_s7 + $0x1c8] sm:$0xff] %v462_v57  ;;  %v468_v60 = vld [vmem:[%s10552_s0 + $0x1e0] sm:$0xff] }
  0x2d   : > { %465 = vst [vmem:[%s10559_s7 + $0x1d0] sm:$0xff] %v464_v58  ;;  %467 = vst [vmem:[%s10559_s7 + $0x1d8] sm:$0xff] %v466_v59  ;;  %v470_v61 = vld [vmem:[%s10552_s0 + $0x1e8] sm:$0xff]  ;;  %v472_v62 = vld [vmem:[%s10552_s0 + $0x1f0] sm:$0xff] }
  0x2e   : > { %469 = vst [vmem:[%s10559_s7 + $0x1e0] sm:$0xff] %v468_v60  ;;  %471 = vst [vmem:[%s10559_s7 + $0x1e8] sm:$0xff] %v470_v61  ;;  %v474_v63 = vld [vmem:[%s10552_s0 + $0x1f8] sm:$0xff] }
  0x2f   : > { %473 = vst [vmem:[%s10559_s7 + $0x1f0] sm:$0xff] %v472_v62  ;;  %475 = vst [vmem:[%s10559_s7 + $0x1f8] sm:$0xff] %v474_v63 }
  0x30   : > { %483 = vsyncadd [#allocation2], 8192 }
  0x31   : > { %5099 = dma.done.wait [#allocation2], 8192 }
  0x32   : > { %5100 = vsyncadd [#allocation2], 4294959104 }
  0x33 PF: > { %v585_v0 = vld [vmem:[%s5166_s10] sm:$0x3]  ;;  %vm683_vm0 = vcmask 1041408   ;;  %v490_v2 = vld [vmem:[%s10559_s7 + $0x8] sm:$0xff]  ;;  %vm586_vm1 = vcmask 31744   ;;  %v507_v29 = vld [vmem:[%s10559_s7 + $0x90] sm:$0xff] }
  0x34   : > { %v489_v1 = vld [vmem:[%s10559_s7] sm:$0xff]  ;;  %5011 = vmatprep.subr.msk.bf16.mxu0 %vm683_vm0, %v585_v0  ;;  %v685_v3 = vsel %vm683_vm0, %v585_v0, 0  ;;  %v491_v5 = vld [vmem:[%s10559_s7 + $0x10] sm:$0xff]  ;;  %v492_v6 = vld [vmem:[%s10559_s7 + $0x18] sm:$0xff]  ;;  %vm978_vm2 = vcmask 15360   ;;  %vm2065_vm3 = vcmask 1047552  }
  0x35   : > { %v553_v4 = vpack.c.bf16 %v490_v2, %v489_v1  ;;  %v493_v7 = vld [vmem:[%s10559_s7 + $0x20] sm:$0xff]  ;;  %4620 = vmatpush3.bf16.msra.mxu0 %v685_v3  ;;  %v554_v8 = vpack.c.bf16 %v492_v6, %v491_v5  ;;  %v494_v9 = vld [vmem:[%s10559_s7 + $0x28] sm:$0xff]  ;;  %v508_v30 = vld [vmem:[%s10559_s7 + $0x98] sm:$0xff]  ;;  %vm2066_vm4 = vsmask.f32 7424  ;;  %vm2519_vm6 = vcmask 1042432  }
  0x36   : > { %v555_v10 = vpack.c.bf16 %v494_v9, %v493_v7  ;;  %v495_v11 = vld [vmem:[%s10559_s7 + $0x30] sm:$0xff]  ;;  %v496_v12 = vld [vmem:[%s10559_s7 + $0x38] sm:$0xff]  ;;  %v505_v25 = vld [vmem:[%s10559_s7 + $0x80] sm:$0xff]  ;;  %v562_v33 = vpack.c.bf16 %v508_v30, %v507_v29  ;;  %vm1934_vm7 = vcmask 1040384   ;;  %vm1935_vm8 = vsmask.f32 256 }
  0x37   : > { %4621 = vmatprep.mubr.msk.bf16.mxu0 %vm586_vm1, %v553_v4  ;;  %v497_v13 = vld [vmem:[%s10559_s7 + $0x40] sm:$0xff]  ;;  %v498_v14 = vld [vmem:[%s10559_s7 + $0x48] sm:$0xff]  ;;  %v556_v15 = vpack.c.bf16 %v496_v12, %v495_v11  ;;  %v511_v35 = vld [vmem:[%s10559_s7 + $0xb0] sm:$0xff]  ;;  %vm2455_vm10 = vcmask 48128  }
  0x38   : > { %4622 = vmatmul.mubr.msk.bf16.vlgmr.msra.gmra.mrb[0].mxu0 %vm586_vm1, %v554_v8  ;;  %v557_v16 = vpack.c.bf16 %v498_v14, %v497_v13  ;;  %v499_v17 = vld [vmem:[%s10559_s7 + $0x50] sm:$0xff]  ;;  %v500_v18 = vld [vmem:[%s10559_s7 + $0x58] sm:$0xff]  ;;  %v506_v26 = vld [vmem:[%s10559_s7 + $0x88] sm:$0xff] }
  0x39   : > { %4625 = vmatprep.mubr.msk.bf16.mxu0 %vm586_vm1, %v555_v10  ;;  %v501_v19 = vld [vmem:[%s10559_s7 + $0x60] sm:$0xff]  ;;  %v502_v20 = vld [vmem:[%s10559_s7 + $0x68] sm:$0xff]  ;;  %v558_v21 = vpack.c.bf16 %v500_v18, %v499_v17  ;;  %v561_v28 = vpack.c.bf16 %v506_v26, %v505_v25  ;;  %v512_v36 = vld [vmem:[%s10559_s7 + $0xb8] sm:$0xff] }
  0x3a   : > { %v559_v22 = vpack.c.bf16 %v502_v20, %v501_v19  ;;  %v503_v23 = vld [vmem:[%s10559_s7 + $0x70] sm:$0xff]  ;;  %v504_v24 = vld [vmem:[%s10559_s7 + $0x78] sm:$0xff]  ;;  %v509_v31 = vld [vmem:[%s10559_s7 + $0xa0] sm:$0xff]  ;;  %v564_v39 = vpack.c.bf16 %v512_v36, %v511_v35 }
  0x3b   : > { %v560_v27 = vpack.c.bf16 %v504_v24, %v503_v23  ;;  %v510_v32 = vld [vmem:[%s10559_s7 + $0xa8] sm:$0xff]  ;;  %v513_v37 = vld [vmem:[%s10559_s7 + $0xc0] sm:$0xff]  ;;  %v515_v41 = vld [vmem:[%s10559_s7 + $0xd0] sm:$0xff] }
  0x3c   : > { %v563_v34 = vpack.c.bf16 %v510_v32, %v509_v31  ;;  %v514_v38 = vld [vmem:[%s10559_s7 + $0xc8] sm:$0xff]  ;;  %v516_v42 = vld [vmem:[%s10559_s7 + $0xd8] sm:$0xff]  ;;  %v517_v43 = vld [vmem:[%s10559_s7 + $0xe0] sm:$0xff] }
  0x3d   : > { %v565_v40 = vpack.c.bf16 %v514_v38, %v513_v37  ;;  %v518_v44 = vld [vmem:[%s10559_s7 + $0xe8] sm:$0xff]  ;;  %v566_v45 = vpack.c.bf16 %v516_v42, %v515_v41  ;;  %v519_v47 = vld [vmem:[%s10559_s7 + $0xf0] sm:$0xff]  ;;  %v520_v48 = vld [vmem:[%s10559_s7 + $0xf8] sm:$0xff] }
  0x3e   : > { %v567_v46 = vpack.c.bf16 %v518_v44, %v517_v43  ;;  %v521_v49 = vld [vmem:[%s10559_s7 + $0x100] sm:$0xff]  ;;  %v522_v50 = vld [vmem:[%s10559_s7 + $0x108] sm:$0xff]  ;;  %v568_v51 = vpack.c.bf16 %v520_v48, %v519_v47  ;;  %v523_v53 = vld [vmem:[%s10559_s7 + $0x110] sm:$0xff] }
  0x3f   : > { %v569_v52 = vpack.c.bf16 %v522_v50, %v521_v49  ;;  %v524_v54 = vld [vmem:[%s10559_s7 + $0x118] sm:$0xff]  ;;  %v525_v55 = vld [vmem:[%s10559_s7 + $0x120] sm:$0xff]  ;;  %v526_v56 = vld [vmem:[%s10559_s7 + $0x128] sm:$0xff] }
  0x40   : > { %4626 = vmatmul.mubr.msk.bf16.gmra.mrb[4].mxu0 %vm586_vm1, %v556_v15  ;;  %v570_v57 = vpack.c.bf16 %v524_v54, %v523_v53  ;;  %v571_v58 = vpack.c.bf16 %v526_v56, %v525_v55  ;;  %v527_v59 = vld [vmem:[%s10559_s7 + $0x130] sm:$0xff]  ;;  %v528_v60 = vld [vmem:[%s10559_s7 + $0x138] sm:$0xff]  ;;  %v529_v61 = vld [vmem:[%s10559_s7 + $0x140] sm:$0xff] }
  0x41   : > { %4629 = vmatprep.mubr.msk.bf16.mxu0 %vm586_vm1, %v557_v16  ;;  %v530_v62 = vld [vmem:[%s10559_s7 + $0x148] sm:$0xff]  ;;  %v572_v63 = vpack.c.bf16 %v528_v60, %v527_v59  ;;  %v531_v1 = vld [vmem:[%s10559_s7 + $0x150] sm:$0xff]  ;;  %v532_v2 = vld [vmem:[%s10559_s7 + $0x158] sm:$0xff] }
  0x42   : > { %v573_v0 = vpack.c.bf16 %v530_v62, %v529_v61  ;;  %v533_v3 = vld [vmem:[%s10559_s7 + $0x160] sm:$0xff]  ;;  %v534_v4 = vld [vmem:[%s10559_s7 + $0x168] sm:$0xff]  ;;  %v574_v5 = vpack.c.bf16 %v532_v2, %v531_v1  ;;  %v535_v7 = vld [vmem:[%s10559_s7 + $0x170] sm:$0xff] }
  0x43   : > { %v575_v6 = vpack.c.bf16 %v534_v4, %v533_v3  ;;  %v536_v8 = vld [vmem:[%s10559_s7 + $0x178] sm:$0xff]  ;;  %v537_v9 = vld [vmem:[%s10559_s7 + $0x180] sm:$0xff]  ;;  %v538_v10 = vld [vmem:[%s10559_s7 + $0x188] sm:$0xff] }
  0x44   : > { %v576_v11 = vpack.c.bf16 %v536_v8, %v535_v7  ;;  %v577_v12 = vpack.c.bf16 %v538_v10, %v537_v9  ;;  %v539_v13 = vld [vmem:[%s10559_s7 + $0x190] sm:$0xff]  ;;  %v540_v14 = vld [vmem:[%s10559_s7 + $0x198] sm:$0xff]  ;;  %v541_v15 = vld [vmem:[%s10559_s7 + $0x1a0] sm:$0xff] }
  0x45   : > { %v542_v16 = vld [vmem:[%s10559_s7 + $0x1a8] sm:$0xff]  ;;  %v578_v17 = vpack.c.bf16 %v540_v14, %v539_v13  ;;  %v543_v19 = vld [vmem:[%s10559_s7 + $0x1b0] sm:$0xff]  ;;  %v544_v20 = vld [vmem:[%s10559_s7 + $0x1b8] sm:$0xff] }
  0x46   : > { %v579_v18 = vpack.c.bf16 %v542_v16, %v541_v15  ;;  %v580_v23 = vpack.c.bf16 %v544_v20, %v543_v19  ;;  %v547_v25 = vld [vmem:[%s10559_s7 + $0x1d0] sm:$0xff]  ;;  %v548_v26 = vld [vmem:[%s10559_s7 + $0x1d8] sm:$0xff]  ;;  %vm6911_vm5 = vmand %vm2065_vm3, %vm2066_vm4 }
  0x47   : > { %v582_v29 = vpack.c.bf16 %v548_v26, %v547_v25  ;;  %v551_v31 = vld [vmem:[%s10559_s7 + $0x1f0] sm:$0xff]  ;;  %v552_v32 = vld [vmem:[%s10559_s7 + $0x1f8] sm:$0xff]  ;;  %vm7564_vm9 = vmand %vm1934_vm7, %vm1935_vm8 }
  0x48   : > { %4630 = vmatmul.mubr.msk.bf16.gmra.mrb[8].mxu0 %vm586_vm1, %v558_v21  ;;  %v545_v21 = vld [vmem:[%s10559_s7 + $0x1c0] sm:$0xff] }
  0x49   : > { %4633 = vmatprep.mubr.msk.bf16.mxu0 %vm586_vm1, %v559_v22  ;;  %v546_v22 = vld [vmem:[%s10559_s7 + $0x1c8] sm:$0xff] }
  0x4a   : > { %v581_v24 = vpack.c.bf16 %v546_v22, %v545_v21 }
  0x50   : > { %4634 = vmatmul.mubr.msk.bf16.gmra.mrb[12].mxu0 %vm586_vm1, %v560_v27  ;;  %v549_v27 = vld [vmem:[%s10559_s7 + $0x1e0] sm:$0xff] }
  0x51   : > { %4637 = vmatprep.mubr.msk.bf16.mxu0 %vm586_vm1, %v561_v28  ;;  %v550_v28 = vld [vmem:[%s10559_s7 + $0x1e8] sm:$0xff] }
  0x52   : > { %v583_v30 = vpack.c.bf16 %v550_v28, %v549_v27 }
  0x58   : > { %4638 = vmatmul.mubr.msk.bf16.gmra.mrb[16].mxu0 %vm586_vm1, %v562_v33  ;;  %v584_v33 = vpack.c.bf16 %v552_v32, %v551_v31 }
  0x59   : > { %4641 = vmatprep.mubr.msk.bf16.mxu0 %vm586_vm1, %v563_v34 }
  0x60   : > { %4642 = vmatmul.mubr.msk.bf16.gmra.mrb[20].mxu0 %vm586_vm1, %v564_v39 }
  0x61   : > { %4645 = vmatprep.mubr.msk.bf16.mxu0 %vm586_vm1, %v565_v40 }
  0x68   : > { %4646 = vmatmul.mubr.msk.bf16.gmra.mrb[24].mxu0 %vm586_vm1, %v566_v45 }
  0x69   : > { %4649 = vmatprep.mubr.msk.bf16.mxu0 %vm586_vm1, %v567_v46 }
  0x70   : > { %4650 = vmatmul.mubr.msk.bf16.gmra.mrb[28].mxu0 %vm586_vm1, %v568_v51 }
  0x71   : > { %4653 = vmatprep.mubr.msk.bf16.mxu0 %vm586_vm1, %v569_v52 }
  0x78   : > { %4654 = vmatmul.mubr.msk.bf16.gmra.mrb[32].mxu0 %vm586_vm1, %v570_v57 }
  0x79   : > { %4657 = vmatprep.mubr.msk.bf16.mxu0 %vm586_vm1, %v571_v58 }
  0x80   : > { %4658 = vmatmul.mubr.msk.bf16.gmra.mrb[36].mxu0 %vm586_vm1, %v572_v63 }
  0x81   : > { %4661 = vmatprep.mubr.msk.bf16.mxu0 %vm586_vm1, %v573_v0 }
  0x88   : > { %4662 = vmatmul.mubr.msk.bf16.gmra.mrb[40].mxu0 %vm586_vm1, %v574_v5 }
  0x89   : > { %4665 = vmatprep.mubr.msk.bf16.mxu0 %vm586_vm1, %v575_v6 }
  0x90   : > { %4666 = vmatmul.mubr.msk.bf16.gmra.mrb[44].mxu0 %vm586_vm1, %v576_v11 }
  0x91   : > { %4669 = vmatprep.mubr.msk.bf16.mxu0 %vm586_vm1, %v577_v12 }
  0x98   : > { %4670 = vmatmul.mubr.msk.bf16.gmra.mrb[48].mxu0 %vm586_vm1, %v578_v17 }
  0x99   : > { %4673 = vmatprep.mubr.msk.bf16.mxu0 %vm586_vm1, %v579_v18 }
  0xa0   : > { %4674 = vmatmul.mubr.msk.bf16.gmra.mrb[52].mxu0 %vm586_vm1, %v580_v23 }
  0xa1   : > { %4677 = vmatprep.mubr.msk.bf16.mxu0 %vm586_vm1, %v581_v24 }
  0xa8   : > { %4678 = vmatmul.mubr.msk.bf16.gmra.mrb[56].mxu0 %vm586_vm1, %v582_v29 }
  0xa9   : > { %4681 = vmatprep.mubr.msk.bf16.mxu0 %vm586_vm1, %v583_v30 }
  0xb0   : > { %4682 = vmatmul.mubr.msk.bf16.gmra.mrb[60].mxu0 %vm586_vm1, %v584_v33 }
 0x10b   : > { %v5795_v34 = vpop.f32.mrb[0].mxu0 }
 0x10c   : > { %v5797_v35 = vpop.f32.mrb[1].mxu0  ;;  %v982_v41 = vsel %vm978_vm2, %v5795_v34, 0.0 }
 0x10d   : > { %v5799_v36 = vpop.f32.mrb[2].mxu0  ;;  %v979_v38 = vsel %vm978_vm2, %v5797_v35, 0.0 }
 0x10e   : > { %v5801_v37 = vpop.f32.mrb[3].mxu0  ;;  %v984_v43 = vsel %vm978_vm2, %v5799_v36, 0.0 }
 0x10f   : > { %v980_v39 = vsel %vm978_vm2, %v5801_v37, 0.0 }
 0x110   : > { %v981_v40 = vadd.f32 %v980_v39, %v979_v38 }
 0x112   : > { %v983_v42 = vadd.f32 %v982_v41, %v981_v40 }
 0x113   : > { %v5811_v44 = vpop.f32.mrb[4].mxu0 }
 0x114   : > { %v5813_v45 = vpop.f32.mrb[5].mxu0  ;;  %v985_v46 = vadd.f32 %v984_v43, %v983_v42  ;;  %v990_v53 = vsel %vm978_vm2, %v5811_v44, 0.0 }
 0x115   : > { %v986_v47 = vsel %vm978_vm2, %v5813_v45, 0.0  ;;  %v5817_v48 = vpop.f32.mrb[6].mxu0 }
 0x116   : > { %v987_v49 = vadd.f32 %v986_v47, %v985_v46  ;;  %v5819_v50 = vpop.f32.mrb[7].mxu0  ;;  %v992_v55 = vsel %vm978_vm2, %v5817_v48, 0.0 }
 0x117   : > { %v988_v51 = vsel %vm978_vm2, %v5819_v50, 0.0 }
 0x118   : > { %v989_v52 = vadd.f32 %v988_v51, %v987_v49 }
 0x11a   : > { %v991_v54 = vadd.f32 %v990_v53, %v989_v52 }
 0x11b   : > { %v5827_v56 = vpop.f32.mrb[8].mxu0 }
 0x11c   : > { %v5829_v57 = vpop.f32.mrb[9].mxu0  ;;  %v993_v58 = vadd.f32 %v992_v55, %v991_v54  ;;  %v998_v1 = vsel %vm978_vm2, %v5827_v56, 0.0 }
 0x11d   : > { %v994_v59 = vsel %vm978_vm2, %v5829_v57, 0.0  ;;  %v5833_v60 = vpop.f32.mrb[10].mxu0 }
 0x11e   : > { %v995_v61 = vadd.f32 %v994_v59, %v993_v58  ;;  %v5835_v62 = vpop.f32.mrb[11].mxu0  ;;  %v1000_v3 = vsel %vm978_vm2, %v5833_v60, 0.0 }
 0x11f   : > { %v996_v63 = vsel %vm978_vm2, %v5835_v62, 0.0 }
 0x120   : > { %v997_v0 = vadd.f32 %v996_v63, %v995_v61 }
 0x122   : > { %v999_v2 = vadd.f32 %v998_v1, %v997_v0 }
 0x123   : > { %v5843_v4 = vpop.f32.mrb[12].mxu0 }
 0x124   : > { %v5845_v5 = vpop.f32.mrb[13].mxu0  ;;  %v1001_v6 = vadd.f32 %v1000_v3, %v999_v2  ;;  %v1006_v13 = vsel %vm978_vm2, %v5843_v4, 0.0 }
 0x125   : > { %v1002_v7 = vsel %vm978_vm2, %v5845_v5, 0.0  ;;  %v5849_v8 = vpop.f32.mrb[14].mxu0 }
 0x126   : > { %v1003_v9 = vadd.f32 %v1002_v7, %v1001_v6  ;;  %v5851_v10 = vpop.f32.mrb[15].mxu0  ;;  %v1008_v15 = vsel %vm978_vm2, %v5849_v8, 0.0 }
 0x127   : > { %v1004_v11 = vsel %vm978_vm2, %v5851_v10, 0.0 }
 0x128   : > { %v1005_v12 = vadd.f32 %v1004_v11, %v1003_v9 }
 0x12a   : > { %v1007_v14 = vadd.f32 %v1006_v13, %v1005_v12 }
 0x12b   : > { %v5859_v16 = vpop.f32.mrb[16].mxu0 }
 0x12c   : > { %v5861_v17 = vpop.f32.mrb[17].mxu0  ;;  %v1009_v18 = vadd.f32 %v1008_v15, %v1007_v14  ;;  %v1014_v25 = vsel %vm978_vm2, %v5859_v16, 0.0 }
 0x12d   : > { %v1010_v19 = vsel %vm978_vm2, %v5861_v17, 0.0  ;;  %v5865_v20 = vpop.f32.mrb[18].mxu0 }
 0x12e   : > { %v1011_v21 = vadd.f32 %v1010_v19, %v1009_v18  ;;  %v5867_v22 = vpop.f32.mrb[19].mxu0  ;;  %v1016_v27 = vsel %vm978_vm2, %v5865_v20, 0.0 }
 0x12f   : > { %v1012_v23 = vsel %vm978_vm2, %v5867_v22, 0.0 }
 0x130   : > { %v1013_v24 = vadd.f32 %v1012_v23, %v1011_v21 }
 0x132   : > { %v1015_v26 = vadd.f32 %v1014_v25, %v1013_v24 }
 0x133   : > { %v5875_v28 = vpop.f32.mrb[20].mxu0 }
 0x134   : > { %v5877_v29 = vpop.f32.mrb[21].mxu0  ;;  %v1017_v30 = vadd.f32 %v1016_v27, %v1015_v26  ;;  %v1022_v41 = vsel %vm978_vm2, %v5875_v28, 0.0 }
 0x135   : > { %v1018_v31 = vsel %vm978_vm2, %v5877_v29, 0.0  ;;  %v5881_v32 = vpop.f32.mrb[22].mxu0 }
 0x136   : > { %v1019_v33 = vadd.f32 %v1018_v31, %v1017_v30  ;;  %v5883_v38 = vpop.f32.mrb[23].mxu0  ;;  %v1024_v43 = vsel %vm978_vm2, %v5881_v32, 0.0 }
 0x137   : > { %v1020_v39 = vsel %vm978_vm2, %v5883_v38, 0.0 }
 0x138   : > { %v1021_v40 = vadd.f32 %v1020_v39, %v1019_v33 }
 0x13a   : > { %v1023_v42 = vadd.f32 %v1022_v41, %v1021_v40 }
 0x13b   : > { %v5891_v46 = vpop.f32.mrb[24].mxu0 }
 0x13c   : > { %v5893_v47 = vpop.f32.mrb[25].mxu0  ;;  %v1025_v49 = vadd.f32 %v1024_v43, %v1023_v42  ;;  %v1030_v59 = vsel %vm978_vm2, %v5891_v46, 0.0 }
 0x13d   : > { %v1026_v51 = vsel %vm978_vm2, %v5893_v47, 0.0  ;;  %v5897_v52 = vpop.f32.mrb[26].mxu0 }
 0x13e   : > { %v1027_v53 = vadd.f32 %v1026_v51, %v1025_v49  ;;  %v5899_v54 = vpop.f32.mrb[27].mxu0  ;;  %v1032_v63 = vsel %vm978_vm2, %v5897_v52, 0.0 }
 0x13f   : > { %v1028_v55 = vsel %vm978_vm2, %v5899_v54, 0.0 }
 0x140   : > { %v1029_v58 = vadd.f32 %v1028_v55, %v1027_v53 }
 0x142   : > { %v1031_v61 = vadd.f32 %v1030_v59, %v1029_v58 }
 0x143   : > { %v5907_v0 = vpop.f32.mrb[28].mxu0 }
 0x144   : > { %v5909_v1 = vpop.f32.mrb[29].mxu0  ;;  %v1033_v2 = vadd.f32 %v1032_v63, %v1031_v61  ;;  %v1038_v13 = vsel %vm978_vm2, %v5907_v0, 0.0 }
 0x145   : > { %v1034_v3 = vsel %vm978_vm2, %v5909_v1, 0.0  ;;  %v5913_v6 = vpop.f32.mrb[30].mxu0 }
 0x146   : > { %v1035_v7 = vadd.f32 %v1034_v3, %v1033_v2  ;;  %v5915_v9 = vpop.f32.mrb[31].mxu0  ;;  %v1040_v15 = vsel %vm978_vm2, %v5913_v6, 0.0 }
 0x147   : > { %v1036_v11 = vsel %vm978_vm2, %v5915_v9, 0.0 }
 0x148   : > { %v1037_v12 = vadd.f32 %v1036_v11, %v1035_v7 }
 0x14a   : > { %v1039_v14 = vadd.f32 %v1038_v13, %v1037_v12 }
 0x14b   : > { %v5923_v18 = vpop.f32.mrb[32].mxu0 }
 0x14c   : > { %v5925_v19 = vpop.f32.mrb[33].mxu0  ;;  %v1041_v21 = vadd.f32 %v1040_v15, %v1039_v14  ;;  %v1046_v31 = vsel %vm978_vm2, %v5923_v18, 0.0 }
 0x14d   : > { %v1042_v23 = vsel %vm978_vm2, %v5925_v19, 0.0  ;;  %v5929_v24 = vpop.f32.mrb[34].mxu0 }
 0x14e   : > { %v1043_v25 = vadd.f32 %v1042_v23, %v1041_v21  ;;  %v5931_v26 = vpop.f32.mrb[35].mxu0  ;;  %v1048_v39 = vsel %vm978_vm2, %v5929_v24, 0.0 }
 0x14f   : > { %v1044_v27 = vsel %vm978_vm2, %v5931_v26, 0.0 }
 0x150   : > { %v1045_v30 = vadd.f32 %v1044_v27, %v1043_v25 }
 0x152   : > { %v1047_v33 = vadd.f32 %v1046_v31, %v1045_v30 }
 0x153   : > { %v5939_v40 = vpop.f32.mrb[36].mxu0 }
 0x154   : > { %v5941_v41 = vpop.f32.mrb[37].mxu0  ;;  %v1049_v42 = vadd.f32 %v1048_v39, %v1047_v33  ;;  %v1054_v59 = vsel %vm978_vm2, %v5939_v40, 0.0 }
 0x155   : > { %v1050_v43 = vsel %vm978_vm2, %v5941_v41, 0.0  ;;  %v5945_v49 = vpop.f32.mrb[38].mxu0 }
 0x156   : > { %v1051_v51 = vadd.f32 %v1050_v43, %v1049_v42  ;;  %v5947_v53 = vpop.f32.mrb[39].mxu0  ;;  %v1056_v63 = vsel %vm978_vm2, %v5945_v49, 0.0 }
 0x157   : > { %v1052_v55 = vsel %vm978_vm2, %v5947_v53, 0.0 }
 0x158   : > { %v1053_v58 = vadd.f32 %v1052_v55, %v1051_v51 }
 0x15a   : > { %v1055_v61 = vadd.f32 %v1054_v59, %v1053_v58 }
 0x15b   : > { %v5955_v2 = vpop.f32.mrb[40].mxu0 }
 0x15c   : > { %v5957_v3 = vpop.f32.mrb[41].mxu0  ;;  %v1057_v7 = vadd.f32 %v1056_v63, %v1055_v61  ;;  %v1062_v23 = vsel %vm978_vm2, %v5955_v2, 0.0 }
 0x15d   : > { %v1058_v11 = vsel %vm978_vm2, %v5957_v3, 0.0  ;;  %v5961_v12 = vpop.f32.mrb[42].mxu0 }
 0x15e   : > { %v1059_v13 = vadd.f32 %v1058_v11, %v1057_v7  ;;  %v5963_v14 = vpop.f32.mrb[43].mxu0  ;;  %v1064_v27 = vsel %vm978_vm2, %v5961_v12, 0.0 }
 0x15f   : > { %v1060_v15 = vsel %vm978_vm2, %v5963_v14, 0.0 }
 0x160   : > { %v1061_v21 = vadd.f32 %v1060_v15, %v1059_v13 }
 0x162   : > { %v1063_v25 = vadd.f32 %v1062_v23, %v1061_v21 }
 0x163   : > { %v5971_v30 = vpop.f32.mrb[44].mxu0 }
 0x164   : > { %v5973_v31 = vpop.f32.mrb[45].mxu0  ;;  %v1065_v33 = vadd.f32 %v1064_v27, %v1063_v25  ;;  %v1070_v59 = vsel %vm978_vm2, %v5971_v30, 0.0 }
 0x165   : > { %v1066_v39 = vsel %vm978_vm2, %v5973_v31, 0.0  ;;  %v5977_v42 = vpop.f32.mrb[46].mxu0 }
 0x166   : > { %10833 = vst [vmem:[#allocation5_spill] sm:$0xff] %v5977_v42  ;;  %v1067_v43 = vadd.f32 %v1066_v39, %v1065_v33  ;;  %v5979_v51 = vpop.f32.mrb[47].mxu0  ;;  %v1072_v63 = vsel %vm978_vm2, %v5977_v42, 0.0 }
 0x167   : > { %v1068_v55 = vsel %vm978_vm2, %v5979_v51, 0.0 }
 0x168   : > { %v1069_v58 = vadd.f32 %v1068_v55, %v1067_v43 }
 0x16a   : > { %v1071_v61 = vadd.f32 %v1070_v59, %v1069_v58 }
 0x16b   : > { %v5987_v7 = vpop.f32.mrb[48].mxu0 }
 0x16c   : > { %10834 = vst [vmem:[#allocation6_spill] sm:$0xff] %v5987_v7  ;;  %v5989_v11 = vpop.f32.mrb[49].mxu0  ;;  %v1073_v13 = vadd.f32 %v1072_v63, %v1071_v61  ;;  %v1078_v39 = vsel %vm978_vm2, %v5987_v7, 0.0 }
 0x16d   : > { %10835 = vst [vmem:[#allocation7_spill] sm:$0xff] %v5989_v11  ;;  %v1074_v15 = vsel %vm978_vm2, %v5989_v11, 0.0  ;;  %v5993_v21 = vpop.f32.mrb[50].mxu0 }
 0x16e   : > { %10836 = vst [vmem:[#allocation8_spill] sm:$0xff] %v5993_v21  ;;  %v1075_v23 = vadd.f32 %v1074_v15, %v1073_v13  ;;  %v5995_v25 = vpop.f32.mrb[51].mxu0  ;;  %v1080_v55 = vsel %vm978_vm2, %v5993_v21, 0.0 }
 0x16f   : > { %10837 = vst [vmem:[#allocation9_spill] sm:$0xff] %v5995_v25  ;;  %v1076_v27 = vsel %vm978_vm2, %v5995_v25, 0.0 }
 0x170   : > { %v1077_v33 = vadd.f32 %v1076_v27, %v1075_v23 }
 0x172   : > { %v1079_v43 = vadd.f32 %v1078_v39, %v1077_v33 }
 0x173   : > { %v6003_v58 = vpop.f32.mrb[52].mxu0 }
 0x174   : > { %10838 = vst [vmem:[#allocation10_spill] sm:$0xff] %v6003_v58  ;;  %v6005_v59 = vpop.f32.mrb[53].mxu0  ;;  %v1081_v61 = vadd.f32 %v1080_v55, %v1079_v43  ;;  %v1086_v33 = vsel %vm978_vm2, %v6003_v58, 0.0 }
 0x175   : > { %10839 = vst [vmem:[#allocation11_spill] sm:$0xff] %v6005_v59  ;;  %v1082_v63 = vsel %vm978_vm2, %v6005_v59, 0.0  ;;  %v6009_v13 = vpop.f32.mrb[54].mxu0 }
 0x176   : > { %10840 = vst [vmem:[#allocation12_spill] sm:$0xff] %v6009_v13  ;;  %v1083_v15 = vadd.f32 %v1082_v63, %v1081_v61  ;;  %v6011_v25 = vpop.f32.mrb[55].mxu0  ;;  %v1088_v21 = vsel %vm978_vm2, %v6009_v13, 0.0 }
 0x177   : > { %10841 = vst [vmem:[#allocation13_spill] sm:$0xff] %v6011_v25  ;;  %v1084_v23 = vsel %vm978_vm2, %v6011_v25, 0.0 }
 0x178   : > { %v1085_v27 = vadd.f32 %v1084_v23, %v1083_v15 }
 0x17a   : > { %v1087_v39 = vadd.f32 %v1086_v33, %v1085_v27 }
 0x17b   : > { %v6019_v43 = vpop.f32.mrb[56].mxu0 }
 0x17c   : > { %10842 = vst [vmem:[#allocation14_spill] sm:$0xff] %v6019_v43  ;;  %v6021_v55 = vpop.f32.mrb[57].mxu0  ;;  %v1089_v59 = vadd.f32 %v1088_v21, %v1087_v39  ;;  %v1094_v27 = vsel %vm978_vm2, %v6019_v43, 0.0 }
 0x17d   : > { %10843 = vst [vmem:[#allocation15_spill] sm:$0xff] %v6021_v55  ;;  %v1090_v61 = vsel %vm978_vm2, %v6021_v55, 0.0  ;;  %v6025_v63 = vpop.f32.mrb[58].mxu0 }
 0x17e   : > { %10844 = vst [vmem:[#allocation16_spill] sm:$0xff] %v6025_v63  ;;  %v1091_v7 = vadd.f32 %v1090_v61, %v1089_v59  ;;  %v6027_v25 = vpop.f32.mrb[59].mxu0  ;;  %v1096_v13 = vsel %vm978_vm2, %v6025_v63, 0.0 }
 0x17f   : > { %10845 = vst [vmem:[#allocation17_spill] sm:$0xff] %v6027_v25  ;;  %v1092_v15 = vsel %vm978_vm2, %v6027_v25, 0.0 }
 0x180   : > { %v1093_v23 = vadd.f32 %v1092_v15, %v1091_v7 }
 0x182   : > { %v1095_v33 = vadd.f32 %v1094_v27, %v1093_v23 }
 0x183   : > { %v6035_v21 = vpop.f32.mrb[60].mxu0 }
 0x184   : > { %v6037_v39 = vpop.f32.mrb[61].mxu0  ;;  %v1097_v55 = vadd.f32 %v1096_v13, %v1095_v33  ;;  %v1102_v23 = vsel %vm978_vm2, %v6035_v21, 0.0 }
 0x185   : > { %10846 = vst [vmem:[#allocation18_spill] sm:$0xff] %v6037_v39  ;;  %v1098_v59 = vsel %vm978_vm2, %v6037_v39, 0.0  ;;  %v6041_v61 = vpop.f32.mrb[62].mxu0 }
 0x186   : > { %v1099_v58 = vadd.f32 %v1098_v59, %v1097_v55  ;;  %v6043_v25 = vpop.f32.mrb[63].mxu0  ;;  %v1104_v63 = vsel %vm978_vm2, %v6041_v61, 0.0 }
 0x187   : > { %10847 = vst [vmem:[#allocation19_spill] sm:$0xff] %v6043_v25  ;;  %v1100_v7 = vsel %vm978_vm2, %v6043_v25, 0.0 }
 0x188   : > { %v1101_v15 = vadd.f32 %v1100_v7, %v1099_v58 }
 0x18a   : > { %v1103_v27 = vadd.f32 %v1102_v23, %v1101_v15  ;;  %v10869_v15 = vld [vmem:[#allocation6_spill] sm:$0xff]  ;;  %v10871_v23 = vld [vmem:[#allocation8_spill] sm:$0xff] }
 0x18c   : > { %v1105_v13 = vadd.f32 %v1104_v63, %v1103_v27  ;;  %v10873_v27 = vld [vmem:[#allocation11_spill] sm:$0xff] }
 0x18e   : > { %v1106_v33 = vrot.slane %v1105_v13, 4 }
 0x190   : > { %v1107_v43 = vadd.f32 %v1106_v33, %v1105_v13  ;;  %v10875_v33 = vld [vmem:[#allocation13_spill] sm:$0xff] }
 0x192   : > { %v1108_v39 = vrot.slane %v1107_v43, 2 }
 0x194   : > { %v1109_v11 = vadd.f32 %v1108_v39, %v1107_v43  ;;  %v10867_v43 = vld [vmem:[#allocation7_spill] sm:$0xff]  ;;  %v10868_v39 = vld [vmem:[#allocation9_spill] sm:$0xff] }
 0x196   : > { %v1110_v42 = vrot.slane %v1109_v11, 1 }
 0x198   : > { %v1111_v55 = vadd.f32 %v1110_v42, %v1109_v11  ;;  %v10866_v11 = vld [vmem:[#allocation5_spill] sm:$0xff] }
 0x19a   : > { %v6051_v59 = vmul.f32 0.001953125, %v1111_v55 }
 0x19c   : > { %v6055_v25 = vsub.f32 %v5797_v35, %v6051_v59  ;;  %v6059_v58 = vsub.f32 %v5801_v37, %v6051_v59  ;;  %v6063_v7 = vsub.f32 %v5795_v34, %v6051_v59  ;;  %v6067_v63 = vsub.f32 %v5799_v36, %v6051_v59 }
 0x19d   : > { %v6071_v42 = vsub.f32 %v5813_v45, %v6051_v59  ;;  %v6075_v35 = vsub.f32 %v5819_v50, %v6051_v59  ;;  %v6079_v37 = vsub.f32 %v5811_v44, %v6051_v59  ;;  %v6083_v34 = vsub.f32 %v5817_v48, %v6051_v59 }
 0x19e   : > { %10848 = vst [vmem:[#allocation20_spill] sm:$0xff] %v6055_v25  ;;  %10849 = vst [vmem:[#allocation21_spill] sm:$0xff] %v6059_v58  ;;  %v6087_v36 = vsub.f32 %v5829_v57, %v6051_v59  ;;  %v6091_v45 = vsub.f32 %v5835_v62, %v6051_v59  ;;  %v6095_v50 = vsub.f32 %v5827_v56, %v6051_v59 }
 0x19f   : > { %10850 = vst [vmem:[#allocation22_spill] sm:$0xff] %v6063_v7  ;;  %10851 = vst [vmem:[#allocation23_spill] sm:$0xff] %v6067_v63  ;;  %v6099_v44 = vsub.f32 %v5833_v60, %v6051_v59  ;;  %v6103_v48 = vsub.f32 %v5845_v5, %v6051_v59  ;;  %v6107_v57 = vsub.f32 %v5851_v10, %v6051_v59 }
 0x1a0   : > { %10852 = vst [vmem:[#allocation24_spill] sm:$0xff] %v6079_v37  ;;  %10853 = vst [vmem:[#allocation25_spill] sm:$0xff] %v6083_v34  ;;  %v6111_v62 = vsub.f32 %v5843_v4, %v6051_v59  ;;  %v6115_v56 = vsub.f32 %v5849_v8, %v6051_v59  ;;  %v6119_v60 = vsub.f32 %v5861_v17, %v6051_v59 }
 0x1a1   : > { %10854 = vst [vmem:[#allocation26_spill] sm:$0xff] %v6087_v36  ;;  %10855 = vst [vmem:[#allocation27_spill] sm:$0xff] %v6091_v45  ;;  %v6123_v5 = vsub.f32 %v5867_v22, %v6051_v59  ;;  %v6127_v10 = vsub.f32 %v5859_v16, %v6051_v59  ;;  %v6131_v4 = vsub.f32 %v5865_v20, %v6051_v59 }
 0x1a2   : > { %10856 = vst [vmem:[#allocation28_spill] sm:$0xff] %v6095_v50  ;;  %10857 = vst [vmem:[#allocation29_spill] sm:$0xff] %v6099_v44  ;;  %v6135_v8 = vsub.f32 %v5877_v29, %v6051_v59  ;;  %v6139_v17 = vsub.f32 %v5883_v38, %v6051_v59  ;;  %v6143_v22 = vsub.f32 %v5875_v28, %v6051_v59 }
 0x1a3   : > { %10858 = vst [vmem:[#allocation30_spill] sm:$0xff] %v6103_v48  ;;  %10859 = vst [vmem:[#allocation31_spill] sm:$0xff] %v6107_v57  ;;  %v6147_v16 = vsub.f32 %v5881_v32, %v6051_v59  ;;  %v6151_v20 = vsub.f32 %v5893_v47, %v6051_v59  ;;  %v6155_v29 = vsub.f32 %v5899_v54, %v6051_v59 }
 0x1a4   : > { %10860 = vst [vmem:[#allocation32_spill] sm:$0xff] %v6111_v62  ;;  %10861 = vst [vmem:[#allocation33_spill] sm:$0xff] %v6115_v56  ;;  %v6159_v38 = vsub.f32 %v5891_v46, %v6051_v59  ;;  %v6163_v28 = vsub.f32 %v5897_v52, %v6051_v59  ;;  %v6167_v32 = vsub.f32 %v5909_v1, %v6051_v59 }
 0x1a5   : > { %10862 = vst [vmem:[#allocation34_spill] sm:$0xff] %v6119_v60  ;;  %10863 = vst [vmem:[#allocation35_spill] sm:$0xff] %v6123_v5  ;;  %v6171_v47 = vsub.f32 %v5915_v9, %v6051_v59  ;;  %v6175_v54 = vsub.f32 %v5907_v0, %v6051_v59  ;;  %v6179_v46 = vsub.f32 %v5913_v6, %v6051_v59 }
 0x1a6   : > { %10864 = vst [vmem:[#allocation36_spill] sm:$0xff] %v6135_v8  ;;  %10865 = vst [vmem:[#allocation37_spill] sm:$0xff] %v6139_v17  ;;  %v6183_v52 = vsub.f32 %v5925_v19, %v6051_v59  ;;  %v6187_v1 = vsub.f32 %v5931_v26, %v6051_v59  ;;  %v6191_v9 = vsub.f32 %v5923_v18, %v6051_v59 }
 0x1a7   : > { %v6195_v0 = vsub.f32 %v5929_v24, %v6051_v59  ;;  %v6199_v6 = vsub.f32 %v5941_v41, %v6051_v59  ;;  %v6203_v19 = vsub.f32 %v5947_v53, %v6051_v59  ;;  %v6207_v26 = vsub.f32 %v5939_v40, %v6051_v59 }
 0x1a8   : > { %v6211_v18 = vsub.f32 %v5945_v49, %v6051_v59  ;;  %v6215_v24 = vsub.f32 %v5957_v3, %v6051_v59  ;;  %v6219_v41 = vsub.f32 %v5963_v14, %v6051_v59  ;;  %v6223_v53 = vsub.f32 %v5955_v2, %v6051_v59 }
 0x1a9   : > { %v6227_v40 = vsub.f32 %v5961_v12, %v6051_v59  ;;  %v6231_v49 = vsub.f32 %v5973_v31, %v6051_v59  ;;  %v6235_v3 = vsub.f32 %v5979_v51, %v6051_v59  ;;  %v6239_v14 = vsub.f32 %v5971_v30, %v6051_v59 }
 0x1aa   : > { %v6243_v2 = vsub.f32 %v10866_v11, %v6051_v59  ;;  %v6247_v12 = vsub.f32 %v10867_v43, %v6051_v59  ;;  %v6251_v31 = vsub.f32 %v10868_v39, %v6051_v59  ;;  %v6255_v51 = vsub.f32 %v10869_v15, %v6051_v59  ;;  %v10877_v11 = vld [vmem:[#allocation10_spill] sm:$0xff]  ;;  %v10879_v39 = vld [vmem:[#allocation12_spill] sm:$0xff] }
 0x1ab   : > { %v6259_v30 = vsub.f32 %v10871_v23, %v6051_v59  ;;  %v6263_v13 = vsub.f32 %v10873_v27, %v6051_v59  ;;  %v6267_v55 = vsub.f32 %v10875_v33, %v6051_v59  ;;  %v6271_v43 = vsub.f32 %v10877_v11, %v6051_v59 }
 0x1ac   : > { %10870 = vst [vmem:[#allocation5_spill] sm:$0xff] %v6255_v51  ;;  %v6275_v15 = vsub.f32 %v10879_v39, %v6051_v59  ;;  %v10881_v51 = vld [vmem:[#allocation15_spill] sm:$0xff] }
 0x1ad   : > { %10872 = vst [vmem:[#allocation7_spill] sm:$0xff] %v6259_v30  ;;  %10874 = vst [vmem:[#allocation9_spill] sm:$0xff] %v6263_v13  ;;  %v6279_v23 = vsub.f32 %v10881_v51, %v6051_v59  ;;  %v10882_v30 = vld [vmem:[#allocation17_spill] sm:$0xff]  ;;  %v10883_v13 = vld [vmem:[#allocation14_spill] sm:$0xff] }
 0x1ae   : > { %10876 = vst [vmem:[#allocation6_spill] sm:$0xff] %v6267_v55  ;;  %10878 = vst [vmem:[#allocation8_spill] sm:$0xff] %v6271_v43  ;;  %v6283_v27 = vsub.f32 %v10882_v30, %v6051_v59  ;;  %v6287_v33 = vsub.f32 %v10883_v13, %v6051_v59  ;;  %v10884_v55 = vld [vmem:[#allocation16_spill] sm:$0xff]  ;;  %v10886_v43 = vld [vmem:[#allocation18_spill] sm:$0xff]  ;;  %v6303_v30 = vsub.f32 %v6035_v21, %v6051_v59 }
 0x1af   : > { %10880 = vst [vmem:[#allocation11_spill] sm:$0xff] %v6275_v15  ;;  %v6291_v11 = vsub.f32 %v10884_v55, %v6051_v59  ;;  %v6295_v39 = vsub.f32 %v10886_v43, %v6051_v59  ;;  %v10888_v15 = vld [vmem:[#allocation19_spill] sm:$0xff]  ;;  %v6307_v13 = vsub.f32 %v6041_v61, %v6051_v59  ;;  %v1177_v55 = vmul.f32 %v6055_v25, %v6055_v25 }
 0x1b0   : > { %v6299_v51 = vsub.f32 %v10888_v15, %v6051_v59  ;;  %10890 = vst [vmem:[#allocation15_spill] sm:$0xff] %v6303_v30  ;;  %v1179_v43 = vmul.f32 %v6063_v7, %v6063_v7  ;;  %v1180_v15 = vmul.f32 %v6067_v63, %v6067_v63  ;;  %v1181_v61 = vmul.f32 %v6071_v42, %v6071_v42 }
 0x1b1   : > { %10885 = vst [vmem:[#allocation13_spill] sm:$0xff] %v6291_v11  ;;  %10887 = vst [vmem:[#allocation10_spill] sm:$0xff] %v6295_v39  ;;  %v1178_v11 = vmul.f32 %v6059_v58, %v6059_v58  ;;  %v1182_v58 = vmul.f32 %v6075_v35, %v6075_v35  ;;  %v1183_v63 = vmul.f32 %v6079_v37, %v6079_v37 }
 0x1b2   : > { %10889 = vst [vmem:[#allocation12_spill] sm:$0xff] %v6299_v51  ;;  %10891 = vst [vmem:[#allocation17_spill] sm:$0xff] %v6307_v13  ;;  %v1241_v51 = vsel %vm978_vm2, %v1177_v55, 0.0  ;;  %v1244_v59 = vsel %vm978_vm2, %v1179_v43, 0.0  ;;  %v1246_v13 = vsel %vm978_vm2, %v1180_v15, 0.0  ;;  %v1248_v55 = vsel %vm978_vm2, %v1181_v61, 0.0 }
 0x1b3   : > { %v1242_v21 = vsel %vm978_vm2, %v1178_v11, 0.0  ;;  %v1184_v11 = vmul.f32 %v6083_v34, %v6083_v34  ;;  %v1252_v43 = vsel %vm978_vm2, %v1183_v63, 0.0  ;;  %v1189_v63 = vmul.f32 %v6103_v48, %v6103_v48 }
 0x1b4   : > { %v1243_v30 = vadd.f32 %v1242_v21, %v1241_v51  ;;  %v1250_v51 = vsel %vm978_vm2, %v1182_v58, 0.0  ;;  %v1188_v58 = vmul.f32 %v6099_v44, %v6099_v44 }
 0x1b6   : > { %v1245_v25 = vadd.f32 %v1244_v59, %v1243_v30  ;;  %v1185_v30 = vmul.f32 %v6087_v36, %v6087_v36 }
 0x1b8   : > { %v1247_v7 = vadd.f32 %v1246_v13, %v1245_v25  ;;  %v1186_v25 = vmul.f32 %v6091_v45, %v6091_v45  ;;  %v1254_v13 = vsel %vm978_vm2, %v1184_v11, 0.0  ;;  %v1256_v61 = vsel %vm978_vm2, %v1185_v30, 0.0 }
 0x1b9   : > { %v1190_v11 = vmul.f32 %v6107_v57, %v6107_v57  ;;  %v1191_v30 = vmul.f32 %v6111_v62, %v6111_v62 }
 0x1ba   : > { %v1249_v39 = vadd.f32 %v1248_v55, %v1247_v7  ;;  %v1187_v7 = vmul.f32 %v6095_v50, %v6095_v50 }
 0x1bc   : > { %v1251_v21 = vadd.f32 %v1250_v51, %v1249_v39  ;;  %v1258_v39 = vsel %vm978_vm2, %v1186_v25, 0.0  ;;  %v1192_v25 = vmul.f32 %v6115_v56, %v6115_v56 }
 0x1be   : > { %v1253_v59 = vadd.f32 %v1252_v43, %v1251_v21  ;;  %v1260_v21 = vsel %vm978_vm2, %v1187_v7, 0.0  ;;  %v1193_v7 = vmul.f32 %v6119_v60, %v6119_v60 }
 0x1c0   : > { %v1255_v15 = vadd.f32 %v1254_v13, %v1253_v59  ;;  %v1262_v59 = vsel %vm978_vm2, %v1188_v58, 0.0  ;;  %v1194_v58 = vmul.f32 %v6123_v5, %v6123_v5 }
 0x1c2   : > { %v1257_v55 = vadd.f32 %v1256_v61, %v1255_v15  ;;  %v1264_v15 = vsel %vm978_vm2, %v1189_v63, 0.0  ;;  %v1195_v63 = vmul.f32 %v6127_v10, %v6127_v10 }
 0x1c4   : > { %v1259_v51 = vadd.f32 %v1258_v39, %v1257_v55  ;;  %v1266_v55 = vsel %vm978_vm2, %v1190_v11, 0.0  ;;  %v1196_v11 = vmul.f32 %v6131_v4, %v6131_v4 }
 0x1c6   : > { %v1261_v43 = vadd.f32 %v1260_v21, %v1259_v51  ;;  %v1268_v51 = vsel %vm978_vm2, %v1191_v30, 0.0  ;;  %v1197_v30 = vmul.f32 %v6135_v8, %v6135_v8 }
 0x1c8   : > { %v1263_v13 = vadd.f32 %v1262_v59, %v1261_v43  ;;  %v1270_v43 = vsel %vm978_vm2, %v1192_v25, 0.0  ;;  %v1198_v25 = vmul.f32 %v6139_v17, %v6139_v17 }
 0x1ca   : > { %v1265_v61 = vadd.f32 %v1264_v15, %v1263_v13  ;;  %v1272_v13 = vsel %vm978_vm2, %v1193_v7, 0.0  ;;  %v1199_v7 = vmul.f32 %v6143_v22, %v6143_v22 }
 0x1cc   : > { %v1267_v39 = vadd.f32 %v1266_v55, %v1265_v61  ;;  %v1274_v61 = vsel %vm978_vm2, %v1194_v58, 0.0  ;;  %v1200_v58 = vmul.f32 %v6147_v16, %v6147_v16 }
 0x1ce   : > { %v1269_v21 = vadd.f32 %v1268_v51, %v1267_v39  ;;  %v1276_v39 = vsel %vm978_vm2, %v1195_v63, 0.0  ;;  %v1201_v63 = vmul.f32 %v6151_v20, %v6151_v20 }
 0x1d0   : > { %v1271_v59 = vadd.f32 %v1270_v43, %v1269_v21  ;;  %v1278_v21 = vsel %vm978_vm2, %v1196_v11, 0.0  ;;  %v1202_v11 = vmul.f32 %v6155_v29, %v6155_v29 }
 0x1d2   : > { %v1273_v15 = vadd.f32 %v1272_v13, %v1271_v59  ;;  %v1280_v59 = vsel %vm978_vm2, %v1197_v30, 0.0  ;;  %v1203_v30 = vmul.f32 %v6159_v38, %v6159_v38 }
 0x1d4   : > { %v1275_v55 = vadd.f32 %v1274_v61, %v1273_v15  ;;  %v1282_v15 = vsel %vm978_vm2, %v1198_v25, 0.0  ;;  %v1204_v25 = vmul.f32 %v6163_v28, %v6163_v28 }
 0x1d6   : > { %v1277_v51 = vadd.f32 %v1276_v39, %v1275_v55  ;;  %v1284_v55 = vsel %vm978_vm2, %v1199_v7, 0.0  ;;  %v1205_v7 = vmul.f32 %v6167_v32, %v6167_v32 }
 0x1d8   : > { %v1279_v43 = vadd.f32 %v1278_v21, %v1277_v51  ;;  %v1286_v51 = vsel %vm978_vm2, %v1200_v58, 0.0  ;;  %v1206_v58 = vmul.f32 %v6171_v47, %v6171_v47 }
 0x1da   : > { %v1281_v13 = vadd.f32 %v1280_v59, %v1279_v43  ;;  %v1288_v43 = vsel %vm978_vm2, %v1201_v63, 0.0  ;;  %v1207_v63 = vmul.f32 %v6175_v54, %v6175_v54 }
 0x1dc   : > { %v1283_v61 = vadd.f32 %v1282_v15, %v1281_v13  ;;  %v1290_v13 = vsel %vm978_vm2, %v1202_v11, 0.0  ;;  %v1208_v11 = vmul.f32 %v6179_v46, %v6179_v46 }
 0x1de   : > { %v1285_v39 = vadd.f32 %v1284_v55, %v1283_v61  ;;  %v1292_v61 = vsel %vm978_vm2, %v1203_v30, 0.0  ;;  %v1209_v30 = vmul.f32 %v6183_v52, %v6183_v52 }
 0x1e0   : > { %v1287_v21 = vadd.f32 %v1286_v51, %v1285_v39  ;;  %v1294_v39 = vsel %vm978_vm2, %v1204_v25, 0.0  ;;  %v1210_v25 = vmul.f32 %v6187_v1, %v6187_v1 }
 0x1e2   : > { %v1289_v59 = vadd.f32 %v1288_v43, %v1287_v21  ;;  %v1296_v21 = vsel %vm978_vm2, %v1205_v7, 0.0  ;;  %v1211_v7 = vmul.f32 %v6191_v9, %v6191_v9 }
 0x1e4   : > { %v1291_v15 = vadd.f32 %v1290_v13, %v1289_v59  ;;  %v1298_v59 = vsel %vm978_vm2, %v1206_v58, 0.0  ;;  %v1212_v58 = vmul.f32 %v6195_v0, %v6195_v0 }
 0x1e6   : > { %v1293_v55 = vadd.f32 %v1292_v61, %v1291_v15  ;;  %v1300_v15 = vsel %vm978_vm2, %v1207_v63, 0.0  ;;  %v1213_v63 = vmul.f32 %v6199_v6, %v6199_v6 }
 0x1e8   : > { %v1295_v51 = vadd.f32 %v1294_v39, %v1293_v55  ;;  %v1302_v55 = vsel %vm978_vm2, %v1208_v11, 0.0  ;;  %v1214_v11 = vmul.f32 %v6203_v19, %v6203_v19 }
 0x1ea   : > { %v1297_v43 = vadd.f32 %v1296_v21, %v1295_v51  ;;  %v1304_v51 = vsel %vm978_vm2, %v1209_v30, 0.0  ;;  %v1215_v30 = vmul.f32 %v6207_v26, %v6207_v26 }
 0x1ec   : > { %v1299_v13 = vadd.f32 %v1298_v59, %v1297_v43  ;;  %v1306_v43 = vsel %vm978_vm2, %v1210_v25, 0.0  ;;  %v1216_v25 = vmul.f32 %v6211_v18, %v6211_v18 }
 0x1ee   : > { %v1301_v61 = vadd.f32 %v1300_v15, %v1299_v13  ;;  %v1308_v13 = vsel %vm978_vm2, %v1211_v7, 0.0  ;;  %v1217_v7 = vmul.f32 %v6215_v24, %v6215_v24 }
 0x1f0   : > { %v1303_v39 = vadd.f32 %v1302_v55, %v1301_v61  ;;  %v1310_v61 = vsel %vm978_vm2, %v1212_v58, 0.0  ;;  %v1218_v58 = vmul.f32 %v6219_v41, %v6219_v41 }
 0x1f2   : > { %v1305_v21 = vadd.f32 %v1304_v51, %v1303_v39  ;;  %v1312_v39 = vsel %vm978_vm2, %v1213_v63, 0.0  ;;  %v1219_v63 = vmul.f32 %v6223_v53, %v6223_v53 }
 0x1f4   : > { %v1307_v59 = vadd.f32 %v1306_v43, %v1305_v21  ;;  %v1314_v21 = vsel %vm978_vm2, %v1214_v11, 0.0  ;;  %v1220_v11 = vmul.f32 %v6227_v40, %v6227_v40 }
 0x1f6   : > { %v1309_v15 = vadd.f32 %v1308_v13, %v1307_v59  ;;  %v1316_v59 = vsel %vm978_vm2, %v1215_v30, 0.0  ;;  %v1221_v30 = vmul.f32 %v6231_v49, %v6231_v49 }
 0x1f8   : > { %v1311_v55 = vadd.f32 %v1310_v61, %v1309_v15  ;;  %v1318_v15 = vsel %vm978_vm2, %v1216_v25, 0.0  ;;  %v1222_v25 = vmul.f32 %v6235_v3, %v6235_v3 }
 0x1fa   : > { %v1313_v51 = vadd.f32 %v1312_v39, %v1311_v55  ;;  %v1320_v55 = vsel %vm978_vm2, %v1217_v7, 0.0  ;;  %v1223_v7 = vmul.f32 %v6239_v14, %v6239_v14 }
 0x1fc   : > { %v1315_v43 = vadd.f32 %v1314_v21, %v1313_v51  ;;  %v1322_v51 = vsel %vm978_vm2, %v1218_v58, 0.0  ;;  %v1224_v58 = vmul.f32 %v6243_v2, %v6243_v2 }
 0x1fe   : > { %v1317_v13 = vadd.f32 %v1316_v59, %v1315_v43  ;;  %v1324_v43 = vsel %vm978_vm2, %v1219_v63, 0.0  ;;  %v1225_v63 = vmul.f32 %v6247_v12, %v6247_v12 }
 0x200   : > { %v1319_v61 = vadd.f32 %v1318_v15, %v1317_v13  ;;  %v1326_v13 = vsel %vm978_vm2, %v1220_v11, 0.0  ;;  %v1226_v11 = vmul.f32 %v6251_v31, %v6251_v31 }
 0x202   : > { %v1321_v39 = vadd.f32 %v1320_v55, %v1319_v61  ;;  %v1328_v61 = vsel %vm978_vm2, %v1221_v30, 0.0  ;;  %v10892_v30 = vld [vmem:[#allocation5_spill] sm:$0xff] }
 0x204   : > { %v1323_v21 = vadd.f32 %v1322_v51, %v1321_v39  ;;  %v1330_v39 = vsel %vm978_vm2, %v1222_v25, 0.0  ;;  %v10893_v25 = vld [vmem:[#allocation7_spill] sm:$0xff] }
 0x206   : > { %v1325_v59 = vadd.f32 %v1324_v43, %v1323_v21  ;;  %v1332_v21 = vsel %vm978_vm2, %v1223_v7, 0.0  ;;  %v10894_v7 = vld [vmem:[#allocation9_spill] sm:$0xff] }
 0x208   : > { %v1327_v15 = vadd.f32 %v1326_v13, %v1325_v59  ;;  %v1334_v59 = vsel %vm978_vm2, %v1224_v58, 0.0  ;;  %v10895_v58 = vld [vmem:[#allocation6_spill] sm:$0xff] }
 0x20a   : > { %v1329_v55 = vadd.f32 %v1328_v61, %v1327_v15  ;;  %v1227_v15 = vmul.f32 %v10892_v30, %v10892_v30  ;;  %v1336_v61 = vsel %vm978_vm2, %v1225_v63, 0.0  ;;  %v10896_v63 = vld [vmem:[#allocation8_spill] sm:$0xff] }
 0x20c   : > { %v1331_v51 = vadd.f32 %v1330_v39, %v1329_v55  ;;  %v1228_v55 = vmul.f32 %v10893_v25, %v10893_v25  ;;  %v1338_v39 = vsel %vm978_vm2, %v1226_v11, 0.0  ;;  %v10897_v11 = vld [vmem:[#allocation11_spill] sm:$0xff] }
 0x20e   : > { %v1333_v43 = vadd.f32 %v1332_v21, %v1331_v51  ;;  %v1229_v51 = vmul.f32 %v10894_v7, %v10894_v7  ;;  %v1340_v21 = vsel %vm978_vm2, %v1227_v15, 0.0 }
 0x210   : > { %v1335_v13 = vadd.f32 %v1334_v59, %v1333_v43  ;;  %v1230_v43 = vmul.f32 %v10895_v58, %v10895_v58  ;;  %v1342_v59 = vsel %vm978_vm2, %v1228_v55, 0.0 }
 0x212   : > { %v1337_v17 = vadd.f32 %v1336_v61, %v1335_v13  ;;  %v1231_v13 = vmul.f32 %v10896_v63, %v10896_v63  ;;  %v1344_v61 = vsel %vm978_vm2, %v1229_v51, 0.0 }
 0x214   : > { %v1339_v8 = vadd.f32 %v1338_v39, %v1337_v17  ;;  %v1232_v17 = vmul.f32 %v10897_v11, %v10897_v11  ;;  %v1346_v39 = vsel %vm978_vm2, %v1230_v43, 0.0  ;;  %v1348_v15 = vsel %vm978_vm2, %v1231_v13, 0.0  ;;  %v10898_v43 = vld [vmem:[#allocation13_spill] sm:$0xff]  ;;  %v10899_v13 = vld [vmem:[#allocation10_spill] sm:$0xff] }
 0x216   : > { %v1341_v5 = vadd.f32 %v1340_v21, %v1339_v8  ;;  %v1233_v8 = vmul.f32 %v6279_v23, %v6279_v23  ;;  %v1350_v55 = vsel %vm978_vm2, %v1232_v17, 0.0  ;;  %v10900_v17 = vld [vmem:[#allocation12_spill] sm:$0xff] }
 0x218   : > { %v1343_v60 = vadd.f32 %v1342_v59, %v1341_v5  ;;  %v1234_v5 = vmul.f32 %v6283_v27, %v6283_v27  ;;  %v1352_v51 = vsel %vm978_vm2, %v1233_v8, 0.0  ;;  %v10901_v8 = vld [vmem:[#allocation15_spill] sm:$0xff] }
 0x21a   : > { %v1345_v56 = vadd.f32 %v1344_v61, %v1343_v60  ;;  %v1235_v60 = vmul.f32 %v6287_v33, %v6287_v33 }
 0x21c   : > { %v1347_v62 = vadd.f32 %v1346_v39, %v1345_v56  ;;  %v1236_v56 = vmul.f32 %v10898_v43, %v10898_v43  ;;  %v1354_v39 = vsel %vm978_vm2, %v1234_v5, 0.0  ;;  %v10902_v5 = vld [vmem:[#allocation17_spill] sm:$0xff] }
 0x21e   : > { %v1349_v21 = vadd.f32 %v1348_v15, %v1347_v62  ;;  %v1237_v62 = vmul.f32 %v10899_v13, %v10899_v13  ;;  %v1356_v15 = vsel %vm978_vm2, %v1235_v60, 0.0 }
 0x220   : > { %v1351_v59 = vadd.f32 %v1350_v55, %v1349_v21  ;;  %v1238_v21 = vmul.f32 %v10900_v17, %v10900_v17  ;;  %v1358_v55 = vsel %vm978_vm2, %v1236_v56, 0.0 }
 0x222   : > { %v1353_v61 = vadd.f32 %v1352_v51, %v1351_v59  ;;  %v1239_v59 = vmul.f32 %v10901_v8, %v10901_v8  ;;  %v1360_v51 = vsel %vm978_vm2, %v1237_v62, 0.0 }
 0x224   : > { %v1355_v57 = vadd.f32 %v1354_v39, %v1353_v61  ;;  %v1240_v61 = vmul.f32 %v10902_v5, %v10902_v5  ;;  %v1362_v39 = vsel %vm978_vm2, %v1238_v21, 0.0  ;;  %v1379_v5 = vlaneseq }
 0x226   : > { %v1357_v48 = vadd.f32 %v1356_v15, %v1355_v57  ;;  %v1364_v57 = vsel %vm978_vm2, %v1239_v59, 0.0  ;;  %v1366_v15 = vsel %vm978_vm2, %v1240_v61, 0.0  ;;  %v6501_v21 = vshrl.u32 %v1379_v5, 7 }
 0x228   : > { %v1359_v44 = vadd.f32 %v1358_v55, %v1357_v48  ;;  %10903 = vst [vmem:[#allocation14_spill] sm:$0xff] %v6501_v21 }
 0x22a   : > { %v1361_v50 = vadd.f32 %v1360_v51, %v1359_v44 }
 0x22c   : > { %v1363_v34 = vadd.f32 %v1362_v39, %v1361_v50  ;;  %v10604_v50 = vsub.s32 0, %v6501_v21  ;;  %v10905_v39 = vld [vmem:[#allocation20_spill] sm:$0xff] }
 0x22e   : > { %v1365_v60 = vadd.f32 %v1364_v57, %v1363_v34  ;;  %v976_v34 = vld [vmem:[%s296_s30] sm:$0x1]  ;;  %s5105_s30 = smov 2  }
 0x230   : > { %v1367_v56 = vadd.f32 %v1366_v15, %v1365_v60  ;;  %v10906_v60 = vld [vmem:[#allocation21_spill] sm:$0xff] }
 0x232   : > { %v1368_v48 = vrot.slane %v1367_v56, 4 }
 0x234   : > { %v1369_v55 = vadd.f32 %v1368_v48, %v1367_v56  ;;  %v10907_v56 = vld [vmem:[#allocation22_spill] sm:$0xff] }
 0x236   : > { %v1370_v37 = vrot.slane %v1369_v55, 2 }
 0x238   : > { %v1371_v45 = vadd.f32 %v1370_v37, %v1369_v55  ;;  %v10908_v55 = vld [vmem:[#allocation23_spill] sm:$0xff] }
 0x23a   : > { %v1372_v62 = vrot.slane %v1371_v45, 1 }
 0x23c   : > { %v1373_v44 = vadd.f32 %v1372_v62, %v1371_v45 }
 0x23e   : > { %v1374_v51 = vmul.f32 0.001953125, %v1373_v44 }
 0x240   : > { %v1375_v36 = vadd.f32 1e-05, %v1374_v51 }
 0x242   : > { %5027 = vrsqrt.f32 %v1375_v36  ;;  %v6518_v36 = vld [vmem:[%s299_s13] ss:$0 sm:$0xff]  ;;  %s5106_s13 = smov 4  }
 0x24c   : > { %v5028_v59 = vpop.eup %5027 }
 0x24d   : > { %v1377_v61 = vmul.f32 %v5028_v59, %v976_v34 }
 0x24f   : > { %v6511_v37 = vrot.slane %v1377_v61, %v10604_v50 }
 0x251   : > { %v1445_v45 = vmul.f32 %v6511_v37, %v10900_v17  ;;  %v1384_v57 = vmul.f32 %v6511_v37, %v10905_v39  ;;  %v1385_v15 = vmul.f32 %v6511_v37, %v10906_v60  ;;  %v1386_v48 = vmul.f32 %v6511_v37, %v10907_v56 }
 0x252   : > { %v1387_v62 = vmul.f32 %v6511_v37, %v10908_v55  ;;  %v1388_v44 = vmul.f32 %v6511_v37, %v6071_v42  ;;  %v1389_v17 = vmul.f32 %v6511_v37, %v6075_v35  ;;  %v1402_v51 = vmul.f32 %v6511_v37, %v6127_v10  ;;  %v10909_v55 = vld [vmem:[#allocation17_spill] sm:$0xff] }
 0x253   : > { %v6523_v5 = vadd.f32 %v6518_v36, %v1445_v45  ;;  %v1403_v34 = vmul.f32 %v6511_v37, %v6131_v4  ;;  %v1406_v59 = vmul.f32 %v6511_v37, %v6143_v22  ;;  %v1407_v61 = vmul.f32 %v6511_v37, %v6147_v16 }
 0x254   : > { %v1408_v45 = vmul.f32 %v6511_v37, %v6151_v20  ;;  %v1409_v42 = vmul.f32 %v6511_v37, %v6155_v29  ;;  %v1410_v35 = vmul.f32 %v6511_v37, %v6159_v38  ;;  %v1411_v10 = vmul.f32 %v6511_v37, %v6163_v28 }
 0x255   : > { %10904 = vst [vmem:[#allocation16_spill] sm:$0xff] %v6523_v5  ;;  %v1412_v4 = vmul.f32 %v6511_v37, %v6167_v32  ;;  %v1413_v22 = vmul.f32 %v6511_v37, %v6171_v47  ;;  %v1414_v16 = vmul.f32 %v6511_v37, %v6175_v54  ;;  %v1415_v20 = vmul.f32 %v6511_v37, %v6179_v46 }
 0x256   : > { %v1416_v29 = vmul.f32 %v6511_v37, %v6183_v52  ;;  %v1417_v38 = vmul.f32 %v6511_v37, %v6187_v1  ;;  %v1418_v28 = vmul.f32 %v6511_v37, %v6191_v9  ;;  %v1419_v32 = vmul.f32 %v6511_v37, %v6195_v0 }
 0x257   : > { %v1420_v47 = vmul.f32 %v6511_v37, %v6199_v6  ;;  %v1421_v54 = vmul.f32 %v6511_v37, %v6203_v19  ;;  %v1422_v46 = vmul.f32 %v6511_v37, %v6207_v26  ;;  %v1423_v52 = vmul.f32 %v6511_v37, %v6211_v18 }
 0x258   : > { %v1424_v1 = vmul.f32 %v6511_v37, %v6215_v24  ;;  %v1425_v9 = vmul.f32 %v6511_v37, %v6219_v41  ;;  %v1426_v0 = vmul.f32 %v6511_v37, %v6223_v53  ;;  %v1427_v6 = vmul.f32 %v6511_v37, %v6227_v40 }
 0x259   : > { %v1428_v19 = vmul.f32 %v6511_v37, %v6231_v49  ;;  %v1429_v26 = vmul.f32 %v6511_v37, %v6235_v3  ;;  %v1430_v18 = vmul.f32 %v6511_v37, %v6239_v14  ;;  %v1431_v24 = vmul.f32 %v6511_v37, %v6243_v2 }
 0x25a   : > { %v1432_v41 = vmul.f32 %v6511_v37, %v6247_v12  ;;  %v1454_v53 = vadd.f32 %v6518_v36, %v1384_v57  ;;  %v1455_v39 = vadd.f32 %v6518_v36, %v1385_v15  ;;  %v1433_v40 = vmul.f32 %v6511_v37, %v6251_v31 }
 0x25b   : > { %v1434_v49 = vmul.f32 %v6511_v37, %v10892_v30  ;;  %v1435_v3 = vmul.f32 %v6511_v37, %v10893_v25  ;;  %v1436_v14 = vmul.f32 %v6511_v37, %v10894_v7  ;;  %v1437_v2 = vmul.f32 %v6511_v37, %v10895_v58 }
 0x25c   : > { %v1438_v12 = vmul.f32 %v6511_v37, %v10896_v63  ;;  %v1518_v57 = vmul.f32 0.1, %v1454_v53  ;;  %v1519_v60 = vmul.f32 0.1, %v1455_v39  ;;  %v1439_v31 = vmul.f32 %v6511_v37, %v10897_v11 }
 0x25d   : > { %v1440_v30 = vmul.f32 %v6511_v37, %v6279_v23  ;;  %v1441_v25 = vmul.f32 %v6511_v37, %v6283_v27  ;;  %v1442_v7 = vmul.f32 %v6511_v37, %v6287_v33  ;;  %v1443_v58 = vmul.f32 %v6511_v37, %v10898_v43 }
 0x25e   : > { %v1444_v63 = vmul.f32 %v6511_v37, %v10899_v13  ;;  %v1582_v15 = vmax.f32 %v1454_v53, %v1518_v57  ;;  %v1583_v56 = vmax.f32 %v1455_v39, %v1519_v60  ;;  %v1446_v11 = vmul.f32 %v6511_v37, %v10901_v8 }
 0x25f   : > { %v1447_v23 = vmul.f32 %v6511_v37, %v10909_v55  ;;  %v1456_v50 = vadd.f32 %v6518_v36, %v1386_v48  ;;  %v1457_v27 = vadd.f32 %v6518_v36, %v1387_v62  ;;  %v6630_v33 = vadd.f32 %v6518_v36, %v1388_v44 }
 0x260   : > { %v6627_v21 = vpack.c.bf16 %v1583_v56, %v1582_v15  ;;  %v6633_v43 = vadd.f32 %v6518_v36, %v1402_v51  ;;  %v6636_v13 = vadd.f32 %v6518_v36, %v1403_v34  ;;  %v6639_v8 = vadd.f32 %v6518_v36, %v1389_v17 }
 0x261   : > { %v6642_v53 = vadd.f32 %v6518_v36, %v1406_v59  ;;  %v6645_v48 = vadd.f32 %v6518_v36, %v1407_v61  ;;  %v6648_v62 = vadd.f32 %v6518_v36, %v1408_v45  ;;  %v6653_v44 = vadd.f32 %v6518_v36, %v1409_v42 }
 0x262   : > { %10910 = vst [vmem:[#allocation18_spill] sm:$0xff] %v6627_v21  ;;  %2132 = vrot.lane.b32.xlu0 %v6627_v21, %s5105_s30  ;;  %v6656_v51 = vadd.f32 %v6518_v36, %v1410_v35  ;;  %v6659_v17 = vadd.f32 %v6518_v36, %v1411_v10  ;;  %v6662_v34 = vadd.f32 %v6518_v36, %v1412_v4  ;;  %v1520_v57 = vmul.f32 0.1, %v1456_v50 }
 0x263   : > { %10911 = vst [vmem:[#allocation19_spill] sm:$0xff] %v6653_v44  ;;  %v6665_v59 = vadd.f32 %v6518_v36, %v1413_v22  ;;  %v6668_v61 = vadd.f32 %v6518_v36, %v1414_v16  ;;  %v6671_v45 = vadd.f32 %v6518_v36, %v1415_v20  ;;  %v6674_v42 = vadd.f32 %v6518_v36, %v1416_v29 }
 0x264   : > { %10912 = vst [vmem:[#allocation5_spill] sm:$0xff] %v6656_v51  ;;  %10913 = vst [vmem:[#allocation7_spill] sm:$0xff] %v6659_v17  ;;  %v6677_v35 = vadd.f32 %v6518_v36, %v1417_v38  ;;  %v6680_v10 = vadd.f32 %v6518_v36, %v1418_v28  ;;  %v6683_v4 = vadd.f32 %v6518_v36, %v1419_v32  ;;  %v1521_v60 = vmul.f32 0.1, %v1457_v27 }
 0x265   : > { %10914 = vst [vmem:[#allocation9_spill] sm:$0xff] %v6662_v34  ;;  %10915 = vst [vmem:[#allocation6_spill] sm:$0xff] %v6665_v59  ;;  %v6686_v22 = vadd.f32 %v6518_v36, %v1420_v47  ;;  %v6689_v16 = vadd.f32 %v6518_v36, %v1421_v54  ;;  %v6692_v20 = vadd.f32 %v6518_v36, %v1422_v46 }
 0x266   : > { %v6695_v29 = vadd.f32 %v6518_v36, %v1423_v52  ;;  %v6698_v38 = vadd.f32 %v6518_v36, %v1424_v1  ;;  %v6701_v28 = vadd.f32 %v6518_v36, %v1425_v9  ;;  %v6704_v32 = vadd.f32 %v6518_v36, %v1426_v0 }
 0x267   : > { %v6707_v47 = vadd.f32 %v6518_v36, %v1427_v6  ;;  %v6710_v54 = vadd.f32 %v6518_v36, %v1428_v19  ;;  %v6713_v46 = vadd.f32 %v6518_v36, %v1429_v26  ;;  %v6716_v52 = vadd.f32 %v6518_v36, %v1430_v18 }
 0x268   : > { %v6719_v1 = vadd.f32 %v6518_v36, %v1431_v24  ;;  %v6722_v9 = vadd.f32 %v6518_v36, %v1432_v41  ;;  %v6725_v0 = vadd.f32 %v6518_v36, %v1433_v40  ;;  %v6728_v6 = vadd.f32 %v6518_v36, %v1434_v49 }
 0x269   : > { %10916 = vst [vmem:[#allocation8_spill] sm:$0xff] %v6710_v54  ;;  %10917 = vst [vmem:[#allocation11_spill] sm:$0xff] %v6713_v46  ;;  %v6731_v19 = vadd.f32 %v6518_v36, %v1435_v3  ;;  %v6734_v26 = vadd.f32 %v6518_v36, %v1436_v14  ;;  %v6737_v18 = vadd.f32 %v6518_v36, %v1437_v2 }
 0x26a   : > { %10918 = vst [vmem:[#allocation13_spill] sm:$0xff] %v6716_v52  ;;  %10919 = vst [vmem:[#allocation10_spill] sm:$0xff] %v6719_v1  ;;  %v6740_v24 = vadd.f32 %v6518_v36, %v1438_v12  ;;  %v6743_v41 = vadd.f32 %v6518_v36, %v1439_v31  ;;  %v6746_v39 = vadd.f32 %v6518_v36, %v1440_v30  ;;  %v1522_v31 = vmul.f32 0.1, %v6630_v33 }
 0x26b   : > { %10920 = vst [vmem:[#allocation12_spill] sm:$0xff] %v6722_v9  ;;  %10921 = vst [vmem:[#allocation15_spill] sm:$0xff] %v6725_v0  ;;  %v6749_v40 = vadd.f32 %v6518_v36, %v1441_v25  ;;  %v6752_v49 = vadd.f32 %v6518_v36, %v1442_v7  ;;  %v6755_v3 = vadd.f32 %v6518_v36, %v1443_v58  ;;  %v1523_v30 = vmul.f32 0.1, %v6639_v8 }
 0x26c   : > { %10922 = vst [vmem:[#allocation20_spill] sm:$0xff] %v6728_v6  ;;  %10923 = vst [vmem:[#allocation21_spill] sm:$0xff] %v6731_v19  ;;  %v6758_v14 = vadd.f32 %v6518_v36, %v1444_v63  ;;  %v6761_v2 = vadd.f32 %v6518_v36, %v1446_v11  ;;  %v6764_v12 = vadd.f32 %v6518_v36, %v1447_v23  ;;  %v10935_v63 = vld [vmem:[#allocation26_spill] sm:$0xff]  ;;  %v10936_v11 = vld [vmem:[#allocation27_spill] sm:$0xff]  ;;  %v6863_v19 = vmul.f32 0.1, %v6636_v13 }
 0x26d   : > { %10924 = vst [vmem:[#allocation22_spill] sm:$0xff] %v6734_v26  ;;  %10925 = vst [vmem:[#allocation23_spill] sm:$0xff] %v6737_v18  ;;  %v1584_v25 = vmax.f32 %v1456_v50, %v1520_v57  ;;  %v1585_v7 = vmax.f32 %v1457_v27, %v1521_v60  ;;  %v1586_v58 = vmax.f32 %v6630_v33, %v1522_v31  ;;  %v10939_v50 = vld [vmem:[#allocation28_spill] sm:$0xff]  ;;  %v10940_v33 = vld [vmem:[#allocation29_spill] sm:$0xff]  ;;  %v6860_v26 = vmul.f32 0.1, %v6633_v43 }
 0x26e   : > { %10926 = vst [vmem:[#allocation17_spill] sm:$0xff] %v6740_v24  ;;  %10927 = vst [vmem:[#allocation38_spill] sm:$0xff] %v6743_v41  ;;  %v1392_v56 = vmul.f32 %v6511_v37, %v10935_v63  ;;  %v1393_v55 = vmul.f32 %v6511_v37, %v10936_v11  ;;  %v1587_v23 = vmax.f32 %v6639_v8, %v1523_v30  ;;  %v10941_v60 = vld [vmem:[#allocation30_spill] sm:$0xff]  ;;  %v10943_v30 = vld [vmem:[#allocation32_spill] sm:$0xff]  ;;  %v6872_v52 = vmul.f32 0.1, %v6642_v53 }
 0x26f   : > { %10928 = vst [vmem:[#allocation39_spill] sm:$0xff] %v6746_v39  ;;  %10929 = vst [vmem:[#allocation40_spill] sm:$0xff] %v6749_v40  ;;  %v6768_v15 = vpack.c.bf16 %v1585_v7, %v1584_v25  ;;  %v1394_v27 = vmul.f32 %v6511_v37, %v10939_v50  ;;  %v1395_v57 = vmul.f32 %v6511_v37, %v10940_v33  ;;  %v10942_v25 = vld [vmem:[#allocation31_spill] sm:$0xff]  ;;  %v10944_v7 = vld [vmem:[#allocation33_spill] sm:$0xff] }
 0x270   : > { %10930 = vst [vmem:[#allocation41_spill] sm:$0xff] %v6752_v49  ;;  %10931 = vst [vmem:[#allocation42_spill] sm:$0xff] %v6755_v3  ;;  %v1396_v31 = vmul.f32 %v6511_v37, %v10941_v60  ;;  %v1397_v8 = vmul.f32 %v6511_v37, %v10942_v25  ;;  %v6794_v63 = vpack.c.bf16 %v1587_v23, %v1586_v58  ;;  %v10945_v11 = vld [vmem:[#allocation34_spill] sm:$0xff]  ;;  %v10946_v49 = vld [vmem:[#allocation35_spill] sm:$0xff] }
 0x271   : > { %10932 = vst [vmem:[#allocation43_spill] sm:$0xff] %v6758_v14  ;;  %10933 = vst [vmem:[#allocation44_spill] sm:$0xff] %v6761_v2  ;;  %v10938_v14 = vld [vmem:[#allocation25_spill] sm:$0xff]  ;;  %2134 = vrot.lane.b32.xlu0 %v6768_v15, %s5105_s30  ;;  %v1400_v50 = vmul.f32 %v6511_v37, %v10945_v11  ;;  %v1401_v33 = vmul.f32 %v6511_v37, %v10946_v49  ;;  %v1462_v40 = vadd.f32 %v6518_v36, %v1392_v56  ;;  %v10947_v39 = vld [vmem:[#allocation36_spill] sm:$0xff] }
 0x272   : > { %10934 = vst [vmem:[#allocation45_spill] sm:$0xff] %v6764_v12  ;;  %v10937_v12 = vld [vmem:[#allocation24_spill] sm:$0xff]  ;;  %v1391_v3 = vmul.f32 %v6511_v37, %v10938_v14  ;;  %v1399_v14 = vmul.f32 %v6511_v37, %v10944_v7  ;;  %v1463_v60 = vadd.f32 %v6518_v36, %v1393_v55  ;;  %v1404_v25 = vmul.f32 %v6511_v37, %v10947_v39  ;;  %v10948_v58 = vld [vmem:[#allocation37_spill] sm:$0xff] }
 0x273   : > { %v1390_v2 = vmul.f32 %v6511_v37, %v10937_v12  ;;  %v1398_v12 = vmul.f32 %v6511_v37, %v10943_v30  ;;  %v1405_v23 = vmul.f32 %v6511_v37, %v10948_v58  ;;  %v6811_v7 = vadd.f32 %v6518_v36, %v1394_v27 }
 0x274   : > { %v1461_v41 = vadd.f32 %v6518_v36, %v1391_v3  ;;  %v6814_v49 = vadd.f32 %v6518_v36, %v1395_v57  ;;  %v6817_v56 = vadd.f32 %v6518_v36, %v1396_v31  ;;  %v6820_v39 = vadd.f32 %v6518_v36, %v1397_v8 }
 0x275   : > { %v1460_v30 = vadd.f32 %v6518_v36, %v1390_v2  ;;  %2136 = vrot.lane.b32.xlu0 %v6794_v63, %s5105_s30  ;;  %v6823_v3 = vadd.f32 %v6518_v36, %v1398_v12  ;;  %v6826_v2 = vadd.f32 %v6518_v36, %v1399_v14  ;;  %v6829_v37 = vadd.f32 %v6518_v36, %v1400_v50 }
 0x276   : > { %v6832_v55 = vadd.f32 %v6518_v36, %v1401_v33  ;;  %v1526_v27 = vmul.f32 0.1, %v1462_v40  ;;  %v1527_v57 = vmul.f32 0.1, %v1463_v60  ;;  %v6835_v31 = vmul.f32 0.1, %v6523_v5 }
 0x277   : > { %v6838_v8 = vadd.f32 %v6518_v36, %v1404_v25  ;;  %v1524_v12 = vmul.f32 0.1, %v1460_v30  ;;  %v1525_v11 = vmul.f32 0.1, %v1461_v41  ;;  %v6841_v14 = vadd.f32 %v6518_v36, %v1405_v23 }
 0x278   : > { %10949 = vst [vmem:[#allocation26_spill] sm:$0xff] %v6835_v31  ;;  %v1528_v50 = vmul.f32 0.1, %v6811_v7  ;;  %v1529_v33 = vmul.f32 0.1, %v6814_v49  ;;  %v1590_v23 = vmax.f32 %v1462_v40, %v1526_v27  ;;  %v1591_v31 = vmax.f32 %v1463_v60, %v1527_v57 }
 0x279   : > { %10950 = vst [vmem:[#allocation27_spill] sm:$0xff] %v6838_v8  ;;  %10951 = vst [vmem:[#allocation24_spill] sm:$0xff] %v6841_v14  ;;  %v1530_v58 = vmul.f32 0.1, %v6817_v56  ;;  %v1531_v24 = vmul.f32 0.1, %v6820_v39  ;;  %v1588_v6 = vmax.f32 %v1460_v30, %v1524_v12  ;;  %v1589_v0 = vmax.f32 %v1461_v41, %v1525_v11 }
 0x27a   : > { %v6848_v18 = vmul.f32 0.1, %v6823_v3  ;;  %v6851_v5 = vmul.f32 0.1, %v6826_v2  ;;  %v6854_v25 = vmul.f32 0.1, %v6829_v37  ;;  %v6888_v12 = vpack.c.bf16 %v1591_v31, %v1590_v23 }
 0x27b   : > { %v6857_v36 = vmul.f32 0.1, %v6832_v55  ;;  %v6866_v9 = vmul.f32 0.1, %v6838_v8  ;;  %v6869_v1 = vmul.f32 0.1, %v6841_v14  ;;  %v1594_v8 = vmax.f32 %v6817_v56, %v1530_v58 }
 0x27c   : > { %v6875_v40 = vmul.f32 0.1, %v6645_v48  ;;  %v6878_v60 = vmul.f32 0.1, %v6648_v62  ;;  %v6881_v27 = vmul.f32 0.1, %v6653_v44  ;;  %v1595_v31 = vmax.f32 %v6820_v39, %v1531_v24 }
 0x27d   : > { %10952 = vst [vmem:[#allocation25_spill] sm:$0xff] %v6869_v1  ;;  %v6884_v41 = vmul.f32 0.1, %v6656_v51  ;;  %v10632_v30 = vshll.u32 %v6627_v21, 16  ;;  %v10631_v57 = vshll.u32 %v6768_v15, 16  ;;  %v10635_v14 = vshll.u32 %v6794_v63, 16 }
 0x27e   : > { %v6891_v11 = vmul.f32 0.1, %v6659_v17  ;;  %v6894_v1 = vpack.c.bf16 %v1589_v0, %v1588_v6  ;;  %v10638_v44 = vshrl.u32 %v6627_v21, 16  ;;  %v6904_v23 = vmul.f32 0.1, %v6662_v34 }
 0x27f   : > { %10953 = vst [vmem:[#allocation28_spill] sm:$0xff] %v6884_v41  ;;  %v1969_v51 = vrot.slane %v10632_v30, 1  ;;  %v1971_v41 = vrot.slane %v10631_v57, 1  ;;  %v6907_v17 = vmul.f32 0.1, %v6665_v59  ;;  %v10639_v6 = vshrl.u32 %v6794_v63, 16 }
 0x280   : > { %v1973_v56 = vrot.slane %v10635_v14, 1  ;;  %v6919_v58 = vmul.f32 0.1, %v6668_v61  ;;  %v10640_v39 = vshrl.u32 %v6768_v15, 16  ;;  %v10641_v59 = vshll.u32 %v6894_v1, 16 }
 0x281   : > { %10954 = vst [vmem:[#allocation29_spill] sm:$0xff] %v6907_v17  ;;  %v1970_v24 = vor.u32 %v1969_v51, %v10638_v44  ;;  %v1592_v17 = vmax.f32 %v6811_v7, %v1528_v50  ;;  %v1593_v34 = vmax.f32 %v6814_v49, %v1529_v33  ;;  %v6931_v14 = vmul.f32 0.1, %v6671_v45 }
 0x282   : > { %v1974_v30 = vor.u32 %v1973_v56, %v10639_v6  ;;  %v1972_v51 = vor.u32 %v1971_v41, %v10640_v39  ;;  %v6937_v44 = vpack.c.bf16 %v1595_v31, %v1594_v8  ;;  %v6940_v57 = vmul.f32 0.1, %v6674_v42 }
 0x283   : > { %v2068_v21 = vsel %vm6911_vm5, %v1970_v24, 0  ;;  %v6943_v56 = vmul.f32 0.1, %v6677_v35  ;;  %v10958_v49 = vshll.u32 %v6888_v12, 16  ;;  %v6951_v33 = vmul.f32 0.1, %v6680_v10 }
 0x284   : > { %10957 = vst [vmem:[#allocation30_spill] sm:$0xff] %v6937_v44  ;;  %2228 = vrot.lane.b32.xlu1 %v2068_v21, %s5106_s13  ;;  %v2070_v7 = vsel %vm6911_vm5, %v1974_v30, 0  ;;  %v6954_v8 = vmul.f32 0.1, %v6683_v4  ;;  %v6957_v41 = vmul.f32 0.1, %v6686_v22  ;;  %v6963_v30 = vpack.c.bf16 %v1593_v34, %v1592_v17 }
 0x285   : > { %v1977_v50 = vrot.slane %v10958_v49, 1  ;;  %2232 = vrot.lane.b32.xlu0 %v2070_v7, %s5106_s13  ;;  %v1975_v21 = vrot.slane %v10641_v59, 1  ;;  %v10642_v31 = vshrl.u32 %v6888_v12, 16  ;;  %v1600_v24 = vmax.f32 %v6633_v43, %v6860_v26 }
 0x286   : > { %v6968_v49 = vmul.f32 0.1, %v6689_v16  ;;  %v2069_v6 = vsel %vm6911_vm5, %v1972_v51, 0  ;;  %v10644_v39 = vshrl.u32 %v6894_v1, 16  ;;  %v10643_v7 = vshll.u32 %v6937_v44, 16 }
 0x287   : > { %v1978_v59 = vor.u32 %v1977_v50, %v10642_v31  ;;  %v1598_v17 = vmax.f32 %v6829_v37, %v6854_v25  ;;  %v1599_v43 = vmax.f32 %v6832_v55, %v6857_v36  ;;  %v1601_v34 = vmax.f32 %v6636_v13, %v6863_v19 }
 0x288   : > { %2230 = vrot.lane.b32.xlu1 %v2069_v6, %s5106_s13  ;;  %v6984_v26 = vmul.f32 0.1, %v6692_v20  ;;  %v6987_v51 = vmul.f32 0.1, %v6695_v29  ;;  %v6990_v6 = vmul.f32 0.1, %v6698_v38  ;;  %v1596_v37 = vmax.f32 %v6823_v3, %v6848_v18 }
 0x289   : > { %2140 = vrot.lane.b32.xlu0 %v6888_v12, %s5105_s30  ;;  %v1976_v55 = vor.u32 %v1975_v21, %v10644_v39  ;;  %v10647_v13 = vshll.u32 %v6963_v30, 16  ;;  %v1597_v19 = vmax.f32 %v6826_v2, %v6851_v5  ;;  %v7001_v25 = vpack.c.bf16 %v1601_v34, %v1600_v24  ;;  %v10964_v39 = vld [vmem:[#allocation25_spill] sm:$0xff] }
 0x28a   : > { %v7004_v36 = vmul.f32 0.1, %v6701_v28  ;;  %v1981_v50 = vrot.slane %v10643_v7, 1  ;;  %v1604_v31 = vmax.f32 %v6642_v53, %v6872_v52  ;;  %v1605_v18 = vmax.f32 %v6645_v48, %v6875_v40 }
 0x28b   : > { %10959 = vst [vmem:[#allocation31_spill] sm:$0xff] %v7001_v25  ;;  %v7013_v3 = vmul.f32 0.1, %v6704_v32  ;;  %v7016_v21 = vmul.f32 0.1, %v6707_v47  ;;  %v2072_v5 = vsel %vm6911_vm5, %v1978_v59, 0  ;;  %v7022_v2 = vpack.c.bf16 %v1599_v43, %v1598_v17 }
 0x28c   : > { %2138 = vrot.lane.b32.xlu1 %v6894_v1, %s5105_s30  ;;  %v7025_v24 = vmul.f32 0.1, %v6710_v54  ;;  %v7028_v53 = vmul.f32 0.1, %v6713_v46  ;;  %v10648_v48 = vshrl.u32 %v6937_v44, 16  ;;  %v7032_v52 = vpack.c.bf16 %v1605_v18, %v1604_v31  ;;  %v10965_v31 = vld [vmem:[#allocation24_spill] sm:$0xff] }
 0x28d   : > { %10960 = vst [vmem:[#allocation32_spill] sm:$0xff] %v7022_v2  ;;  %2236 = vrot.lane.b32.xlu0 %v2072_v5, %s5106_s13  ;;  %v2071_v40 = vsel %vm6911_vm5, %v1976_v55, 0  ;;  %v1979_v59 = vrot.slane %v10647_v13, 1  ;;  %v7038_v17 = vpack.c.bf16 %v1597_v19, %v1596_v37  ;;  %v1606_v43 = vmax.f32 %v6648_v62, %v6878_v60  ;;  %v10963_v5 = vld [vmem:[#allocation27_spill] sm:$0xff]  ;;  %v10968_v37 = vld [vmem:[#allocation10_spill] sm:$0xff]  ;;  %v10970_v60 = vld [vmem:[#allocation28_spill] sm:$0xff] }
 0x28e   : > { %10961 = vst [vmem:[#allocation33_spill] sm:$0xff] %v7028_v53  ;;  %v1982_v34 = vor.u32 %v1981_v50, %v10648_v48  ;;  %v1602_v7 = vmax.f32 %v10963_v5, %v6866_v9  ;;  %v1603_v18 = vmax.f32 %v10965_v31, %v10964_v39  ;;  %v10966_v46 = vld [vmem:[#allocation19_spill] sm:$0xff]  ;;  %v10967_v53 = vld [vmem:[#allocation13_spill] sm:$0xff]  ;;  %v7054_v19 = vmul.f32 0.1, %v10968_v37  ;;  %v10972_v9 = vld [vmem:[#allocation12_spill] sm:$0xff] }
 0x28f   : > { %10962 = vst [vmem:[#allocation34_spill] sm:$0xff] %v7038_v17  ;;  %v1607_v55 = vmax.f32 %v10966_v46, %v6881_v27  ;;  %v7051_v54 = vmul.f32 0.1, %v10967_v53  ;;  %v10971_v50 = vld [vmem:[#allocation5_spill] sm:$0xff]  ;;  %v7061_v5 = vmul.f32 0.1, %v10972_v9 }
 0x290   : > { %10969 = vst [vmem:[#allocation35_spill] sm:$0xff] %v7054_v19  ;;  %2234 = vrot.lane.b32.xlu1 %v2071_v40, %s5106_s13  ;;  %v1608_v13 = vmax.f32 %v10971_v50, %v10970_v60  ;;  %v10649_v46 = vshrl.u32 %v6963_v30, 16  ;;  %v10974_v39 = vld [vmem:[#allocation7_spill] sm:$0xff]  ;;  %v10976_v60 = vld [vmem:[#allocation9_spill] sm:$0xff]  ;;  %v10979_v19 = vld [vmem:[#allocation20_spill] sm:$0xff] }
 0x291   : > { %10973 = vst [vmem:[#allocation36_spill] sm:$0xff] %v7061_v5  ;;  %2144 = vrot.lane.b32.xlu0 %v6937_v44, %s5105_s30  ;;  %v7066_v27 = vpack.c.bf16 %v1607_v55, %v1606_v43  ;;  %v1609_v31 = vmax.f32 %v10974_v39, %v6891_v11  ;;  %v10975_v48 = vld [vmem:[#allocation15_spill] sm:$0xff]  ;;  %v1610_v50 = vmax.f32 %v10976_v60, %v6904_v23  ;;  %v10977_v9 = vld [vmem:[#allocation29_spill] sm:$0xff]  ;;  %v10978_v5 = vld [vmem:[#allocation6_spill] sm:$0xff]  ;;  %v7079_v53 = vmul.f32 0.1, %v10979_v19 }
 0x292   : > { %v7071_v40 = vmul.f32 0.1, %v10975_v48  ;;  %v1611_v37 = vmax.f32 %v10978_v5, %v10977_v9  ;;  %v1980_v43 = vor.u32 %v1979_v59, %v10649_v46  ;;  %v2074_v11 = vsel %vm6911_vm5, %v1982_v34, 0  ;;  %v10982_v62 = vld [vmem:[#allocation21_spill] sm:$0xff]  ;;  %v10983_v46 = vld [vmem:[#allocation22_spill] sm:$0xff] }
 0x293   : > { %v7085_v55 = vpack.c.bf16 %v1603_v18, %v1602_v7  ;;  %v10981_v39 = vshll.u32 %v7022_v2, 16  ;;  %v7091_v60 = vpack.c.bf16 %v1609_v31, %v1608_v13  ;;  %v1612_v5 = vmax.f32 %v6668_v61, %v6919_v58  ;;  %v10984_v18 = vld [vmem:[#allocation23_spill] sm:$0xff]  ;;  %v10985_v31 = vld [vmem:[#allocation17_spill] sm:$0xff] }
 0x294   : > { %2142 = vrot.lane.b32.xlu1 %v6963_v30, %s5105_s30  ;;  %v7093_v9 = vpack.c.bf16 %v1611_v37, %v1610_v50  ;;  %v7098_v59 = vmul.f32 0.1, %v10982_v62  ;;  %v7101_v34 = vmul.f32 0.1, %v10983_v46  ;;  %v1613_v7 = vmax.f32 %v6671_v45, %v6931_v14  ;;  %v10988_v14 = vld [vmem:[#allocation38_spill] sm:$0xff] }
 0x295   : > { %10980 = vst [vmem:[#allocation37_spill] sm:$0xff] %v7085_v55  ;;  %v1985_v23 = vrot.slane %v10981_v39, 1  ;;  %2240 = vrot.lane.b32.xlu0 %v2074_v11, %s5106_s13  ;;  %v1614_v13 = vmax.f32 %v6674_v42, %v6940_v57  ;;  %v7109_v37 = vmul.f32 0.1, %v10984_v18  ;;  %v7112_v50 = vmul.f32 0.1, %v10985_v31 }
 0x296   : > { %v10987_v61 = vshll.u32 %v7038_v17, 16  ;;  %v10650_v39 = vshrl.u32 %v7022_v2, 16  ;;  %v2073_v11 = vsel %vm6911_vm5, %v1980_v43, 0  ;;  %v7120_v45 = vpack.c.bf16 %v1613_v7, %v1612_v5  ;;  %v10991_v5 = vld [vmem:[#allocation40_spill] sm:$0xff] }
 0x297   : > { %10986 = vst [vmem:[#allocation27_spill] sm:$0xff] %v7112_v50  ;;  %v1615_v42 = vmax.f32 %v6677_v35, %v6943_v56  ;;  %v7125_v57 = vmul.f32 0.1, %v10988_v14  ;;  %v1728_v31 = vshrl.u32 %v7038_v17, 16  ;;  %v1616_v43 = vmax.f32 %v6680_v10, %v6951_v33  ;;  %v10989_v50 = vld [vmem:[#allocation39_spill] sm:$0xff] }
 0x298   : > { %v1983_v58 = vrot.slane %v10987_v61, 1  ;;  %2238 = vrot.lane.b32.xlu1 %v2073_v11, %s5106_s13  ;;  %v1986_v61 = vor.u32 %v1985_v23, %v10650_v39  ;;  %v7134_v46 = vmul.f32 0.1, %v10989_v50  ;;  %v7137_v7 = vmul.f32 0.1, %v10991_v5  ;;  %v10993_v11 = vld [vmem:[#allocation41_spill] sm:$0xff] }
 0x299   : > { %2148 = vrot.lane.b32.xlu0 %v7022_v2, %s5105_s30  ;;  %v7142_v56 = vpack.c.bf16 %v1615_v42, %v1614_v13  ;;  %v7145_v14 = vmul.f32 0.1, %v10993_v11  ;;  %v1617_v10 = vmax.f32 %v6683_v4, %v6954_v8  ;;  %v1618_v33 = vmax.f32 %v6686_v22, %v6957_v41  ;;  %v10995_v39 = vld [vmem:[#allocation42_spill] sm:$0xff]  ;;  %v11002_v41 = vld [vmem:[#allocation45_spill] sm:$0xff] }
 0x29a   : > { %10990 = vst [vmem:[#allocation25_spill] sm:$0xff] %v7134_v46  ;;  %10992 = vst [vmem:[#allocation24_spill] sm:$0xff] %v7137_v7  ;;  %v1984_v23 = vor.u32 %v1983_v58, %v1728_v31  ;;  %v7152_v5 = vmul.f32 0.1, %v10995_v39  ;;  %v10996_v7 = vld [vmem:[#allocation43_spill] sm:$0xff]  ;;  %v10997_v35 = vshll.u32 %v7085_v55, 16  ;;  %v1619_v8 = vmax.f32 %v6689_v16, %v6968_v49 }
 0x29b   : > { %10994 = vst [vmem:[#allocation19_spill] sm:$0xff] %v7145_v14  ;;  %v7155_v50 = vmul.f32 0.1, %v10996_v7  ;;  %v10998_v42 = vld [vmem:[#allocation26_spill] sm:$0xff]  ;;  %v10999_v46 = vld [vmem:[#allocation16_spill] sm:$0xff]  ;;  %v2076_v4 = vsel %vm6911_vm5, %v1986_v61, 0  ;;  %v7168_v22 = vpack.c.bf16 %v1617_v10, %v1616_v43 }
 0x29c   : > { %v1989_v13 = vrot.slane %v10997_v35, 1  ;;  %v11000_v14 = vld [vmem:[#allocation44_spill] sm:$0xff]  ;;  %2146 = vrot.lane.b32.xlu1 %v7038_v17, %s5105_s30  ;;  %v7173_v7 = vmul.f32 0.1, %v11002_v41  ;;  %v11004_v35 = vshll.u32 %v7001_v25, 16  ;;  %v1620_v17 = vmax.f32 %v6692_v20, %v6984_v26  ;;  %v11005_v20 = vld [vmem:[#allocation18_spill] sm:$0xff] }
 0x29d   : > { %v7162_v58 = vmul.f32 0.1, %v11000_v14  ;;  %2244 = vrot.lane.b32.xlu0 %v2076_v4, %s5106_s13  ;;  %v1749_v14 = vshrl.u32 %v7085_v55, 16  ;;  %v2075_v61 = vsel %vm6911_vm5, %v1984_v23, 0  ;;  %v1742_v43 = vshrl.u32 %v7001_v25, 16 }
 0x29e   : > { %11003 = vst [vmem:[#allocation5_spill] sm:$0xff] %v7173_v7  ;;  %v1987_v11 = vrot.slane %v11004_v35, 1  ;;  %v10652_v16 = vshll.u32 %v7032_v52, 16  ;;  %v7185_v49 = vpack.c.bf16 %v1619_v8, %v1618_v33  ;;  %v1621_v4 = vmax.f32 %v6695_v29, %v6987_v51 }
 0x29f   : > { %11001 = vst [vmem:[#allocation28_spill] sm:$0xff] %v7162_v58  ;;  %v1990_v10 = vor.u32 %v1989_v13, %v1749_v14  ;;  %v1622_v35 = vmax.f32 %v6698_v38, %v6990_v6  ;;  %v1623_v41 = vmax.f32 %v6701_v28, %v7004_v36  ;;  %v11006_v26 = vshrl.u32 %v11005_v20, 16 }
 0x2a0   : > { %v11007_v23 = vshrl.u32 %v6768_v15, 16  ;;  %v11008_v33 = vshrl.u32 %v6794_v63, 16  ;;  %2242 = vrot.lane.b32.xlu1 %v2075_v61, %s5106_s13  ;;  %v10654_v29 = vshll.u32 %v7066_v27, 16  ;;  %v11009_v38 = vshrl.u32 %v6894_v1, 16 }
 0x2a1   : > { %v7195_v7 = vrot.slane %v11006_v26, 7  ;;  %2152 = vrot.lane.b32.xlu0 %v7085_v55, %s5105_s30  ;;  %v1988_v28 = vor.u32 %v1987_v11, %v1742_v43  ;;  %v7213_v6 = vpack.c.bf16 %v1621_v4, %v1620_v17  ;;  %v7215_v36 = vpack.c.bf16 %v1623_v41, %v1622_v35 }
 0x2a2   : > { %v7199_v58 = vrot.slane %v11007_v23, 7  ;;  %v7203_v13 = vrot.slane %v11008_v33, 7  ;;  %v7209_v51 = vrot.slane %v11009_v38, 7  ;;  %v11010_v8 = vshrl.u32 %v6888_v12, 16 }
 0x2a3   : > { %v1991_v61 = vrot.slane %v10652_v16, 1  ;;  %v1624_v23 = vmax.f32 %v6704_v32, %v7013_v3  ;;  %v1625_v33 = vmax.f32 %v6707_v47, %v7016_v21  ;;  %v11011_v38 = vshrl.u32 %v6963_v30, 16  ;;  %v11013_v21 = vld [vmem:[#allocation8_spill] sm:$0xff]  ;;  %v11018_v47 = vld [vmem:[#allocation33_spill] sm:$0xff] }
 0x2a4   : > { %v7219_v26 = vrot.slane %v11010_v8, 7  ;;  %v11012_v17 = vshrl.u32 %v6937_v44, 16  ;;  %v2078_v4 = vsel %vm6911_vm5, %v1990_v10, 0  ;;  %v1756_v35 = vshrl.u32 %v7032_v52, 16  ;;  %2150 = vrot.lane.b32.xlu1 %v7001_v25, %s5105_s30 }
 0x2a5   : > { %v7229_v11 = vrot.slane %v11011_v38, 7  ;;  %v1993_v32 = vrot.slane %v10654_v29, 1  ;;  %v7243_v3 = vpack.c.bf16 %v1625_v33, %v1624_v23  ;;  %v1626_v8 = vmax.f32 %v11013_v21, %v7025_v24  ;;  %2248 = vrot.lane.b32.xlu0 %v2078_v4, %s5106_s13  ;;  %v11019_v24 = vld [vmem:[#allocation11_spill] sm:$0xff] }
 0x2a6   : > { %v7233_v41 = vrot.slane %v11012_v17, 7  ;;  %v7247_v38 = vrot.slane %v1728_v31, 7  ;;  %v11015_v17 = vshrl.u32 %v7022_v2, 16  ;;  %v7253_v16 = vrot.slane %v1742_v43, 7  ;;  %v11020_v43 = vld [vmem:[#allocation13_spill] sm:$0xff]  ;;  %v11022_v2 = vld [vmem:[#allocation10_spill] sm:$0xff] }
 0x2a7   : > { %v2077_v55 = vsel %vm6911_vm5, %v1988_v28, 0  ;;  %v1992_v29 = vor.u32 %v1991_v61, %v1756_v35  ;;  %v1763_v23 = vshrl.u32 %v7066_v27, 16  ;;  %v1770_v33 = vshrl.u32 %v7091_v60, 16 }
 0x2a8   : > { %11014 = vst [vmem:[#allocation7_spill] sm:$0xff] %v7247_v38  ;;  %v7251_v10 = vrot.slane %v11015_v17, 7  ;;  %11017 = vst [vmem:[#allocation9_spill] sm:$0xff] %v7253_v16  ;;  %v1627_v31 = vmax.f32 %v11019_v24, %v11018_v47  ;;  %v1777_v21 = vshrl.u32 %v7093_v9, 16  ;;  %v10659_v17 = vshll.u32 %v7093_v9, 16  ;;  %v11021_v16 = vld [vmem:[#allocation35_spill] sm:$0xff]  ;;  %2246 = vrot.lane.b32.xlu1 %v2077_v55, %s5106_s13 }
 0x2a9   : > { %v1628_v25 = vmax.f32 %v11020_v43, %v7051_v54  ;;  %v1629_v28 = vmax.f32 %v11022_v2, %v11021_v16  ;;  %v1994_v61 = vor.u32 %v1993_v32, %v1763_v23  ;;  %v11023_v4 = vshll.u32 %v7091_v60, 16  ;;  %2156 = vrot.lane.b32.xlu0 %v7066_v27, %s5105_s30  ;;  %v11024_v54 = vld [vmem:[#allocation36_spill] sm:$0xff] }
 0x2aa   : > { %11016 = vst [vmem:[#allocation15_spill] sm:$0xff] %v7251_v10  ;;  %v10658_v38 = vshll.u32 %v7120_v45, 16  ;;  %v7272_v44 = vpack.c.bf16 %v1627_v31, %v1626_v8  ;;  %v10660_v47 = vshll.u32 %v7142_v56, 16  ;;  %v11025_v43 = vld [vmem:[#allocation12_spill] sm:$0xff]  ;;  %v1631_v55 = vmax.f32 %v10975_v48, %v7071_v40 }
 0x2ab   : > { %v1995_v10 = vrot.slane %v11023_v4, 1  ;;  %v7277_v24 = vpack.c.bf16 %v1629_v28, %v1628_v25  ;;  %v1630_v2 = vmax.f32 %v11025_v43, %v11024_v54  ;;  %v7283_v16 = vrot.slane %v1749_v14, 7 }
 0x2ac   : > { %v7285_v32 = vrot.slane %v1756_v35, 7  ;;  %v7287_v4 = vrot.slane %v1763_v23, 7  ;;  %v10661_v8 = vshll.u32 %v7168_v22, 16  ;;  %v1997_v31 = vrot.slane %v10659_v17, 1  ;;  %2154 = vrot.lane.b32.xlu1 %v7032_v52, %s5105_s30 }
 0x2ad   : > { %v1784_v25 = vshrl.u32 %v7120_v45, 16  ;;  %v7293_v28 = vpack.c.bf16 %v1631_v55, %v1630_v2  ;;  %v1632_v54 = vmax.f32 %v10979_v19, %v7079_v53  ;;  %v2079_v48 = vsel %vm6911_vm5, %v1992_v29, 0  ;;  %v11026_v2 = vld [vmem:[#allocation22_spill] sm:$0xff] }
 0x2ae   : > { %v2080_v40 = vsel %vm6911_vm5, %v1994_v61, 0  ;;  %v1999_v14 = vrot.slane %v10658_v38, 1  ;;  %v1633_v35 = vmax.f32 %v10982_v62, %v7098_v59  ;;  %v7308_v23 = vrot.slane %v1770_v33, 7  ;;  %v11028_v38 = vld [vmem:[#allocation17_spill] sm:$0xff] }
 0x2af   : > { %2252 = vrot.lane.b32.xlu0 %v2080_v40, %s5106_s13  ;;  %v1996_v53 = vor.u32 %v1995_v10, %v1770_v33  ;;  %v7310_v19 = vrot.slane %v1777_v21, 7  ;;  %v2001_v43 = vrot.slane %v10660_v47, 1  ;;  %v2003_v29 = vrot.slane %v10661_v8, 1  ;;  %v11027_v33 = vld [vmem:[#allocation27_spill] sm:$0xff] }
 0x2b0   : > { %v7316_v61 = vpack.c.bf16 %v1633_v35, %v1632_v54  ;;  %v1634_v55 = vmax.f32 %v11026_v2, %v7101_v34  ;;  %v1635_v62 = vmax.f32 %v10984_v18, %v7109_v37  ;;  %v1998_v59 = vor.u32 %v1997_v31, %v1777_v21  ;;  %2250 = vrot.lane.b32.xlu1 %v2079_v48, %s5106_s13  ;;  %v11030_v31 = vld [vmem:[#allocation25_spill] sm:$0xff]  ;;  %v11032_v37 = vld [vmem:[#allocation24_spill] sm:$0xff] }
 0x2b1   : > { %v7322_v40 = vrot.slane %v1784_v25, 7  ;;  %v10662_v10 = vshll.u32 %v7185_v49, 16  ;;  %v1636_v17 = vmax.f32 %v11028_v38, %v11027_v33  ;;  %v7328_v47 = vor.u32 %v1999_v14, %v1784_v25  ;;  %v11029_v38 = vld [vmem:[#allocation38_spill] sm:$0xff]  ;;  %v11031_v25 = vld [vmem:[#allocation39_spill] sm:$0xff]  ;;  %v11033_v18 = vld [vmem:[#allocation40_spill] sm:$0xff] }
 0x2b2   : > { %v1791_v54 = vshrl.u32 %v7142_v56, 16  ;;  %v1798_v34 = vshrl.u32 %v7168_v22, 16  ;;  %v7332_v35 = vpack.c.bf16 %v1635_v62, %v1634_v55  ;;  %v1637_v21 = vmax.f32 %v11029_v38, %v7125_v57 }
 0x2b3   : > { %2160 = vrot.lane.b32.xlu0 %v7093_v9, %s5105_s30  ;;  %v1638_v48 = vmax.f32 %v11031_v25, %v11030_v31  ;;  %v2081_v14 = vsel %vm6911_vm5, %v1996_v53, 0  ;;  %v1805_v62 = vshrl.u32 %v7185_v49, 16  ;;  %v2005_v33 = vrot.slane %v10662_v10, 1  ;;  %v2452_v25 = vld [vmem:[%s5184_s23] sm:$0x7] }
 0x2b4   : > { %v2002_v2 = vor.u32 %v2001_v43, %v1791_v54  ;;  %v7344_v55 = vor.u32 %v2003_v29, %v1798_v34  ;;  %v7349_v8 = vpack.c.bf16 %v1637_v21, %v1636_v17  ;;  %v1639_v57 = vmax.f32 %v11033_v18, %v11032_v37  ;;  %2158 = vrot.lane.b32.xlu1 %v7091_v60, %s5105_s30 }
 0x2b5   : > { %v11034_v38 = vshll.u32 %v11005_v20, 16  ;;  %v2082_v53 = vsel %vm6911_vm5, %v1998_v59, 0  ;;  %v2083_v17 = vsel %vm6911_vm5, %v7328_v47, 0  ;;  %v7366_v43 = vrot.slane %v1791_v54, 7  ;;  %5012 = vmatprep.subr.msk.bf16.mxu0 %vm2519_vm6, %v2452_v25 }
 0x2b6   : > { %v11035_v29 = vshll.u32 %v6768_v15, 16  ;;  %v1812_v20 = vshrl.u32 %v7213_v6, 16  ;;  %v11037_v37 = vshll.u32 %v7213_v6, 16  ;;  %v11038_v59 = vshll.u32 %v7215_v36, 16 }
 0x2b7   : > { %v7356_v31 = vor.u32 %v11034_v38, %v7195_v7  ;;  %v2453_v7 = vld [vmem:[%s5184_s23 + $0x4] sm:$0x7]  ;;  %2256 = vrot.lane.b32.xlu0 %v2082_v53, %s5106_s13  ;;  %v7380_v10 = vpack.c.bf16 %v1639_v57, %v1638_v48  ;;  %v2084_v47 = vsel %vm6911_vm5, %v2002_v2, 0  ;;  %v7384_v54 = vrot.slane %v1798_v34, 7  ;;  %v11039_v2 = vld [vmem:[#allocation19_spill] sm:$0xff] }
 0x2b8   : > { %v7371_v18 = vor.u32 %v11035_v29, %v7199_v58  ;;  %v2007_v21 = vrot.slane %v11037_v37, 1  ;;  %v2009_v38 = vrot.slane %v11038_v59, 1  ;;  %v7386_v15 = vrot.slane %v1805_v62, 7  ;;  %5013 = vmatprep.subr.msk.bf16.mxu1 %vm2519_vm6, %v2453_v7  ;;  %2254 = vrot.lane.b32.xlu1 %v2081_v14, %s5106_s13  ;;  %v11040_v57 = vld [vmem:[#allocation41_spill] sm:$0xff]  ;;  %v11041_v14 = vld [vmem:[#allocation43_spill] sm:$0xff] }
 0x2b9   : > { %v7391_v53 = vor.u32 %v2005_v33, %v1805_v62  ;;  %v1819_v29 = vshrl.u32 %v7215_v36, 16  ;;  %v1640_v37 = vmax.f32 %v11040_v57, %v11039_v2  ;;  %v1641_v62 = vmax.f32 %v10995_v39, %v7152_v5 }
 0x2ba   : > { %11036 = vst [vmem:[#allocation29_spill] sm:$0xff] %v7371_v18  ;;  %v2521_v33 = vsel %vm2519_vm6, %v2452_v25, 0  ;;  %v7406_v59 = vrot.slane %v1812_v20, 7  ;;  %v7408_v58 = vor.u32 %v2007_v21, %v1812_v20  ;;  %v1642_v34 = vmax.f32 %v11041_v14, %v7155_v50  ;;  %v2454_v18 = vld [vmem:[%s5184_s23 + $0x8] sm:$0x7] }
 0x2bb   : > { %2164 = vrot.lane.b32.xlu0 %v7142_v56, %s5105_s30  ;;  %v7410_v48 = vor.u32 %v2009_v38, %v1819_v29  ;;  %4686 = vmatpush3.bf16.msra.mxu0 %v2521_v33  ;;  %v7415_v2 = vpack.c.bf16 %v1641_v62, %v1640_v37  ;;  %v11042_v39 = vshll.u32 %v6794_v63, 16  ;;  %v2817_v25 = vsel %vm2519_vm6, %v2453_v7, 0 }
 0x2bc   : > { %v2086_v20 = vsel %vm6911_vm5, %v7391_v53, 0  ;;  %v7426_v21 = vrot.slane %v1819_v29, 7  ;;  %v11043_v38 = vshrl.u32 %v7243_v3, 16  ;;  %v11044_v50 = vmax.f32 %v10999_v46, %v10998_v42  ;;  %4752 = vmatpush3.bf16.msra.mxu1 %v2817_v25  ;;  %2162 = vrot.lane.b32.xlu1 %v7120_v45, %s5105_s30  ;;  %v11046_v46 = vld [vmem:[#allocation28_spill] sm:$0xff]  ;;  %v11049_v25 = vld [vmem:[#allocation45_spill] sm:$0xff] }
 0x2bd   : > { %v7420_v5 = vor.u32 %v11042_v39, %v7203_v13  ;;  %v10663_v63 = vmov 0   ;;  %v11045_v13 = vshll.u32 %v7243_v3, 16  ;;  %v10665_v53 = vshrl.u32 %v7272_v44, 16  ;;  %5014 = vmatprep.subr.msk.bf16.mxu1 %vm2519_vm6, %v2454_v18  ;;  %v11047_v42 = vld [vmem:[#allocation44_spill] sm:$0xff]  ;;  %v11048_v39 = vld [vmem:[#allocation5_spill] sm:$0xff] }
 0x2be   : > { %v7430_v57 = vrot.slane %v11043_v38, 7  ;;  %v7435_v37 = vpack.c.bf16 %v11044_v50, %v1642_v34  ;;  %4687 = vmatprep.mubr.bf16.mxu0 %v10663_v63  ;;  %v10667_v29 = vshll.u32 %v7272_v44, 16  ;;  %v1644_v34 = vmax.f32 %v11047_v42, %v11046_v46 }
 0x2bf   : > { %v7442_v7 = vrot.slane %v11045_v13, 1  ;;  %2260 = vrot.lane.b32.xlu0 %v2084_v47, %s5106_s13  ;;  %v10666_v33 = vshrl.u32 %v7277_v24, 16  ;;  %v1645_v38 = vmax.f32 %v11049_v25, %v11048_v39  ;;  %v10668_v13 = vshrl.u32 %v7316_v61, 16 }
 0x2c0   : > { %v7462_v46 = vsel %vm2519_vm6, %v2454_v18, 0  ;;  %v11050_v47 = vshll.u32 %v6894_v1, 16  ;;  %v10669_v62 = vshrl.u32 %v7332_v35, 16  ;;  %v11051_v39 = vshll.u32 %v6888_v12, 16  ;;  %2258 = vrot.lane.b32.xlu1 %v2083_v17, %s5106_s13 }
 0x2c1   : > { %v7471_v14 = vpack.c.bf16 %v1645_v38, %v1644_v34  ;;  %v1835_v18 = vrot.slane %v10665_v53, 7  ;;  %v7483_v1 = vrot.slane %v10667_v29, 1  ;;  %v11053_v34 = vld [vmem:[#allocation30_spill] sm:$0xff]  ;;  %v11056_v17 = vshrl.u32 %v7293_v28, 16  ;;  %v11061_v29 = vld [vmem:[#allocation15_spill] sm:$0xff] }
 0x2c2   : > { %v7467_v42 = vor.u32 %v11050_v47, %v7209_v51  ;;  %v7476_v25 = vor.u32 %v11051_v39, %v7219_v26  ;;  %v11052_v51 = vshll.u32 %v6963_v30, 16  ;;  %v11054_v38 = vshll.u32 %v11053_v34, 16  ;;  %v11057_v34 = vld [vmem:[#allocation7_spill] sm:$0xff]  ;;  %v11062_v30 = vld [vmem:[#allocation32_spill] sm:$0xff] }
 0x2c3   : > { %2168 = vrot.lane.b32.xlu0 %v7185_v49, %s5105_s30  ;;  %v1842_v26 = vrot.slane %v10666_v33, 7  ;;  %v1849_v39 = vrot.slane %v11056_v17, 7  ;;  %v1863_v33 = vrot.slane %v10669_v62, 7  ;;  %v11067_v62 = vld [vmem:[#allocation37_spill] sm:$0xff]  ;;  %v1871_v53 = vshll.u32 %v7349_v8, 16 }
 0x2c4   : > { %v7488_v47 = vor.u32 %v11052_v51, %v7229_v11  ;;  %v7493_v12 = vor.u32 %v11054_v38, %v7233_v41  ;;  %v1856_v11 = vrot.slane %v10668_v13, 7  ;;  %v11058_v38 = vld [vmem:[#allocation34_spill] sm:$0xff]  ;;  %2166 = vrot.lane.b32.xlu1 %v7168_v22, %s5105_s30  ;;  %v11068_v17 = vshll.u32 %v11067_v62, 16 }
 0x2c5   : > { %v11059_v50 = vshll.u32 %v11058_v38, 16  ;;  %v11064_v38 = vld [vmem:[#allocation9_spill] sm:$0xff] }
 0x2c6   : > { %11055 = vst [vmem:[#allocation6_spill] sm:$0xff] %v7493_v12  ;;  %v11063_v12 = vshll.u32 %v11062_v30, 16  ;;  %v11069_v30 = vshll.u32 %v7032_v52, 16  ;;  %v11073_v52 = vshrl.u32 %v7380_v10, 16 }
 0x2c7   : > { %v7510_v63 = vor.u32 %v11059_v50, %v11057_v34  ;;  %v11065_v50 = vld [vmem:[#allocation31_spill] sm:$0xff]  ;;  %2264 = vrot.lane.b32.xlu0 %v2086_v20, %s5106_s13  ;;  %v1878_v20 = vshll.u32 %v7380_v10, 16 }
 0x2c8   : > { %v7519_v13 = vor.u32 %v11063_v12, %v11061_v29  ;;  %v11066_v34 = vshll.u32 %v11065_v50, 16  ;;  %v7537_v29 = vor.u32 %v11069_v30, %v7285_v32  ;;  %v11070_v12 = vshrl.u32 %v7349_v8, 16 }
 0x2c9   : > { %11060 = vst [vmem:[#allocation20_spill] sm:$0xff] %v7510_v63  ;;  %v7532_v63 = vor.u32 %v11068_v17, %v7283_v16  ;;  %v11072_v16 = vshll.u32 %v7091_v60, 16  ;;  %v1877_v32 = vrot.slane %v11073_v52, 7  ;;  %v1896_v17 = vshrl.u32 %v7471_v14, 16 }
 0x2ca   : > { %v7527_v41 = vor.u32 %v11066_v34, %v11064_v38  ;;  %v1870_v51 = vrot.slane %v11070_v12, 7  ;;  %v11071_v38 = vshll.u32 %v7066_v27, 16  ;;  %v11074_v34 = vshll.u32 %v7093_v9, 16 }
 0x2cb   : > { %v7551_v62 = vor.u32 %v11072_v16, %v7308_v23  ;;  %v11077_v60 = vshrl.u32 %v7415_v2, 16  ;;  %v1885_v23 = vshll.u32 %v7415_v2, 16  ;;  %v11079_v9 = vsel %vm6911_vm5, %v7344_v55, 0  ;;  %2172 = vrot.lane.b32.xlu0 %v7215_v36, %s5105_s30 }
 0x2cc   : > { %v7546_v50 = vor.u32 %v11071_v38, %v7287_v4  ;;  %v7560_v30 = vor.u32 %v11074_v34, %v7310_v19  ;;  %v11078_v38 = vshll.u32 %v7120_v45, 16  ;;  %2262 = vrot.lane.b32.xlu1 %v11079_v9, %s5106_s13  ;;  %v11080_v19 = vshrl.u32 %v7435_v37, 16 }
 0x2cd   : > { %v1884_v4 = vrot.slane %v11077_v60, 7  ;;  %v11081_v34 = vshll.u32 %v7142_v56, 16  ;;  %v11082_v12 = vshll.u32 %v7168_v22, 16  ;;  %v1899_v55 = vshll.u32 %v7471_v14, 16 }
 0x2ce   : > { %v7575_v16 = vor.u32 %v11078_v38, %v7322_v40  ;;  %v1891_v52 = vrot.slane %v11080_v19, 7  ;;  %v11083_v40 = vshll.u32 %v7185_v49, 16  ;;  %v11084_v56 = vshll.u32 %v7213_v6, 16 }
 0x2cf   : > { %v7587_v60 = vor.u32 %v11081_v34, %v7366_v43  ;;  %v7592_v45 = vor.u32 %v11082_v12, %v7384_v54  ;;  %v11085_v22 = vshll.u32 %v7215_v36, 16  ;;  %v11086_v49 = vshll.u32 %v7243_v3, 16 }
 0x2d0   : > { %v7597_v38 = vor.u32 %v11083_v40, %v7386_v15  ;;  %v7605_v43 = vor.u32 %v11084_v56, %v7406_v59  ;;  %v1898_v12 = vrot.slane %v1896_v17, 7  ;;  %v11087_v36 = vshll.u32 %v7272_v44, 16  ;;  %2170 = vrot.lane.b32.xlu1 %v7213_v6, %s5105_s30 }
 0x2d1   : > { %v7610_v54 = vor.u32 %v11085_v22, %v7426_v21  ;;  %v7615_v15 = vor.u32 %v11086_v49, %v7430_v57  ;;  %v1954_v9 = vsel %vm7564_vm9, 0, %v7592_v45  ;;  %v11088_v40 = vshll.u32 %v7277_v24, 16 }
 0x2d2   : > { %v1955_v59 = vsel %vm7564_vm9, 0, %v7597_v38  ;;  %v7627_v21 = vor.u32 %v11087_v36, %v1835_v18  ;;  %v11089_v22 = vshll.u32 %v7293_v28, 16  ;;  %v11090_v36 = vshll.u32 %v7316_v61, 16 }
 0x2d3   : > { %v7640_v56 = vor.u32 %v11088_v40, %v1842_v26  ;;  %v11091_v34 = vshll.u32 %v7332_v35, 16  ;;  %v11092_v6 = vsel %vm6911_vm5, %v7410_v48, 0  ;;  %v11093_v40 = vshll.u32 %v7435_v37, 16 }
 0x2d4   : > { %v1959_v18 = vsel %vm7564_vm9, 0, %v7627_v21  ;;  %v7649_v49 = vor.u32 %v11089_v22, %v1849_v39  ;;  %v7653_v19 = vor.u32 %v11090_v36, %v1856_v11  ;;  %2268 = vrot.lane.b32.xlu0 %v11092_v6, %s5106_s13  ;;  %v7669_v39 = vor.u32 %v1871_v53, %v1870_v51 }
 0x2d5   : > { %v7657_v57 = vor.u32 %v11091_v34, %v1863_v33  ;;  %v1960_v26 = vsel %vm7564_vm9, 0, %v7640_v56  ;;  %v7673_v11 = vor.u32 %v1878_v20, %v1877_v32  ;;  %v7677_v33 = vor.u32 %v1885_v23, %v1884_v4 }
 0x2d6   : > { %v1961_v48 = vsel %vm7564_vm9, 0, %v7649_v49  ;;  %v1962_v34 = vsel %vm7564_vm9, 0, %v7653_v19  ;;  %v7690_v32 = vor.u32 %v11093_v40, %v1891_v52  ;;  %v7703_v6 = vor.u32 %v1899_v55, %v1898_v12 }
 0x2d7   : > { %v1963_v51 = vsel %vm7564_vm9, 0, %v7657_v57  ;;  %v11094_v52 = vsel %vm6911_vm5, %v7408_v58, 0  ;;  %v11095_v40 = vshrl.u32 %v7272_v44, 16  ;;  %v11096_v36 = vshrl.u32 %v7243_v3, 16 }
 0x2d8   : > { %2266 = vrot.lane.b32.xlu1 %v11094_v52, %s5106_s13  ;;  %2176 = vrot.lane.b32.xlu0 %v7272_v44, %s5105_s30  ;;  %v11097_v52 = vmov %v11089_v22  ;;  %v11098_v12 = vshll.u32 %v7277_v24, 16 }
 0x2d9   : > { %v2014_v4 = vor.u32 %v7483_v1, %v11095_v40  ;;  %v2012_v58 = vor.u32 %v7442_v7, %v11096_v36  ;;  %v2017_v40 = vrot.slane %v11097_v52, 1  ;;  %v11099_v7 = vshrl.u32 %v7293_v28, 16 }
 0x2da   : > { %v2015_v22 = vrot.slane %v11098_v12, 1 }
 0x2db   : > { %v2090_v1 = vsel %vm6911_vm5, %v2014_v4, 0  ;;  %v2089_v44 = vsel %vm6911_vm5, %v2012_v58, 0  ;;  %v2018_v36 = vor.u32 %v2017_v40, %v11099_v7  ;;  %v11102_v40 = vshll.u32 %v7316_v61, 16 }
 0x2dc   : > { %2174 = vrot.lane.b32.xlu1 %v7243_v3, %s5105_s30  ;;  %2272 = vrot.lane.b32.xlu0 %v2090_v1, %s5106_s13  ;;  %v11100_v3 = vshrl.u32 %v7277_v24, 16  ;;  %v11101_v1 = vshll.u32 %v7332_v35, 16 }
 0x2dd   : > { %v2092_v58 = vsel %vm6911_vm5, %v2018_v36, 0 }
 0x2de   : > { %v2016_v4 = vor.u32 %v2015_v22, %v11100_v3  ;;  %v2021_v12 = vrot.slane %v11101_v1, 1  ;;  %v11103_v22 = vshrl.u32 %v7332_v35, 16  ;;  %v2025_v3 = vrot.slane %v1878_v20, 1 }
 0x2df   : > { %v11105_v1 = vshrl.u32 %v7380_v10, 16 }
 0x2e0   : > { %2270 = vrot.lane.b32.xlu1 %v2089_v44, %s5106_s13  ;;  %2180 = vrot.lane.b32.xlu0 %v7293_v28, %s5105_s30  ;;  %v2091_v52 = vsel %vm6911_vm5, %v2016_v4, 0  ;;  %v2019_v28 = vrot.slane %v11102_v40, 1  ;;  %v2022_v44 = vor.u32 %v2021_v12, %v11103_v22  ;;  %v2133_v4 = vpop.permute.xlu0 %2132  ;;  %v11106_v12 = vshrl.u32 %v7349_v8, 16 }
 0x2e2   : > { %v2094_v36 = vsel %vm6911_vm5, %v2022_v44, 0  ;;  %v11108_v44 = vshrl.u32 %v7435_v37, 16 }
 0x2e4   : > { %2178 = vrot.lane.b32.xlu1 %v7277_v24, %s5105_s30  ;;  %2276 = vrot.lane.b32.xlu0 %v2092_v58, %s5106_s13  ;;  %v11104_v24 = vshrl.u32 %v7316_v61, 16 }
 0x2e6   : > { %v2020_v7 = vor.u32 %v2019_v28, %v11104_v24 }
 0x2e8   : > { %2274 = vrot.lane.b32.xlu1 %v2091_v52, %s5106_s13  ;;  %2184 = vrot.lane.b32.xlu0 %v7332_v35, %s5105_s30  ;;  %v2093_v58 = vsel %vm6911_vm5, %v2020_v7, 0  ;;  %v2023_v35 = vrot.slane %v1871_v53, 1  ;;  %v2135_v52 = vpop.permute.xlu0 %2134  ;;  %v11107_v53 = vshll.u32 %v7435_v37, 16  ;;  %v11109_v7 = vshrl.u32 %v7415_v2, 16 }
 0x2ea   : > { %v2024_v20 = vor.u32 %v2023_v35, %v11106_v12  ;;  %v2029_v28 = vrot.slane %v11107_v53, 1 }
 0x2ec   : > { %2182 = vrot.lane.b32.xlu1 %v7316_v61, %s5105_s30  ;;  %2280 = vrot.lane.b32.xlu0 %v2094_v36, %s5106_s13  ;;  %v2026_v61 = vor.u32 %v2025_v3, %v11105_v1  ;;  %v2095_v22 = vsel %vm6911_vm5, %v2024_v20, 0  ;;  %v2030_v24 = vor.u32 %v2029_v28, %v11108_v44 }
 0x2ee   : > { %v2096_v40 = vsel %vm6911_vm5, %v2026_v61, 0  ;;  %v2098_v3 = vsel %vm6911_vm5, %v2030_v24, 0 }
 0x2f0   : > { %2278 = vrot.lane.b32.xlu1 %v2093_v58, %s5106_s13  ;;  %2188 = vrot.lane.b32.xlu0 %v7380_v10, %s5105_s30  ;;  %v2027_v10 = vrot.slane %v1885_v23, 1  ;;  %v1937_v23 = vsel %vm7564_vm9, 0, %v7356_v31  ;;  %v11110_v31 = vld [vmem:[#allocation29_spill] sm:$0xff] }
 0x2f1   : > { %v2294_v58 = vsel %vm978_vm2, %v1937_v23, %v2133_v4  ;;  %v1938_v12 = vsel %vm7564_vm9, 0, %v11110_v31  ;;  %v1939_v4 = vsel %vm7564_vm9, 0, %v7420_v5  ;;  %v11111_v23 = vld [vmem:[#allocation6_spill] sm:$0xff] }
 0x2f2   : > { %v2028_v36 = vor.u32 %v2027_v10, %v11109_v7  ;;  %v2297_v20 = vsel %vm978_vm2, %v1938_v12, %v2135_v52 }
 0x2f4   : > { %2186 = vrot.lane.b32.xlu1 %v7349_v8, %s5105_s30  ;;  %2284 = vrot.lane.b32.xlu0 %v2096_v40, %s5106_s13  ;;  %v2137_v8 = vpop.permute.xlu0 %2136  ;;  %v2097_v1 = vsel %vm6911_vm5, %v2028_v36, 0 }
 0x2f5   : > { %v2300_v40 = vsel %vm978_vm2, %v1939_v4, %v2137_v8  ;;  %v11112_v4 = vld [vmem:[#allocation20_spill] sm:$0xff] }
 0x2f8   : > { %2282 = vrot.lane.b32.xlu1 %v2095_v22, %s5106_s13  ;;  %2192 = vrot.lane.b32.xlu0 %v7435_v37, %s5105_s30  ;;  %v2229_v37 = vpop.permute.xlu1 %2228  ;;  %v2233_v61 = vpop.permute.xlu0 %2232 }
 0x2f9   : > { %v2389_v35 = vsel %vm586_vm1, %v2294_v58, %v2229_v37  ;;  %v7825_v28 = vsel %vm586_vm1, %v2300_v40, %v2233_v61  ;;  %v1943_v58 = vsel %vm7564_vm9, 0, %v11111_v23  ;;  %v1945_v40 = vsel %vm7564_vm9, 0, %v7519_v13 }
 0x2fa   : > { %4688 = vmatmul.mubr.msk.bf16.vlgmr.msra.gmra.mrb[64].mxu0 %vm2455_vm10, %v2389_v35  ;;  %4753 = vmatprep.mubr.msk.bf16.mxu1 %vm2455_vm10, %v2389_v35  ;;  %v1948_v23 = vsel %vm7564_vm9, 0, %v7537_v29 }
 0x2fc   : > { %2190 = vrot.lane.b32.xlu1 %v7415_v2, %s5105_s30  ;;  %2288 = vrot.lane.b32.xlu0 %v2098_v3, %s5106_s13  ;;  %v2031_v2 = vrot.slane %v1899_v55, 1  ;;  %v2231_v53 = vpop.permute.xlu1 %2230  ;;  %v2141_v22 = vpop.permute.xlu0 %2140  ;;  %v1942_v3 = vsel %vm7564_vm9, 0, %v7488_v47 }
 0x2fd   : > { %v7822_v55 = vsel %vm586_vm1, %v2297_v20, %v2231_v53  ;;  %v1944_v20 = vsel %vm7564_vm9, 0, %v11112_v4  ;;  %v1950_v4 = vsel %vm7564_vm9, 0, %v7551_v62 }
 0x2fe   : > { %v2032_v10 = vor.u32 %v2031_v2, %v1896_v17  ;;  %4691 = vmatprep.mubr.msk.bf16.mxu0 %vm2455_vm10, %v7822_v55  ;;  %4754 = vmatmul.mubr.msk.bf16.vlgmr.msra.gmra.mrb[0].mxu1 %vm2455_vm10, %v7822_v55 }
 0x2ff   : > { %4818 = vmatpush3.bf16.msra.mxu1 %v7462_v46  ;;  %4757 = vmatprep.mubr.msk.bf16.mxu1 %vm2455_vm10, %v7825_v28  ;;  %v1941_v46 = vsel %vm7564_vm9, 0, %v7476_v25 }
 0x300   : > { %2286 = vrot.lane.b32.xlu1 %v2097_v1, %s5106_s13  ;;  %v2139_v5 = vpop.permute.xlu1 %2138  ;;  %v2099_v52 = vsel %vm6911_vm5, %v2032_v10, 0  ;;  %v2237_v44 = vpop.permute.xlu0 %2236  ;;  %v2306_v24 = vsel %vm978_vm2, %v1941_v46, %v2141_v22  ;;  %v1946_v46 = vsel %vm7564_vm9, 0, %v7527_v41 }
 0x301   : > { %v7855_v7 = vsel %vm586_vm1, %v2306_v24, %v2237_v44 }
 0x302   : > { %4692 = vmatmul.mubr.msk.bf16.gmra.mrb[68].mxu0 %vm2455_vm10, %v7825_v28 }
 0x304   : > { %2194 = vrot.lane.b32.xlu1 %v7471_v14, %s5105_s30  ;;  %v1940_v14 = vsel %vm7564_vm9, 0, %v7467_v42  ;;  %v2235_v0 = vpop.permute.xlu1 %2234  ;;  %v2145_v36 = vpop.permute.xlu0 %2144 }
 0x305   : > { %v2303_v17 = vsel %vm978_vm2, %v1940_v14, %v2139_v5  ;;  %v2312_v35 = vsel %vm978_vm2, %v1943_v58, %v2145_v36  ;;  %v1949_v58 = vsel %vm7564_vm9, 0, %v7546_v50 }
 0x306   : > { %v7852_v8 = vsel %vm586_vm1, %v2303_v17, %v2235_v0  ;;  %v1947_v17 = vsel %vm7564_vm9, 0, %v7532_v63 }
 0x307   : > { %4695 = vmatprep.mubr.msk.bf16.mxu0 %vm2455_vm10, %v7852_v8  ;;  %4758 = vmatmul.mubr.msk.bf16.gmra.mrb[4].mxu1 %vm2455_vm10, %v7852_v8 }
 0x308   : > { %2290 = vrot.lane.b32.xlu1 %v2099_v52, %s5106_s13  ;;  %4761 = vmatprep.mubr.msk.bf16.mxu1 %vm2455_vm10, %v7855_v7  ;;  %v2143_v42 = vpop.permute.xlu1 %2142  ;;  %v2241_v25 = vpop.permute.xlu0 %2240 }
 0x309   : > { %v2309_v37 = vsel %vm978_vm2, %v1942_v3, %v2143_v42  ;;  %v7877_v2 = vsel %vm586_vm1, %v2312_v35, %v2241_v25 }
 0x30a   : > { %4696 = vmatmul.mubr.msk.bf16.gmra.mrb[72].mxu0 %vm2455_vm10, %v7855_v7 }
 0x30c   : > { %v2239_v1 = vpop.permute.xlu1 %2238  ;;  %v2149_v31 = vpop.permute.xlu0 %2148 }
 0x30d   : > { %v7874_v61 = vsel %vm586_vm1, %v2309_v37, %v2239_v1  ;;  %v2318_v22 = vsel %vm978_vm2, %v1945_v40, %v2149_v31 }
 0x30e   : > { %4699 = vmatprep.mubr.msk.bf16.mxu0 %vm2455_vm10, %v7874_v61 }
 0x30f   : > { %4762 = vmatmul.mubr.msk.bf16.gmra.mrb[8].mxu1 %vm2455_vm10, %v7874_v61 }
 0x310   : > { %4765 = vmatprep.mubr.msk.bf16.mxu1 %vm2455_vm10, %v7877_v2  ;;  %v2147_v47 = vpop.permute.xlu1 %2146  ;;  %v2245_v12 = vpop.permute.xlu0 %2244 }
 0x311   : > { %v2315_v53 = vsel %vm978_vm2, %v1944_v20, %v2147_v47  ;;  %v7899_v52 = vsel %vm586_vm1, %v2318_v22, %v2245_v12  ;;  %v1951_v20 = vsel %vm7564_vm9, 0, %v7560_v30 }
 0x312   : > { %4700 = vmatmul.mubr.msk.bf16.gmra.mrb[76].mxu0 %vm2455_vm10, %v7877_v2 }
 0x314   : > { %v2243_v10 = vpop.permute.xlu1 %2242  ;;  %v2153_v44 = vpop.permute.xlu0 %2152 }
 0x315   : > { %v7896_v5 = vsel %vm586_vm1, %v2315_v53, %v2243_v10  ;;  %v2324_v0 = vsel %vm978_vm2, %v1947_v17, %v2153_v44  ;;  %v11113_v17 = vmov 0  }
 0x316   : > { %4703 = vmatprep.mubr.msk.bf16.mxu0 %vm2455_vm10, %v7896_v5 }
 0x317   : > { %4766 = vmatmul.mubr.msk.bf16.gmra.mrb[12].mxu1 %vm2455_vm10, %v7896_v5 }
 0x318   : > { %4769 = vmatprep.mubr.msk.bf16.mxu1 %vm2455_vm10, %v7899_v52  ;;  %v2151_v13 = vpop.permute.xlu1 %2150  ;;  %v2249_v14 = vpop.permute.xlu0 %2248 }
 0x319   : > { %v2321_v24 = vsel %vm978_vm2, %v1946_v46, %v2151_v13  ;;  %v7921_v25 = vsel %vm586_vm1, %v2324_v0, %v2249_v14  ;;  %v1952_v14 = vsel %vm7564_vm9, 0, %v7575_v16  ;;  %v1953_v46 = vsel %vm7564_vm9, 0, %v7587_v60 }
 0x31a   : > { %4704 = vmatmul.mubr.msk.bf16.gmra.mrb[80].mxu0 %vm2455_vm10, %v7899_v52 }
 0x31c   : > { %v2247_v36 = vpop.permute.xlu1 %2246  ;;  %v2157_v3 = vpop.permute.xlu0 %2156 }
 0x31d   : > { %v7918_v42 = vsel %vm586_vm1, %v2321_v24, %v2247_v36  ;;  %v2330_v35 = vsel %vm978_vm2, %v1949_v58, %v2157_v3 }
 0x31e   : > { %4707 = vmatprep.mubr.msk.bf16.mxu0 %vm2455_vm10, %v7918_v42 }
 0x31f   : > { %4770 = vmatmul.mubr.msk.bf16.gmra.mrb[16].mxu1 %vm2455_vm10, %v7918_v42 }
 0x320   : > { %4773 = vmatprep.mubr.msk.bf16.mxu1 %vm2455_vm10, %v7921_v25  ;;  %v2155_v63 = vpop.permute.xlu1 %2154 }
 0x321   : > { %v2253_v41 = vpop.permute.xlu0 %2252  ;;  %v2327_v37 = vsel %vm978_vm2, %v1948_v23, %v2155_v63 }
 0x322   : > { %4708 = vmatmul.mubr.msk.bf16.gmra.mrb[84].mxu0 %vm2455_vm10, %v7921_v25  ;;  %v7943_v47 = vsel %vm586_vm1, %v2330_v35, %v2253_v41 }
 0x324   : > { %v2251_v1 = vpop.permute.xlu1 %2250 }
 0x325   : > { %v7940_v31 = vsel %vm586_vm1, %v2327_v37, %v2251_v1  ;;  %v2161_v12 = vpop.permute.xlu0 %2160 }
 0x326   : > { %4711 = vmatprep.mubr.msk.bf16.mxu0 %vm2455_vm10, %v7940_v31  ;;  %v2336_v53 = vsel %vm978_vm2, %v1951_v20, %v2161_v12 }
 0x327   : > { %4774 = vmatmul.mubr.msk.bf16.gmra.mrb[20].mxu1 %vm2455_vm10, %v7940_v31 }
 0x328   : > { %4777 = vmatprep.mubr.msk.bf16.mxu1 %vm2455_vm10, %v7943_v47  ;;  %v2159_v29 = vpop.permute.xlu1 %2158 }
 0x329   : > { %v2257_v50 = vpop.permute.xlu0 %2256  ;;  %v2333_v40 = vsel %vm978_vm2, %v1950_v4, %v2159_v29  ;;  %v11115_v29 = vsel %vm7564_vm9, 0, %v7610_v54 }
 0x32a   : > { %4712 = vmatmul.mubr.msk.bf16.gmra.mrb[88].mxu0 %vm2455_vm10, %v7943_v47  ;;  %v7965_v44 = vsel %vm586_vm1, %v2336_v53, %v2257_v50 }
 0x32c   : > { %v2255_v22 = vpop.permute.xlu1 %2254 }
 0x32d   : > { %v7962_v10 = vsel %vm586_vm1, %v2333_v40, %v2255_v22  ;;  %v2165_v13 = vpop.permute.xlu0 %2164  ;;  %v11116_v22 = vsel %vm7564_vm9, 0, %v7615_v15 }
 0x32e   : > { %4715 = vmatprep.mubr.msk.bf16.mxu0 %vm2455_vm10, %v7962_v10  ;;  %v2342_v0 = vsel %vm978_vm2, %v1953_v46, %v2165_v13 }
 0x32f   : > { %4778 = vmatmul.mubr.msk.bf16.gmra.mrb[24].mxu1 %vm2455_vm10, %v7962_v10 }
 0x330   : > { %4781 = vmatprep.mubr.msk.bf16.mxu1 %vm2455_vm10, %v7965_v44  ;;  %v2163_v62 = vpop.permute.xlu1 %2162 }
 0x331   : > { %v2261_v30 = vpop.permute.xlu0 %2260  ;;  %v2339_v24 = vsel %vm978_vm2, %v1952_v14, %v2163_v62 }
 0x332   : > { %4716 = vmatmul.mubr.msk.bf16.gmra.mrb[92].mxu0 %vm2455_vm10, %v7965_v44  ;;  %v2421_v63 = vsel %vm586_vm1, %v2342_v0, %v2261_v30 }
 0x333   : > { %4719 = vmatprep.mubr.bf16.mxu0 %v11113_v17 }
 0x334   : > { %v2259_v36 = vpop.permute.xlu1 %2258 }
 0x335   : > { %v7985_v3 = vsel %vm586_vm1, %v2339_v24, %v2259_v36  ;;  %v2169_v41 = vpop.permute.xlu0 %2168 }
 0x336   : > { %v2348_v58 = vsel %vm978_vm2, %v1955_v59, %v2169_v41 }
 0x337   : > { %4782 = vmatmul.mubr.msk.bf16.gmra.mrb[28].mxu1 %vm2455_vm10, %v7985_v3 }
 0x338   : > { %4785 = vmatprep.mubr.msk.bf16.mxu1 %vm2455_vm10, %v2421_v63  ;;  %v2167_v16 = vpop.permute.xlu1 %2166 }
 0x339   : > { %v2265_v60 = vpop.permute.xlu0 %2264  ;;  %v2345_v23 = vsel %vm978_vm2, %v1954_v9, %v2167_v16  ;;  %v11114_v9 = vsel %vm7564_vm9, 0, %v7605_v43 }
 0x33a   : > { %4720 = vmatmul.mubr.msk.bf16.gmra.mrb[96].mxu0 %vm2455_vm10, %v2421_v63  ;;  %v8006_v1 = vsel %vm586_vm1, %v2348_v58, %v2265_v60 }
 0x33d   : > { %v2173_v12 = vpop.permute.xlu0 %2172 }
 0x33e   : > { %v2263_v37 = vpop.permute.xlu1 %2262  ;;  %v2354_v50 = vsel %vm978_vm2, %v11115_v29, %v2173_v12  ;;  %v11118_v12 = vsel %vm7564_vm9, 0, %v7673_v11 }
 0x33f   : > { %v8003_v35 = vsel %vm586_vm1, %v2345_v23, %v2263_v37 }
 0x340   : > { %4723 = vmatprep.mubr.msk.bf16.mxu0 %vm2455_vm10, %v8003_v35  ;;  %4786 = vmatmul.mubr.msk.bf16.gmra.mrb[32].mxu1 %vm2455_vm10, %v8003_v35 }
 0x341   : > { %4789 = vmatprep.mubr.msk.bf16.mxu1 %vm2455_vm10, %v8006_v1 }
 0x342   : > { %v2171_v45 = vpop.permute.xlu1 %2170  ;;  %4724 = vmatmul.mubr.msk.bf16.gmra.mrb[100].mxu0 %vm2455_vm10, %v8006_v1 }
 0x343   : > { %v2351_v59 = vsel %vm978_vm2, %v11114_v9, %v2171_v45 }
 0x346   : > { %v2269_v38 = vpop.permute.xlu0 %2268 }
 0x347   : > { %v8030_v40 = vsel %vm586_vm1, %v2354_v50, %v2269_v38  ;;  %v11119_v50 = vsel %vm7564_vm9, 0, %v7677_v33 }
 0x34a   : > { %v2267_v4 = vpop.permute.xlu1 %2266  ;;  %v2177_v53 = vpop.permute.xlu0 %2176 }
 0x34b   : > { %v8027_v20 = vsel %vm586_vm1, %v2351_v59, %v2267_v4  ;;  %v2360_v62 = vsel %vm978_vm2, %v1959_v18, %v2177_v53  ;;  %v11120_v53 = vsel %vm7564_vm9, 0, %v7690_v32  ;;  %v11121_v32 = vsel %vm7564_vm9, 0, %v7703_v6 }
 0x34c   : > { %4727 = vmatprep.mubr.msk.bf16.mxu0 %vm2455_vm10, %v8027_v20  ;;  %4790 = vmatmul.mubr.msk.bf16.gmra.mrb[36].mxu1 %vm2455_vm10, %v8027_v20 }
 0x34d   : > { %4793 = vmatprep.mubr.msk.bf16.mxu1 %vm2455_vm10, %v8030_v40  ;;  %4728 = vmatmul.mubr.msk.bf16.gmra.mrb[104].mxu0 %vm2455_vm10, %v8030_v40 }
 0x34e   : > { %v2175_v43 = vpop.permute.xlu1 %2174  ;;  %v2273_v54 = vpop.permute.xlu0 %2272 }
 0x34f   : > { %v2357_v13 = vsel %vm978_vm2, %v11116_v22, %v2175_v43  ;;  %v8054_v46 = vsel %vm586_vm1, %v2360_v62, %v2273_v54 }
 0x352   : > { %v2271_v30 = vpop.permute.xlu1 %2270  ;;  %v2181_v24 = vpop.permute.xlu0 %2180 }
 0x353   : > { %v8051_v14 = vsel %vm586_vm1, %v2357_v13, %v2271_v30  ;;  %v2366_v0 = vsel %vm978_vm2, %v1961_v48, %v2181_v24 }
 0x354   : > { %4731 = vmatprep.mubr.msk.bf16.mxu0 %vm2455_vm10, %v8051_v14  ;;  %4794 = vmatmul.mubr.msk.bf16.gmra.mrb[40].mxu1 %vm2455_vm10, %v8051_v14 }
 0x355   : > { %4797 = vmatprep.mubr.msk.bf16.mxu1 %vm2455_vm10, %v8054_v46  ;;  %4732 = vmatmul.mubr.msk.bf16.gmra.mrb[108].mxu0 %vm2455_vm10, %v8054_v46 }
 0x356   : > { %v2179_v15 = vpop.permute.xlu1 %2178  ;;  %v2277_v21 = vpop.permute.xlu0 %2276 }
 0x357   : > { %v2363_v18 = vsel %vm978_vm2, %v1960_v26, %v2179_v15  ;;  %v8078_v41 = vsel %vm586_vm1, %v2366_v0, %v2277_v21 }
 0x35a   : > { %v2275_v36 = vpop.permute.xlu1 %2274  ;;  %v2185_v16 = vpop.permute.xlu0 %2184 }
 0x35b   : > { %v8075_v63 = vsel %vm586_vm1, %v2363_v18, %v2275_v36  ;;  %v2372_v48 = vsel %vm978_vm2, %v1963_v51, %v2185_v16 }
 0x35c   : > { %4735 = vmatprep.mubr.msk.bf16.mxu0 %vm2455_vm10, %v8075_v63  ;;  %4798 = vmatmul.mubr.msk.bf16.gmra.mrb[44].mxu1 %vm2455_vm10, %v8075_v63 }
 0x35d   : > { %4801 = vmatprep.mubr.msk.bf16.mxu1 %vm2455_vm10, %v8078_v41  ;;  %4736 = vmatmul.mubr.msk.bf16.gmra.mrb[112].mxu0 %vm2455_vm10, %v8078_v41 }
 0x35e   : > { %v2183_v56 = vpop.permute.xlu1 %2182  ;;  %v2281_v49 = vpop.permute.xlu0 %2280 }
 0x35f   : > { %v2369_v26 = vsel %vm978_vm2, %v1962_v34, %v2183_v56  ;;  %v8102_v58 = vsel %vm586_vm1, %v2372_v48, %v2281_v49  ;;  %v11117_v34 = vsel %vm7564_vm9, 0, %v7669_v39 }
 0x362   : > { %v2279_v60 = vpop.permute.xlu1 %2278  ;;  %v2189_v37 = vpop.permute.xlu0 %2188 }
 0x363   : > { %v8099_v23 = vsel %vm586_vm1, %v2369_v26, %v2279_v60  ;;  %v2378_v45 = vsel %vm978_vm2, %v11118_v12, %v2189_v37 }
 0x364   : > { %4739 = vmatprep.mubr.msk.bf16.mxu0 %vm2455_vm10, %v8099_v23  ;;  %4802 = vmatmul.mubr.msk.bf16.gmra.mrb[48].mxu1 %vm2455_vm10, %v8099_v23 }
 0x365   : > { %4805 = vmatprep.mubr.msk.bf16.mxu1 %vm2455_vm10, %v8102_v58  ;;  %4740 = vmatmul.mubr.msk.bf16.gmra.mrb[116].mxu0 %vm2455_vm10, %v8102_v58 }
 0x366   : > { %v2187_v57 = vpop.permute.xlu1 %2186  ;;  %v2285_v19 = vpop.permute.xlu0 %2284 }
 0x367   : > { %v2375_v51 = vsel %vm978_vm2, %v11117_v34, %v2187_v57  ;;  %v8124_v59 = vsel %vm586_vm1, %v2378_v45, %v2285_v19 }
 0x36a   : > { %v2283_v38 = vpop.permute.xlu1 %2282  ;;  %v2193_v29 = vpop.permute.xlu0 %2192 }
 0x36b   : > { %v2443_v9 = vsel %vm586_vm1, %v2375_v51, %v2283_v38  ;;  %v2384_v43 = vsel %vm978_vm2, %v11120_v53, %v2193_v29 }
 0x36c   : > { %4743 = vmatprep.mubr.msk.bf16.mxu0 %vm2455_vm10, %v2443_v9  ;;  %4806 = vmatmul.mubr.msk.bf16.gmra.mrb[52].mxu1 %vm2455_vm10, %v2443_v9 }
 0x36d   : > { %4809 = vmatprep.mubr.msk.bf16.mxu1 %vm2455_vm10, %v8124_v59  ;;  %4744 = vmatmul.mubr.msk.bf16.gmra.mrb[120].mxu0 %vm2455_vm10, %v8124_v59 }
 0x36e   : > { %v2191_v39 = vpop.permute.xlu1 %2190  ;;  %v2289_v11 = vpop.permute.xlu0 %2288 }
 0x36f   : > { %v2381_v4 = vsel %vm978_vm2, %v11119_v50, %v2191_v39  ;;  %v2449_v13 = vsel %vm586_vm1, %v2384_v43, %v2289_v11 }
 0x372   : > { %v2287_v54 = vpop.permute.xlu1 %2286 }
 0x373   : > { %v2447_v22 = vsel %vm586_vm1, %v2381_v4, %v2287_v54 }
 0x374   : > { %4747 = vmatprep.mubr.msk.bf16.mxu0 %vm2455_vm10, %v2447_v22  ;;  %4810 = vmatmul.mubr.msk.bf16.gmra.mrb[56].mxu1 %vm2455_vm10, %v2447_v22 }
 0x375   : > { %4813 = vmatprep.mubr.msk.bf16.mxu1 %vm2455_vm10, %v2449_v13  ;;  %4748 = vmatmul.mubr.msk.bf16.gmra.mrb[124].mxu0 %vm2455_vm10, %v2449_v13 }
 0x376   : > { %v2195_v33 = vpop.permute.xlu1 %2194 }
 0x377   : > { %v2387_v62 = vsel %vm978_vm2, %v11121_v32, %v2195_v33 }
 0x37a   : > { %v2291_v30 = vpop.permute.xlu1 %2290 }
 0x37b   : > { %v2451_v24 = vsel %vm586_vm1, %v2387_v62, %v2291_v30 }
 0x37c   : > { %4814 = vmatmul.mubr.msk.bf16.gmra.mrb[60].mxu1 %vm2455_vm10, %v2451_v24 }
 0x37d   : > { %4819 = vmatprep.mubr.msk.bf16.mxu1 %vm2455_vm10, %v7822_v55 }
 0x384   : > { %4820 = vmatmul.mubr.msk.bf16.vlgmr.msra.gmra.mrb[0].mxu1 %vm2455_vm10, %v7825_v28 }
 0x385   : > { %4823 = vmatprep.mubr.msk.bf16.mxu1 %vm2455_vm10, %v7852_v8 }
 0x38c   : > { %4824 = vmatmul.mubr.msk.bf16.gmra.mrb[4].mxu1 %vm2455_vm10, %v7855_v7 }
 0x38d   : > { %4827 = vmatprep.mubr.msk.bf16.mxu1 %vm2455_vm10, %v7874_v61 }
 0x394   : > { %4828 = vmatmul.mubr.msk.bf16.gmra.mrb[8].mxu1 %vm2455_vm10, %v7877_v2 }
 0x395   : > { %4831 = vmatprep.mubr.msk.bf16.mxu1 %vm2455_vm10, %v7896_v5 }
 0x39c   : > { %4832 = vmatmul.mubr.msk.bf16.gmra.mrb[12].mxu1 %vm2455_vm10, %v7899_v52 }
 0x39d   : > { %4835 = vmatprep.mubr.msk.bf16.mxu1 %vm2455_vm10, %v7918_v42 }
 0x3a4   : > { %4836 = vmatmul.mubr.msk.bf16.gmra.mrb[16].mxu1 %vm2455_vm10, %v7921_v25 }
 0x3a5   : > { %4839 = vmatprep.mubr.msk.bf16.mxu1 %vm2455_vm10, %v7940_v31 }
 0x3ac   : > { %4840 = vmatmul.mubr.msk.bf16.gmra.mrb[20].mxu1 %vm2455_vm10, %v7943_v47 }
 0x3ad   : > { %4843 = vmatprep.mubr.msk.bf16.mxu1 %vm2455_vm10, %v7962_v10 }
 0x3b4   : > { %4844 = vmatmul.mubr.msk.bf16.gmra.mrb[24].mxu1 %vm2455_vm10, %v7965_v44 }
 0x3b5   : > { %4847 = vmatprep.mubr.msk.bf16.mxu1 %vm2455_vm10, %v7985_v3 }
 0x3bc   : > { %4848 = vmatmul.mubr.bf16.gmra.mrb[28].mxu1 %v11113_v17 }
 0x3bd   : > { %4851 = vmatprep.mubr.msk.bf16.mxu1 %vm2455_vm10, %v8003_v35 }
 0x3c4   : > { %4852 = vmatmul.mubr.msk.bf16.gmra.mrb[32].mxu1 %vm2455_vm10, %v8006_v1 }
 0x3c5   : > { %4855 = vmatprep.mubr.msk.bf16.mxu1 %vm2455_vm10, %v8027_v20 }
 0x3cc   : > { %4856 = vmatmul.mubr.msk.bf16.gmra.mrb[36].mxu1 %vm2455_vm10, %v8030_v40 }
 0x3cd   : > { %4859 = vmatprep.mubr.msk.bf16.mxu1 %vm2455_vm10, %v8051_v14  ;;  %v8196_v27 = vpop.f32.mrb[64].mxu0 }
 0x3ce   : > { %v8198_v6 = vpop.f32.mrb[65].mxu0 }
 0x3cf   : > { %v8202_v55 = vpop.f32.mrb[66].mxu0 }
 0x3d0   : > { %v8206_v28 = vpop.f32.mrb[67].mxu0 }
 0x3d4   : > { %4860 = vmatmul.mubr.msk.bf16.gmra.mrb[40].mxu1 %vm2455_vm10, %v8054_v46 }
 0x3d5   : > { %4863 = vmatprep.mubr.msk.bf16.mxu1 %vm2455_vm10, %v8075_v63  ;;  %v8208_v8 = vpop.f32.mrb[68].mxu0 }
 0x3d6   : > { %v8210_v7 = vpop.f32.mrb[69].mxu0 }
 0x3d7   : > { %v8214_v61 = vpop.f32.mrb[70].mxu0 }
 0x3d8   : > { %v8218_v2 = vpop.f32.mrb[71].mxu0 }
 0x3dc   : > { %4864 = vmatmul.mubr.msk.bf16.gmra.mrb[44].mxu1 %vm2455_vm10, %v8078_v41 }
 0x3dd   : > { %4867 = vmatprep.mubr.msk.bf16.mxu1 %vm2455_vm10, %v8099_v23  ;;  %v8220_v5 = vpop.f32.mrb[72].mxu0 }
 0x3de   : > { %v8222_v52 = vpop.f32.mrb[73].mxu0 }
 0x3df   : > { %v8226_v42 = vpop.f32.mrb[74].mxu0 }
 0x3e0   : > { %v8229_v25 = vpop.f32.mrb[75].mxu0 }
 0x3e4   : > { %4868 = vmatmul.mubr.msk.bf16.gmra.mrb[48].mxu1 %vm2455_vm10, %v8102_v58 }
 0x3e5   : > { %4871 = vmatprep.mubr.msk.bf16.mxu1 %vm2455_vm10, %v2443_v9  ;;  %v8231_v31 = vpop.f32.mrb[76].mxu0 }
 0x3e6   : > { %v8233_v47 = vpop.f32.mrb[77].mxu0 }
 0x3e7   : > { %v8237_v10 = vpop.f32.mrb[78].mxu0 }
 0x3e8   : > { %v8240_v44 = vpop.f32.mrb[79].mxu0 }
 0x3ec   : > { %4872 = vmatmul.mubr.msk.bf16.gmra.mrb[52].mxu1 %vm2455_vm10, %v8124_v59 }
 0x3ed   : > { %4875 = vmatprep.mubr.msk.bf16.mxu1 %vm2455_vm10, %v2447_v22  ;;  %v8242_v3 = vpop.f32.mrb[80].mxu0 }
 0x3ee   : > { %v8244_v35 = vpop.f32.mrb[81].mxu0 }
 0x3ef   : > { %v8247_v1 = vpop.f32.mrb[82].mxu0 }
 0x3f0   : > { %v8250_v20 = vpop.f32.mrb[83].mxu0 }
 0x3f4   : > { %4876 = vmatmul.mubr.msk.bf16.gmra.mrb[56].mxu1 %vm2455_vm10, %v2449_v13 }
 0x3f5   : > { %4879 = vmatprep.mubr.msk.bf16.mxu1 %vm2455_vm10, %v2451_v24  ;;  %v8252_v40 = vpop.f32.mrb[84].mxu0 }
 0x3f6   : > { %v8254_v14 = vpop.f32.mrb[85].mxu0 }
 0x3f7   : > { %v8257_v46 = vpop.f32.mrb[86].mxu0 }
 0x3f8   : > { %v8259_v15 = vpop.f32.mrb[87].mxu0 }
 0x3fc   : > { %4880 = vmatmul.mubr.bf16.gmra.mrb[60].mxu1 %v11113_v17 }
 0x3fd   : > { %v8261_v21 = vpop.f32.mrb[88].mxu0 }
 0x3fe   : > { %v8263_v18 = vpop.f32.mrb[89].mxu0 }
 0x3ff   : > { %v8265_v0 = vpop.f32.mrb[90].mxu0 }
 0x400   : > { %v8267_v36 = vpop.f32.mrb[91].mxu0 }
 0x405   : > { %v8269_v63 = vpop.f32.mrb[92].mxu0 }
 0x406   : > { %v8271_v41 = vpop.f32.mrb[93].mxu0 }
 0x407   : > { %v8273_v16 = vpop.f32.mrb[94].mxu0 }
 0x408   : > { %v8275_v56 = vpop.f32.mrb[95].mxu0 }
 0x40d   : > { %v8277_v17 = vpop.f32.mrb[96].mxu0 }
 0x40e   : > { %v8279_v49 = vpop.f32.mrb[97].mxu0 }
 0x40f   : > { %v8281_v26 = vpop.f32.mrb[98].mxu0 }
 0x410   : > { %v8283_v48 = vpop.f32.mrb[99].mxu0 }
 0x415   : > { %v8285_v60 = vpop.f32.mrb[100].mxu0 }
 0x416   : > { %v8287_v23 = vpop.f32.mrb[101].mxu0 }
 0x417   : > { %v8289_v58 = vpop.f32.mrb[102].mxu0 }
 0x418   : > { %v8291_v37 = vpop.f32.mrb[103].mxu0 }
 0x420   : > { %v8293_v57 = vpop.f32.mrb[104].mxu0 }
 0x421   : > { %v8295_v19 = vpop.f32.mrb[105].mxu0 }
 0x422   : > { %v8297_v34 = vpop.f32.mrb[106].mxu0 }
 0x423   : > { %v8299_v51 = vpop.f32.mrb[107].mxu0 }
 0x428   : > { %v8301_v12 = vpop.f32.mrb[108].mxu0 }
 0x429   : > { %v8303_v45 = vpop.f32.mrb[109].mxu0 }
 0x42a   : > { %v8305_v38 = vpop.f32.mrb[110].mxu0 }
 0x42b   : > { %v8307_v9 = vpop.f32.mrb[111].mxu0 }
 0x430   : > { %v8309_v59 = vpop.f32.mrb[112].mxu0 }
 0x431   : > { %v8311_v29 = vpop.f32.mrb[113].mxu0 }
 0x432   : > { %v8313_v39 = vpop.f32.mrb[114].mxu0 }
 0x433   : > { %v8315_v11 = vpop.f32.mrb[115].mxu0 }
 0x438   : > { %v8317_v50 = vpop.f32.mrb[116].mxu0 }
 0x439   : > { %v8319_v4 = vpop.f32.mrb[117].mxu0 }
 0x43a   : > { %11122 = vst [vmem:[#allocation21_spill] sm:$0xff] %v8319_v4  ;;  %v8321_v53 = vpop.f32.mrb[118].mxu0 }
 0x43b   : > { %11123 = vst [vmem:[#allocation23_spill] sm:$0xff] %v8321_v53  ;;  %v8323_v43 = vpop.f32.mrb[119].mxu0 }
 0x43c   : > { %11124 = vst [vmem:[#allocation42_spill] sm:$0xff] %v8323_v43 }
 0x440   : > { %v8325_v54 = vpop.f32.mrb[120].mxu0 }
 0x441   : > { %11125 = vst [vmem:[#allocation26_spill] sm:$0xff] %v8325_v54  ;;  %v8327_v22 = vpop.f32.mrb[121].mxu0 }
 0x442   : > { %11126 = vst [vmem:[#allocation16_spill] sm:$0xff] %v8327_v22  ;;  %v8329_v13 = vpop.f32.mrb[122].mxu0 }
 0x443   : > { %11127 = vst [vmem:[#allocation18_spill] sm:$0xff] %v8329_v13  ;;  %v8331_v33 = vpop.f32.mrb[123].mxu0 }
 0x444   : > { %11128 = vst [vmem:[#allocation8_spill] sm:$0xff] %v8331_v33 }
 0x448   : > { %v8333_v32 = vpop.f32.mrb[124].mxu0 }
 0x449   : > { %11129 = vst [vmem:[#allocation33_spill] sm:$0xff] %v8333_v32  ;;  %v8335_v62 = vpop.f32.mrb[125].mxu0 }
 0x44a   : > { %11130 = vst [vmem:[#allocation11_spill] sm:$0xff] %v8335_v62  ;;  %v8337_v30 = vpop.f32.mrb[126].mxu0 }
 0x44b   : > { %11131 = vst [vmem:[#allocation13_spill] sm:$0xff] %v8337_v30  ;;  %v8339_v24 = vpop.f32.mrb[127].mxu0 }
 0x44c   : > { %11132 = vst [vmem:[#allocation35_spill] sm:$0xff] %v8339_v24 }
 0x457   : > { %v4821_v4 = vpop.f32.mrb[0].mxu1 }
 0x458   : > { %v8342_v53 = vadd.f32 %v4821_v4, %v8196_v27  ;;  %v3145_v43 = vpop.f32.mrb[1].mxu1 }
 0x459   : > { %v8345_v54 = vadd.f32 %v3145_v43, %v8198_v6  ;;  %v4822_v22 = vpop.f32.mrb[2].mxu1 }
 0x45a   : > { %v8348_v13 = vadd.f32 %v4822_v22, %v8202_v55  ;;  %v3148_v33 = vpop.f32.mrb[3].mxu1  ;;  %v3469_v4 = vsel %vm586_vm1, %v8342_v53, 0.0 }
 0x45b   : > { %11133 = vst [vmem:[#allocation10_spill] sm:$0xff] %v8345_v54  ;;  %v8351_v32 = vadd.f32 %v3148_v33, %v8206_v28  ;;  %v3466_v30 = vsel %vm586_vm1, %v8345_v54, 0.0 }
 0x45c   : > { %v3471_v28 = vsel %vm586_vm1, %v8348_v13, 0.0 }
 0x45d   : > { %11134 = vst [vmem:[#allocation36_spill] sm:$0xff] %v8351_v32  ;;  %v3467_v24 = vsel %vm586_vm1, %v8351_v32, 0.0 }
 0x45e   : > { %v3468_v27 = vadd.f32 %v3467_v24, %v3466_v30 }
 0x45f   : > { %v4825_v6 = vpop.f32.mrb[4].mxu1 }
 0x460   : > { %v3470_v43 = vadd.f32 %v3469_v4, %v3468_v27  ;;  %v8360_v62 = vadd.f32 %v4825_v6, %v8208_v8  ;;  %v3161_v55 = vpop.f32.mrb[5].mxu1 }
 0x461   : > { %v8365_v22 = vadd.f32 %v3161_v55, %v8210_v7  ;;  %v4826_v33 = vpop.f32.mrb[6].mxu1 }
 0x462   : > { %v3472_v54 = vadd.f32 %v3471_v28, %v3470_v43  ;;  %v8368_v32 = vadd.f32 %v4826_v33, %v8214_v61  ;;  %v3164_v30 = vpop.f32.mrb[7].mxu1  ;;  %v3477_v7 = vsel %vm586_vm1, %v8360_v62, 0.0 }
 0x463   : > { %v3473_v24 = vsel %vm586_vm1, %v8365_v22, 0.0  ;;  %v8373_v27 = vadd.f32 %v3164_v30, %v8218_v2 }
 0x464   : > { %v3474_v8 = vadd.f32 %v3473_v24, %v3472_v54  ;;  %v3479_v33 = vsel %vm586_vm1, %v8368_v32, 0.0 }
 0x465   : > { %v3475_v4 = vsel %vm586_vm1, %v8373_v27, 0.0 }
 0x466   : > { %v3476_v6 = vadd.f32 %v3475_v4, %v3474_v8 }
 0x467   : > { %v4829_v55 = vpop.f32.mrb[8].mxu1 }
 0x468   : > { %v3478_v43 = vadd.f32 %v3477_v7, %v3476_v6  ;;  %v8380_v61 = vadd.f32 %v4829_v55, %v8220_v5  ;;  %v3177_v28 = vpop.f32.mrb[9].mxu1 }
 0x469   : > { %v8385_v2 = vadd.f32 %v3177_v28, %v8222_v52  ;;  %v4830_v54 = vpop.f32.mrb[10].mxu1 }
 0x46a   : > { %v3480_v30 = vadd.f32 %v3479_v33, %v3478_v43  ;;  %v8388_v24 = vadd.f32 %v4830_v54, %v8226_v42  ;;  %v3180_v8 = vpop.f32.mrb[11].mxu1  ;;  %v3485_v52 = vsel %vm586_vm1, %v8380_v61, 0.0 }
 0x46b   : > { %v3481_v4 = vsel %vm586_vm1, %v8385_v2, 0.0  ;;  %v8393_v6 = vadd.f32 %v3180_v8, %v8229_v25 }
 0x46c   : > { %v3482_v5 = vadd.f32 %v3481_v4, %v3480_v30  ;;  %v3487_v54 = vsel %vm586_vm1, %v8388_v24, 0.0 }
 0x46d   : > { %v3483_v7 = vsel %vm586_vm1, %v8393_v6, 0.0 }
 0x46e   : > { %v3484_v55 = vadd.f32 %v3483_v7, %v3482_v5 }
 0x46f   : > { %v4833_v28 = vpop.f32.mrb[12].mxu1 }
 0x470   : > { %v3486_v43 = vadd.f32 %v3485_v52, %v3484_v55  ;;  %v8400_v42 = vadd.f32 %v4833_v28, %v8231_v31  ;;  %v3193_v33 = vpop.f32.mrb[13].mxu1 }
 0x471   : > { %v8405_v25 = vadd.f32 %v3193_v33, %v8233_v47  ;;  %v4834_v30 = vpop.f32.mrb[14].mxu1 }
 0x472   : > { %v3488_v8 = vadd.f32 %v3487_v54, %v3486_v43  ;;  %v8408_v4 = vadd.f32 %v4834_v30, %v8237_v10  ;;  %v3196_v5 = vpop.f32.mrb[15].mxu1  ;;  %v3493_v47 = vsel %vm586_vm1, %v8400_v42, 0.0 }
 0x473   : > { %v3489_v7 = vsel %vm586_vm1, %v8405_v25, 0.0  ;;  %v8413_v55 = vadd.f32 %v3196_v5, %v8240_v44 }
 0x474   : > { %v3490_v31 = vadd.f32 %v3489_v7, %v3488_v8  ;;  %v3495_v30 = vsel %vm586_vm1, %v8408_v4, 0.0 }
 0x475   : > { %v3491_v52 = vsel %vm586_vm1, %v8413_v55, 0.0 }
 0x476   : > { %v3492_v28 = vadd.f32 %v3491_v52, %v3490_v31 }
 0x477   : > { %v4837_v33 = vpop.f32.mrb[16].mxu1 }
 0x478   : > { %v3494_v43 = vadd.f32 %v3493_v47, %v3492_v28  ;;  %v8420_v10 = vadd.f32 %v4837_v33, %v8242_v3  ;;  %v3209_v54 = vpop.f32.mrb[17].mxu1 }
 0x479   : > { %v8425_v44 = vadd.f32 %v3209_v54, %v8244_v35  ;;  %v4838_v8 = vpop.f32.mrb[18].mxu1 }
 0x47a   : > { %v3496_v5 = vadd.f32 %v3495_v30, %v3494_v43  ;;  %v8428_v7 = vadd.f32 %v4838_v8, %v8247_v1  ;;  %v3212_v31 = vpop.f32.mrb[19].mxu1  ;;  %v3501_v35 = vsel %vm586_vm1, %v8420_v10, 0.0 }
 0x47b   : > { %v3497_v52 = vsel %vm586_vm1, %v8425_v44, 0.0  ;;  %v8433_v28 = vadd.f32 %v3212_v31, %v8250_v20 }
 0x47c   : > { %v3498_v3 = vadd.f32 %v3497_v52, %v3496_v5  ;;  %v3503_v8 = vsel %vm586_vm1, %v8428_v7, 0.0 }
 0x47d   : > { %v3499_v47 = vsel %vm586_vm1, %v8433_v28, 0.0 }
 0x47e   : > { %v3500_v33 = vadd.f32 %v3499_v47, %v3498_v3 }
 0x47f   : > { %v4841_v54 = vpop.f32.mrb[20].mxu1 }
 0x480   : > { %v3502_v43 = vadd.f32 %v3501_v35, %v3500_v33  ;;  %v8440_v1 = vadd.f32 %v4841_v54, %v8252_v40  ;;  %v3225_v30 = vpop.f32.mrb[21].mxu1 }
 0x481   : > { %v8445_v20 = vadd.f32 %v3225_v30, %v8254_v14  ;;  %v4842_v5 = vpop.f32.mrb[22].mxu1 }
 0x482   : > { %v3504_v31 = vadd.f32 %v3503_v8, %v3502_v43  ;;  %v8448_v52 = vadd.f32 %v4842_v5, %v8257_v46  ;;  %v3228_v3 = vpop.f32.mrb[23].mxu1  ;;  %v3509_v14 = vsel %vm586_vm1, %v8440_v1, 0.0 }
 0x483   : > { %v3505_v47 = vsel %vm586_vm1, %v8445_v20, 0.0  ;;  %v8453_v33 = vadd.f32 %v3228_v3, %v8259_v15 }
 0x484   : > { %v3506_v40 = vadd.f32 %v3505_v47, %v3504_v31  ;;  %v3511_v5 = vsel %vm586_vm1, %v8448_v52, 0.0 }
 0x485   : > { %v3507_v35 = vsel %vm586_vm1, %v8453_v33, 0.0 }
 0x486   : > { %v3508_v54 = vadd.f32 %v3507_v35, %v3506_v40 }
 0x487   : > { %v4845_v30 = vpop.f32.mrb[24].mxu1 }
 0x488   : > { %v3510_v43 = vadd.f32 %v3509_v14, %v3508_v54  ;;  %v8460_v46 = vadd.f32 %v4845_v30, %v8261_v21  ;;  %v3241_v8 = vpop.f32.mrb[25].mxu1 }
 0x489   : > { %v8465_v15 = vadd.f32 %v3241_v8, %v8263_v18  ;;  %v4846_v31 = vpop.f32.mrb[26].mxu1 }
 0x48a   : > { %v3512_v3 = vadd.f32 %v3511_v5, %v3510_v43  ;;  %v8468_v47 = vadd.f32 %v4846_v31, %v8265_v0  ;;  %v3244_v40 = vpop.f32.mrb[27].mxu1  ;;  %v3517_v18 = vsel %vm586_vm1, %v8460_v46, 0.0 }
 0x48b   : > { %v3513_v35 = vsel %vm586_vm1, %v8465_v15, 0.0  ;;  %v8473_v54 = vadd.f32 %v3244_v40, %v8267_v36 }
 0x48c   : > { %v3514_v21 = vadd.f32 %v3513_v35, %v3512_v3  ;;  %v3519_v31 = vsel %vm586_vm1, %v8468_v47, 0.0 }
 0x48d   : > { %v3515_v14 = vsel %vm586_vm1, %v8473_v54, 0.0 }
 0x48e   : > { %v3516_v30 = vadd.f32 %v3515_v14, %v3514_v21 }
 0x48f   : > { %v4849_v8 = vpop.f32.mrb[28].mxu1 }
 0x490   : > { %v3518_v43 = vadd.f32 %v3517_v18, %v3516_v30  ;;  %v8480_v0 = vadd.f32 %v4849_v8, %v8269_v63  ;;  %v3257_v5 = vpop.f32.mrb[29].mxu1 }
 0x491   : > { %v8485_v36 = vadd.f32 %v3257_v5, %v8271_v41  ;;  %v4850_v3 = vpop.f32.mrb[30].mxu1 }
 0x492   : > { %v3520_v40 = vadd.f32 %v3519_v31, %v3518_v43  ;;  %v8488_v35 = vadd.f32 %v4850_v3, %v8273_v16  ;;  %v3260_v21 = vpop.f32.mrb[31].mxu1  ;;  %v3525_v41 = vsel %vm586_vm1, %v8480_v0, 0.0 }
 0x493   : > { %v3521_v14 = vsel %vm586_vm1, %v8485_v36, 0.0  ;;  %v8493_v30 = vadd.f32 %v3260_v21, %v8275_v56 }
 0x494   : > { %11135 = vst [vmem:[#allocation12_spill] sm:$0xff] %v8488_v35  ;;  %v3522_v63 = vadd.f32 %v3521_v14, %v3520_v40  ;;  %v3527_v3 = vsel %vm586_vm1, %v8488_v35, 0.0 }
 0x495   : > { %v3523_v18 = vsel %vm586_vm1, %v8493_v30, 0.0 }
 0x496   : > { %v3524_v8 = vadd.f32 %v3523_v18, %v3522_v63 }
 0x497   : > { %v4853_v5 = vpop.f32.mrb[32].mxu1 }
 0x498   : > { %v3526_v43 = vadd.f32 %v3525_v41, %v3524_v8  ;;  %v8500_v16 = vadd.f32 %v4853_v5, %v8277_v17  ;;  %v3273_v31 = vpop.f32.mrb[33].mxu1 }
 0x499   : > { %v8505_v56 = vadd.f32 %v3273_v31, %v8279_v49  ;;  %v4854_v40 = vpop.f32.mrb[34].mxu1 }
 0x49a   : > { %11136 = vst [vmem:[#allocation22_spill] sm:$0xff] %v8500_v16  ;;  %v3528_v21 = vadd.f32 %v3527_v3, %v3526_v43  ;;  %v8508_v14 = vadd.f32 %v4854_v40, %v8281_v26  ;;  %v3276_v63 = vpop.f32.mrb[35].mxu1  ;;  %v3533_v49 = vsel %vm586_vm1, %v8500_v16, 0.0  ;;  %v11160_v16 = vld [vmem:[#allocation13_spill] sm:$0xff] }
 0x49b   : > { %11137 = vst [vmem:[#allocation27_spill] sm:$0xff] %v8505_v56  ;;  %v3529_v18 = vsel %vm586_vm1, %v8505_v56, 0.0  ;;  %v8513_v8 = vadd.f32 %v3276_v63, %v8283_v48 }
 0x49c   : > { %11138 = vst [vmem:[#allocation17_spill] sm:$0xff] %v8508_v14  ;;  %v3530_v17 = vadd.f32 %v3529_v18, %v3528_v21  ;;  %v3535_v40 = vsel %vm586_vm1, %v8508_v14, 0.0 }
 0x49d   : > { %11139 = vst [vmem:[#allocation38_spill] sm:$0xff] %v8513_v8  ;;  %v3531_v41 = vsel %vm586_vm1, %v8513_v8, 0.0 }
 0x49e   : > { %v3532_v5 = vadd.f32 %v3531_v41, %v3530_v17 }
 0x49f   : > { %v4857_v31 = vpop.f32.mrb[36].mxu1 }
 0x4a0   : > { %v3534_v43 = vadd.f32 %v3533_v49, %v3532_v5  ;;  %v8520_v26 = vadd.f32 %v4857_v31, %v8285_v60  ;;  %v3289_v3 = vpop.f32.mrb[37].mxu1 }
 0x4a1   : > { %v8525_v48 = vadd.f32 %v3289_v3, %v8287_v23  ;;  %v4858_v21 = vpop.f32.mrb[38].mxu1 }
 0x4a2   : > { %11140 = vst [vmem:[#allocation25_spill] sm:$0xff] %v8520_v26  ;;  %v3536_v63 = vadd.f32 %v3535_v40, %v3534_v43  ;;  %v8528_v18 = vadd.f32 %v4858_v21, %v8289_v58  ;;  %v3292_v17 = vpop.f32.mrb[39].mxu1  ;;  %v3541_v23 = vsel %vm586_vm1, %v8520_v26, 0.0  ;;  %v11156_v26 = vld [vmem:[#allocation18_spill] sm:$0xff] }
 0x4a3   : > { %11141 = vst [vmem:[#allocation39_spill] sm:$0xff] %v8525_v48  ;;  %v3537_v41 = vsel %vm586_vm1, %v8525_v48, 0.0  ;;  %v8533_v5 = vadd.f32 %v3292_v17, %v8291_v37  ;;  %v11158_v48 = vld [vmem:[#allocation33_spill] sm:$0xff] }
 0x4a4   : > { %11142 = vst [vmem:[#allocation24_spill] sm:$0xff] %v8528_v18  ;;  %v3538_v60 = vadd.f32 %v3537_v41, %v3536_v63  ;;  %v3543_v21 = vsel %vm586_vm1, %v8528_v18, 0.0 }
 0x4a5   : > { %11143 = vst [vmem:[#allocation40_spill] sm:$0xff] %v8533_v5  ;;  %v3539_v49 = vsel %vm586_vm1, %v8533_v5, 0.0 }
 0x4a6   : > { %v3540_v31 = vadd.f32 %v3539_v49, %v3538_v60 }
 0x4a7   : > { %v4861_v3 = vpop.f32.mrb[40].mxu1 }
 0x4a8   : > { %v3542_v43 = vadd.f32 %v3541_v23, %v3540_v31  ;;  %v8540_v58 = vadd.f32 %v4861_v3, %v8293_v57  ;;  %v3305_v40 = vpop.f32.mrb[41].mxu1 }
 0x4a9   : > { %v8545_v37 = vadd.f32 %v3305_v40, %v8295_v19  ;;  %v4862_v63 = vpop.f32.mrb[42].mxu1 }
 0x4aa   : > { %11144 = vst [vmem:[#allocation19_spill] sm:$0xff] %v8540_v58  ;;  %v3544_v17 = vadd.f32 %v3543_v21, %v3542_v43  ;;  %v8548_v41 = vadd.f32 %v4862_v63, %v8297_v34  ;;  %v3308_v60 = vpop.f32.mrb[43].mxu1  ;;  %v3549_v19 = vsel %vm586_vm1, %v8540_v58, 0.0 }
 0x4ab   : > { %11145 = vst [vmem:[#allocation41_spill] sm:$0xff] %v8545_v37  ;;  %v3545_v49 = vsel %vm586_vm1, %v8545_v37, 0.0  ;;  %v8553_v31 = vadd.f32 %v3308_v60, %v8299_v51  ;;  %v11154_v37 = vld [vmem:[#allocation26_spill] sm:$0xff] }
 0x4ac   : > { %11146 = vst [vmem:[#allocation43_spill] sm:$0xff] %v8548_v41  ;;  %v3546_v57 = vadd.f32 %v3545_v49, %v3544_v17  ;;  %v3551_v63 = vsel %vm586_vm1, %v8548_v41, 0.0 }
 0x4ad   : > { %11147 = vst [vmem:[#allocation28_spill] sm:$0xff] %v8553_v31  ;;  %v3547_v23 = vsel %vm586_vm1, %v8553_v31, 0.0 }
 0x4ae   : > { %v3548_v3 = vadd.f32 %v3547_v23, %v3546_v57 }
 0x4af   : > { %v4865_v40 = vpop.f32.mrb[44].mxu1 }
 0x4b0   : > { %v3550_v43 = vadd.f32 %v3549_v19, %v3548_v3  ;;  %v8560_v34 = vadd.f32 %v4865_v40, %v8301_v12  ;;  %v3321_v21 = vpop.f32.mrb[45].mxu1 }
 0x4b1   : > { %v8565_v51 = vadd.f32 %v3321_v21, %v8303_v45  ;;  %v4866_v17 = vpop.f32.mrb[46].mxu1 }
 0x4b2   : > { %11148 = vst [vmem:[#allocation44_spill] sm:$0xff] %v8560_v34  ;;  %v3552_v60 = vadd.f32 %v3551_v63, %v3550_v43  ;;  %v8568_v49 = vadd.f32 %v4866_v17, %v8305_v38  ;;  %v3324_v57 = vpop.f32.mrb[47].mxu1  ;;  %v3557_v45 = vsel %vm586_vm1, %v8560_v34, 0.0 }
 0x4b3   : > { %11149 = vst [vmem:[#allocation5_spill] sm:$0xff] %v8565_v51  ;;  %v3553_v23 = vsel %vm586_vm1, %v8565_v51, 0.0  ;;  %v8573_v3 = vadd.f32 %v3324_v57, %v8307_v9 }
 0x4b4   : > { %11150 = vst [vmem:[#allocation45_spill] sm:$0xff] %v8568_v49  ;;  %v3554_v12 = vadd.f32 %v3553_v23, %v3552_v60  ;;  %v3559_v17 = vsel %vm586_vm1, %v8568_v49, 0.0  ;;  %v11151_v49 = vld [vmem:[#allocation21_spill] sm:$0xff] }
 0x4b5   : > { %v3555_v19 = vsel %vm586_vm1, %v8573_v3, 0.0 }
 0x4b6   : > { %v3556_v40 = vadd.f32 %v3555_v19, %v3554_v12 }
 0x4b7   : > { %v4869_v21 = vpop.f32.mrb[48].mxu1 }
 0x4b8   : > { %v3558_v43 = vadd.f32 %v3557_v45, %v3556_v40  ;;  %v8580_v38 = vadd.f32 %v4869_v21, %v8309_v59  ;;  %v3337_v63 = vpop.f32.mrb[49].mxu1 }
 0x4b9   : > { %v8585_v9 = vadd.f32 %v3337_v63, %v8311_v29  ;;  %v4870_v60 = vpop.f32.mrb[50].mxu1 }
 0x4ba   : > { %v3560_v57 = vadd.f32 %v3559_v17, %v3558_v43  ;;  %v8588_v23 = vadd.f32 %v4870_v60, %v8313_v39  ;;  %v3340_v12 = vpop.f32.mrb[51].mxu1  ;;  %v3565_v29 = vsel %vm586_vm1, %v8580_v38, 0.0 }
 0x4bb   : > { %v3561_v19 = vsel %vm586_vm1, %v8585_v9, 0.0  ;;  %v8593_v40 = vadd.f32 %v3340_v12, %v8315_v11 }
 0x4bc   : > { %v3562_v59 = vadd.f32 %v3561_v19, %v3560_v57  ;;  %v3567_v60 = vsel %vm586_vm1, %v8588_v23, 0.0  ;;  %v11152_v19 = vld [vmem:[#allocation23_spill] sm:$0xff] }
 0x4bd   : > { %v3563_v45 = vsel %vm586_vm1, %v8593_v40, 0.0 }
 0x4be   : > { %v3564_v21 = vadd.f32 %v3563_v45, %v3562_v59  ;;  %v11153_v45 = vld [vmem:[#allocation42_spill] sm:$0xff] }
 0x4bf   : > { %v4873_v63 = vpop.f32.mrb[52].mxu1 }
 0x4c0   : > { %v3566_v43 = vadd.f32 %v3565_v29, %v3564_v21  ;;  %v8600_v39 = vadd.f32 %v4873_v63, %v8317_v50  ;;  %v3353_v17 = vpop.f32.mrb[53].mxu1 }
 0x4c1   : > { %v4936_v11 = vadd.f32 %v3353_v17, %v11151_v49  ;;  %v4874_v12 = vpop.f32.mrb[54].mxu1 }
 0x4c2   : > { %v3568_v57 = vadd.f32 %v3567_v60, %v3566_v43  ;;  %v4937_v34 = vadd.f32 %v4874_v12, %v11152_v19  ;;  %v3356_v51 = vpop.f32.mrb[55].mxu1  ;;  %v3573_v29 = vsel %vm586_vm1, %v8600_v39, 0.0  ;;  %v11155_v60 = vld [vmem:[#allocation16_spill] sm:$0xff] }
 0x4c3   : > { %v3569_v59 = vsel %vm586_vm1, %v4936_v11, 0.0  ;;  %v4938_v41 = vadd.f32 %v3356_v51, %v11153_v45 }
 0x4c4   : > { %v3570_v58 = vadd.f32 %v3569_v59, %v3568_v57  ;;  %v3575_v43 = vsel %vm586_vm1, %v4937_v34, 0.0 }
 0x4c5   : > { %v3571_v21 = vsel %vm586_vm1, %v4938_v41, 0.0 }
 0x4c6   : > { %v3572_v50 = vadd.f32 %v3571_v21, %v3570_v58  ;;  %v11157_v58 = vld [vmem:[#allocation8_spill] sm:$0xff] }
 0x4c7   : > { %v4877_v63 = vpop.f32.mrb[56].mxu1 }
 0x4c8   : > { %v3574_v31 = vadd.f32 %v3573_v29, %v3572_v50  ;;  %v4939_v49 = vadd.f32 %v4877_v63, %v11154_v37  ;;  %v3369_v17 = vpop.f32.mrb[57].mxu1 }
 0x4c9   : > { %v4940_v12 = vadd.f32 %v3369_v17, %v11155_v60  ;;  %v4878_v19 = vpop.f32.mrb[58].mxu1 }
 0x4ca   : > { %v3576_v18 = vadd.f32 %v3575_v43, %v3574_v31  ;;  %v4941_v51 = vadd.f32 %v4878_v19, %v11156_v26  ;;  %v3372_v57 = vpop.f32.mrb[59].mxu1  ;;  %v3581_v37 = vsel %vm586_vm1, %v4939_v49, 0.0  ;;  %v11159_v43 = vld [vmem:[#allocation11_spill] sm:$0xff] }
 0x4cb   : > { %v3577_v59 = vsel %vm586_vm1, %v4940_v12, 0.0  ;;  %v4942_v45 = vadd.f32 %v3372_v57, %v11157_v58 }
 0x4cc   : > { %v3578_v21 = vadd.f32 %v3577_v59, %v3576_v18  ;;  %v3583_v31 = vsel %vm586_vm1, %v4941_v51, 0.0  ;;  %v11161_v59 = vld [vmem:[#allocation35_spill] sm:$0xff] }
 0x4cd   : > { %v3579_v5 = vsel %vm586_vm1, %v4942_v45, 0.0 }
 0x4ce   : > { %v3580_v50 = vadd.f32 %v3579_v5, %v3578_v21 }
 0x4cf   : > { %v4881_v29 = vpop.f32.mrb[60].mxu1 }
 0x4d0   : > { %v3582_v63 = vadd.f32 %v3581_v37, %v3580_v50  ;;  %v4943_v14 = vadd.f32 %v4881_v29, %v11158_v48  ;;  %v3385_v17 = vpop.f32.mrb[61].mxu1 }
 0x4d1   : > { %v4944_v26 = vadd.f32 %v3385_v17, %v11159_v43  ;;  %v4882_v60 = vpop.f32.mrb[62].mxu1 }
 0x4d2   : > { %v3584_v19 = vadd.f32 %v3583_v31, %v3582_v63  ;;  %v4945_v8 = vadd.f32 %v4882_v60, %v11160_v16  ;;  %v3388_v57 = vpop.f32.mrb[63].mxu1  ;;  %v3589_v48 = vsel %vm586_vm1, %v4943_v14, 0.0 }
 0x4d3   : > { %v3585_v18 = vsel %vm586_vm1, %v4944_v26, 0.0  ;;  %v4946_v5 = vadd.f32 %v3388_v57, %v11161_v59 }
 0x4d4   : > { %v3586_v58 = vadd.f32 %v3585_v18, %v3584_v19  ;;  %v3591_v29 = vsel %vm586_vm1, %v4945_v8, 0.0 }
 0x4d5   : > { %v3587_v21 = vsel %vm586_vm1, %v4946_v5, 0.0 }
 0x4d6   : > { %v3588_v50 = vadd.f32 %v3587_v21, %v3586_v58 }
 0x4d8   : > { %v3590_v37 = vadd.f32 %v3589_v48, %v3588_v50 }
 0x4da   : > { %v3592_v56 = vadd.f32 %v3591_v29, %v3590_v37 }
 0x4dc   : > { %v3593_v17 = vrot.slane %v3592_v56, 4 }
 0x4de   : > { %v3594_v43 = vadd.f32 %v3593_v17, %v3592_v56 }
 0x4e0   : > { %v3595_v63 = vrot.slane %v3594_v43, 2 }
 0x4e2   : > { %v3596_v31 = vadd.f32 %v3595_v63, %v3594_v43 }
 0x4e4   : > { %v3597_v16 = vrot.slane %v3596_v31, 1 }
 0x4e6   : > { %v3598_v60 = vadd.f32 %v3597_v16, %v3596_v31 }
 0x4e8   : > { %v8628_v35 = vmul.f32 0.001953125, %v3598_v60 }
 0x4ea   : > { %v8632_v19 = vsub.f32 %v8573_v3, %v8628_v35  ;;  %v8636_v57 = vsub.f32 %v8585_v9, %v8628_v35  ;;  %v8640_v18 = vsub.f32 %v8593_v40, %v8628_v35  ;;  %v8644_v56 = vsub.f32 %v8580_v38, %v8628_v35 }
 0x4eb   : > { %v8648_v59 = vsub.f32 %v8588_v23, %v8628_v35  ;;  %v8651_v58 = vsub.f32 %v4936_v11, %v8628_v35  ;;  %v8654_v3 = vsub.f32 %v4938_v41, %v8628_v35  ;;  %v8658_v9 = vsub.f32 %v8600_v39, %v8628_v35 }
 0x4ec   : > { %11162 = vst [vmem:[#allocation30_spill] sm:$0xff] %v8632_v19  ;;  %v8661_v40 = vsub.f32 %v4937_v34, %v8628_v35  ;;  %v8664_v38 = vsub.f32 %v4940_v12, %v8628_v35  ;;  %v8667_v21 = vsub.f32 %v4942_v45, %v8628_v35  ;;  %v8670_v23 = vsub.f32 %v4939_v49, %v8628_v35  ;;  %v11166_v45 = vld [vmem:[#allocation10_spill] sm:$0xff]  ;;  %v11167_v49 = vld [vmem:[#allocation36_spill] sm:$0xff] }
 0x4ed   : > { %11163 = vst [vmem:[#allocation7_spill] sm:$0xff] %v8658_v9  ;;  %v8673_v11 = vsub.f32 %v4941_v51, %v8628_v35  ;;  %v8676_v41 = vsub.f32 %v4944_v26, %v8628_v35  ;;  %v8679_v39 = vsub.f32 %v4946_v5, %v8628_v35  ;;  %v8682_v34 = vsub.f32 %v4943_v14, %v8628_v35 }
 0x4ee   : > { %11164 = vst [vmem:[#allocation34_spill] sm:$0xff] %v8661_v40  ;;  %v8685_v12 = vsub.f32 %v4945_v8, %v8628_v35  ;;  %v8689_v50 = vsub.f32 %v11166_v45, %v8628_v35  ;;  %v8693_v51 = vsub.f32 %v11167_v49, %v8628_v35  ;;  %v8697_v26 = vsub.f32 %v8342_v53, %v8628_v35 }
 0x4ef   : > { %11165 = vst [vmem:[#allocation15_spill] sm:$0xff] %v8682_v34  ;;  %v8701_v5 = vsub.f32 %v8348_v13, %v8628_v35  ;;  %v8709_v48 = vsub.f32 %v8365_v22, %v8628_v35  ;;  %v8715_v53 = vsub.f32 %v8373_v27, %v8628_v35  ;;  %v8723_v63 = vsub.f32 %v8360_v62, %v8628_v35 }
 0x4f0   : > { %v3664_v14 = vmul.f32 %v8689_v50, %v8689_v50  ;;  %v3665_v8 = vmul.f32 %v8693_v51, %v8693_v51  ;;  %v3666_v37 = vmul.f32 %v8697_v26, %v8697_v26  ;;  %v8730_v27 = vsub.f32 %v8368_v32, %v8628_v35 }
 0x4f1   : > { %v3667_v13 = vmul.f32 %v8701_v5, %v8701_v5  ;;  %v3668_v22 = vmul.f32 %v8709_v48, %v8709_v48  ;;  %v3669_v60 = vmul.f32 %v8715_v53, %v8715_v53  ;;  %v8737_v62 = vsub.f32 %v8385_v2, %v8628_v35 }
 0x4f2   : > { %v3728_v29 = vsel %vm586_vm1, %v3664_v14, 0.0  ;;  %v3729_v17 = vsel %vm586_vm1, %v3665_v8, 0.0  ;;  %v3731_v31 = vsel %vm586_vm1, %v3666_v37, 0.0  ;;  %v3670_v14 = vmul.f32 %v8723_v63, %v8723_v63 }
 0x4f3   : > { %v3730_v43 = vadd.f32 %v3729_v17, %v3728_v29  ;;  %v3733_v45 = vsel %vm586_vm1, %v3667_v13, 0.0  ;;  %v3735_v8 = vsel %vm586_vm1, %v3668_v22, 0.0  ;;  %v8744_v32 = vsub.f32 %v8393_v6, %v8628_v35 }
 0x4f4   : > { %v3671_v29 = vmul.f32 %v8730_v27, %v8730_v27  ;;  %v3737_v13 = vsel %vm586_vm1, %v3669_v60, 0.0  ;;  %v8751_v2 = vsub.f32 %v8380_v61, %v8628_v35  ;;  %v3739_v22 = vsel %vm586_vm1, %v3670_v14, 0.0 }
 0x4f5   : > { %v3732_v16 = vadd.f32 %v3731_v31, %v3730_v43  ;;  %v3672_v43 = vmul.f32 %v8737_v62, %v8737_v62  ;;  %v8758_v6 = vsub.f32 %v8388_v24, %v8628_v35  ;;  %v8765_v61 = vsub.f32 %v8405_v25, %v8628_v35 }
 0x4f6   : > { %v3741_v60 = vsel %vm586_vm1, %v3671_v29, 0.0  ;;  %v8772_v24 = vsub.f32 %v8413_v55, %v8628_v35  ;;  %v8779_v25 = vsub.f32 %v8400_v42, %v8628_v35  ;;  %v8786_v55 = vsub.f32 %v8408_v4, %v8628_v35 }
 0x4f7   : > { %v3734_v49 = vadd.f32 %v3733_v45, %v3732_v16  ;;  %v3673_v16 = vmul.f32 %v8744_v32, %v8744_v32  ;;  %v3743_v14 = vsel %vm586_vm1, %v3672_v43, 0.0  ;;  %v8793_v42 = vsub.f32 %v8425_v44, %v8628_v35 }
 0x4f8   : > { %v8800_v4 = vsub.f32 %v8433_v28, %v8628_v35  ;;  %v8807_v44 = vsub.f32 %v8420_v10, %v8628_v35  ;;  %v8814_v28 = vsub.f32 %v8428_v7, %v8628_v35  ;;  %v8821_v10 = vsub.f32 %v8445_v20, %v8628_v35 }
 0x4f9   : > { %v3736_v37 = vadd.f32 %v3735_v8, %v3734_v49  ;;  %v3674_v49 = vmul.f32 %v8751_v2, %v8751_v2  ;;  %v3745_v29 = vsel %vm586_vm1, %v3673_v16, 0.0  ;;  %v8828_v7 = vsub.f32 %v8453_v33, %v8628_v35 }
 0x4fa   : > { %v8835_v20 = vsub.f32 %v8440_v1, %v8628_v35  ;;  %v8842_v33 = vsub.f32 %v8448_v52, %v8628_v35  ;;  %v8849_v1 = vsub.f32 %v8465_v15, %v8628_v35  ;;  %v8856_v52 = vsub.f32 %v8473_v54, %v8628_v35 }
 0x4fb   : > { %v3738_v17 = vadd.f32 %v3737_v13, %v3736_v37  ;;  %v3675_v37 = vmul.f32 %v8758_v6, %v8758_v6  ;;  %v3747_v43 = vsel %vm586_vm1, %v3674_v49, 0.0  ;;  %v8863_v15 = vsub.f32 %v8460_v46, %v8628_v35 }
 0x4fc   : > { %v8870_v54 = vsub.f32 %v8468_v47, %v8628_v35  ;;  %v8877_v46 = vsub.f32 %v8485_v36, %v8628_v35  ;;  %v8884_v47 = vsub.f32 %v8493_v30, %v8628_v35  ;;  %v8891_v36 = vsub.f32 %v8480_v0, %v8628_v35 }
 0x4fd   : > { %v3740_v31 = vadd.f32 %v3739_v22, %v3738_v17  ;;  %v3676_v17 = vmul.f32 %v8765_v61, %v8765_v61  ;;  %v3749_v16 = vsel %vm586_vm1, %v3675_v37, 0.0 }
 0x4fe   : > { %11168 = vst [vmem:[#allocation32_spill] sm:$0xff] %v8884_v47  ;;  %11169 = vst [vmem:[#allocation9_spill] sm:$0xff] %v8891_v36 }
 0x4ff   : > { %v3742_v45 = vadd.f32 %v3741_v60, %v3740_v31  ;;  %v3677_v31 = vmul.f32 %v8772_v24, %v8772_v24  ;;  %v3751_v49 = vsel %vm586_vm1, %v3676_v17, 0.0 }
 0x501   : > { %v3744_v8 = vadd.f32 %v3743_v14, %v3742_v45  ;;  %v3678_v45 = vmul.f32 %v8779_v25, %v8779_v25  ;;  %v3753_v37 = vsel %vm586_vm1, %v3677_v31, 0.0 }
 0x503   : > { %v3746_v13 = vadd.f32 %v3745_v29, %v3744_v8  ;;  %v3679_v8 = vmul.f32 %v8786_v55, %v8786_v55  ;;  %v3755_v17 = vsel %vm586_vm1, %v3678_v45, 0.0 }
 0x505   : > { %v3748_v22 = vadd.f32 %v3747_v43, %v3746_v13  ;;  %v3680_v13 = vmul.f32 %v8793_v42, %v8793_v42  ;;  %v3757_v31 = vsel %vm586_vm1, %v3679_v8, 0.0 }
 0x507   : > { %v3750_v60 = vadd.f32 %v3749_v16, %v3748_v22  ;;  %v3681_v22 = vmul.f32 %v8800_v4, %v8800_v4  ;;  %v3759_v45 = vsel %vm586_vm1, %v3680_v13, 0.0 }
 0x509   : > { %v3752_v14 = vadd.f32 %v3751_v49, %v3750_v60  ;;  %v3682_v60 = vmul.f32 %v8807_v44, %v8807_v44  ;;  %v3761_v8 = vsel %vm586_vm1, %v3681_v22, 0.0 }
 0x50b   : > { %v3754_v29 = vadd.f32 %v3753_v37, %v3752_v14  ;;  %v3683_v14 = vmul.f32 %v8814_v28, %v8814_v28  ;;  %v3763_v13 = vsel %vm586_vm1, %v3682_v60, 0.0 }
 0x50d   : > { %v3756_v43 = vadd.f32 %v3755_v17, %v3754_v29  ;;  %v3684_v29 = vmul.f32 %v8821_v10, %v8821_v10  ;;  %v3765_v22 = vsel %vm586_vm1, %v3683_v14, 0.0 }
 0x50f   : > { %v3758_v16 = vadd.f32 %v3757_v31, %v3756_v43  ;;  %v3685_v43 = vmul.f32 %v8828_v7, %v8828_v7  ;;  %v3767_v60 = vsel %vm586_vm1, %v3684_v29, 0.0 }
 0x511   : > { %v3760_v49 = vadd.f32 %v3759_v45, %v3758_v16  ;;  %v3686_v16 = vmul.f32 %v8835_v20, %v8835_v20  ;;  %v3769_v14 = vsel %vm586_vm1, %v3685_v43, 0.0 }
 0x513   : > { %v3762_v37 = vadd.f32 %v3761_v8, %v3760_v49  ;;  %v3687_v49 = vmul.f32 %v8842_v33, %v8842_v33  ;;  %v3771_v29 = vsel %vm586_vm1, %v3686_v16, 0.0 }
 0x515   : > { %v3764_v17 = vadd.f32 %v3763_v13, %v3762_v37  ;;  %v3688_v37 = vmul.f32 %v8849_v1, %v8849_v1  ;;  %v3773_v43 = vsel %vm586_vm1, %v3687_v49, 0.0 }
 0x517   : > { %v3766_v31 = vadd.f32 %v3765_v22, %v3764_v17  ;;  %v3689_v17 = vmul.f32 %v8856_v52, %v8856_v52  ;;  %v3775_v16 = vsel %vm586_vm1, %v3688_v37, 0.0 }
 0x519   : > { %v3768_v45 = vadd.f32 %v3767_v60, %v3766_v31  ;;  %v3690_v31 = vmul.f32 %v8863_v15, %v8863_v15  ;;  %v3777_v49 = vsel %vm586_vm1, %v3689_v17, 0.0 }
 0x51b   : > { %v3770_v8 = vadd.f32 %v3769_v14, %v3768_v45  ;;  %v3691_v45 = vmul.f32 %v8870_v54, %v8870_v54  ;;  %v3779_v37 = vsel %vm586_vm1, %v3690_v31, 0.0 }
 0x51d   : > { %v3772_v13 = vadd.f32 %v3771_v29, %v3770_v8  ;;  %v3692_v8 = vmul.f32 %v8877_v46, %v8877_v46  ;;  %v3781_v17 = vsel %vm586_vm1, %v3691_v45, 0.0 }
 0x51f   : > { %v3774_v22 = vadd.f32 %v3773_v43, %v3772_v13  ;;  %v11170_v13 = vld [vmem:[#allocation12_spill] sm:$0xff]  ;;  %v3693_v43 = vmul.f32 %v8884_v47, %v8884_v47  ;;  %v3783_v31 = vsel %vm586_vm1, %v3692_v8, 0.0 }
 0x520   : > { %v8898_v30 = vsub.f32 %v11170_v13, %v8628_v35 }
 0x521   : > { %v3776_v60 = vadd.f32 %v3775_v16, %v3774_v22  ;;  %v11172_v16 = vld [vmem:[#allocation27_spill] sm:$0xff]  ;;  %v3785_v45 = vsel %vm586_vm1, %v3693_v43, 0.0 }
 0x522   : > { %11171 = vst [vmem:[#allocation31_spill] sm:$0xff] %v8898_v30  ;;  %v8905_v0 = vsub.f32 %v11172_v16, %v8628_v35  ;;  %v3695_v13 = vmul.f32 %v8898_v30, %v8898_v30 }
 0x523   : > { %v3778_v14 = vadd.f32 %v3777_v49, %v3776_v60  ;;  %v3694_v60 = vmul.f32 %v8891_v36, %v8891_v36 }
 0x524   : > { %11173 = vst [vmem:[#allocation37_spill] sm:$0xff] %v8905_v0  ;;  %v3696_v36 = vmul.f32 %v8905_v0, %v8905_v0  ;;  %v3789_v43 = vsel %vm586_vm1, %v3695_v13, 0.0 }
 0x525   : > { %v3780_v29 = vadd.f32 %v3779_v37, %v3778_v14  ;;  %v11174_v14 = vld [vmem:[#allocation38_spill] sm:$0xff]  ;;  %v3787_v8 = vsel %vm586_vm1, %v3694_v60, 0.0 }
 0x526   : > { %v8912_v37 = vsub.f32 %v11174_v14, %v8628_v35  ;;  %v3791_v60 = vsel %vm586_vm1, %v3696_v36, 0.0 }
 0x527   : > { %v3782_v22 = vadd.f32 %v3781_v17, %v3780_v29  ;;  %v11176_v17 = vld [vmem:[#allocation22_spill] sm:$0xff] }
 0x528   : > { %11175 = vst [vmem:[#allocation29_spill] sm:$0xff] %v8912_v37  ;;  %v8919_v16 = vsub.f32 %v11176_v17, %v8628_v35  ;;  %v3697_v30 = vmul.f32 %v8912_v37, %v8912_v37 }
 0x529   : > { %v3784_v49 = vadd.f32 %v3783_v31, %v3782_v22  ;;  %v11178_v31 = vld [vmem:[#allocation17_spill] sm:$0xff] }
 0x52a   : > { %11177 = vst [vmem:[#allocation6_spill] sm:$0xff] %v8919_v16  ;;  %v8926_v14 = vsub.f32 %v11178_v31, %v8628_v35  ;;  %v3698_v0 = vmul.f32 %v8919_v16, %v8919_v16  ;;  %v3793_v13 = vsel %vm586_vm1, %v3697_v30, 0.0 }
 0x52b   : > { %v3786_v29 = vadd.f32 %v3785_v45, %v3784_v49  ;;  %v11180_v45 = vld [vmem:[#allocation39_spill] sm:$0xff] }
 0x52c   : > { %11179 = vst [vmem:[#allocation20_spill] sm:$0xff] %v8926_v14  ;;  %v8933_v17 = vsub.f32 %v11180_v45, %v8628_v35  ;;  %v3699_v37 = vmul.f32 %v8926_v14, %v8926_v14  ;;  %v3795_v36 = vsel %vm586_vm1, %v3698_v0, 0.0 }
 0x52d   : > { %v3788_v22 = vadd.f32 %v3787_v8, %v3786_v29  ;;  %v11182_v8 = vld [vmem:[#allocation40_spill] sm:$0xff] }
 0x52e   : > { %11181 = vst [vmem:[#allocation21_spill] sm:$0xff] %v8933_v17  ;;  %v8940_v31 = vsub.f32 %v11182_v8, %v8628_v35  ;;  %v3700_v16 = vmul.f32 %v8933_v17, %v8933_v17  ;;  %v3797_v30 = vsel %vm586_vm1, %v3699_v37, 0.0 }
 0x52f   : > { %v3790_v49 = vadd.f32 %v3789_v43, %v3788_v22  ;;  %v11184_v43 = vld [vmem:[#allocation25_spill] sm:$0xff] }
 0x530   : > { %11183 = vst [vmem:[#allocation23_spill] sm:$0xff] %v8940_v31  ;;  %v8947_v45 = vsub.f32 %v11184_v43, %v8628_v35  ;;  %v3701_v14 = vmul.f32 %v8940_v31, %v8940_v31  ;;  %v3799_v0 = vsel %vm586_vm1, %v3700_v16, 0.0 }
 0x531   : > { %v3792_v29 = vadd.f32 %v3791_v60, %v3790_v49  ;;  %v11186_v60 = vld [vmem:[#allocation24_spill] sm:$0xff] }
 0x532   : > { %11185 = vst [vmem:[#allocation42_spill] sm:$0xff] %v8947_v45  ;;  %v8954_v8 = vsub.f32 %v11186_v60, %v8628_v35  ;;  %v3702_v17 = vmul.f32 %v8947_v45, %v8947_v45  ;;  %v3801_v37 = vsel %vm586_vm1, %v3701_v14, 0.0 }
 0x533   : > { %v3794_v22 = vadd.f32 %v3793_v13, %v3792_v29  ;;  %v11188_v13 = vld [vmem:[#allocation41_spill] sm:$0xff] }
 0x534   : > { %11187 = vst [vmem:[#allocation26_spill] sm:$0xff] %v8954_v8  ;;  %v8961_v43 = vsub.f32 %v11188_v13, %v8628_v35  ;;  %v3703_v31 = vmul.f32 %v8954_v8, %v8954_v8  ;;  %v3803_v16 = vsel %vm586_vm1, %v3702_v17, 0.0 }
 0x535   : > { %v3796_v49 = vadd.f32 %v3795_v36, %v3794_v22  ;;  %v11190_v36 = vld [vmem:[#allocation28_spill] sm:$0xff] }
 0x536   : > { %11189 = vst [vmem:[#allocation16_spill] sm:$0xff] %v8961_v43  ;;  %v8968_v60 = vsub.f32 %v11190_v36, %v8628_v35  ;;  %v3704_v45 = vmul.f32 %v8961_v43, %v8961_v43  ;;  %v3805_v14 = vsel %vm586_vm1, %v3703_v31, 0.0 }
 0x537   : > { %v3798_v29 = vadd.f32 %v3797_v30, %v3796_v49  ;;  %v11192_v30 = vld [vmem:[#allocation19_spill] sm:$0xff] }
 0x538   : > { %11191 = vst [vmem:[#allocation18_spill] sm:$0xff] %v8968_v60  ;;  %v8975_v13 = vsub.f32 %v11192_v30, %v8628_v35  ;;  %v3705_v8 = vmul.f32 %v8968_v60, %v8968_v60  ;;  %v3807_v17 = vsel %vm586_vm1, %v3704_v45, 0.0  ;;  %v11196_v60 = vld [vmem:[#allocation44_spill] sm:$0xff] }
 0x539   : > { %v3800_v22 = vadd.f32 %v3799_v0, %v3798_v29  ;;  %v11194_v0 = vld [vmem:[#allocation43_spill] sm:$0xff]  ;;  %v8999_v31 = vsub.f32 %v11196_v60, %v8628_v35 }
 0x53a   : > { %11193 = vst [vmem:[#allocation8_spill] sm:$0xff] %v8975_v13  ;;  %v8982_v36 = vsub.f32 %v11194_v0, %v8628_v35  ;;  %v3706_v43 = vmul.f32 %v8975_v13, %v8975_v13  ;;  %v3809_v0 = vsel %vm586_vm1, %v3705_v8, 0.0  ;;  %v11197_v13 = vld [vmem:[#allocation45_spill] sm:$0xff] }
 0x53b   : > { %v3802_v49 = vadd.f32 %v3801_v37, %v3800_v22  ;;  %v11195_v37 = vld [vmem:[#allocation5_spill] sm:$0xff]  ;;  %v9006_v45 = vsub.f32 %v11197_v13, %v8628_v35  ;;  %v3710_v60 = vmul.f32 %v8999_v31, %v8999_v31 }
 0x53c   : > { %v8989_v30 = vsub.f32 %v11195_v37, %v8628_v35  ;;  %v3712_v35 = vmul.f32 %v8636_v57, %v8636_v57 }
 0x53d   : > { %v3804_v29 = vadd.f32 %v3803_v16, %v3802_v49  ;;  %v3707_v16 = vmul.f32 %v8982_v36, %v8982_v36  ;;  %v3819_v13 = vsel %vm586_vm1, %v3710_v60, 0.0  ;;  %v3716_v60 = vmul.f32 %v8651_v58, %v8651_v58 }
 0x53f   : > { %v3806_v22 = vadd.f32 %v3805_v14, %v3804_v29  ;;  %v3708_v29 = vmul.f32 %v8989_v30, %v8989_v30  ;;  %v3811_v14 = vsel %vm586_vm1, %v3706_v43, 0.0  ;;  %v3813_v8 = vsel %vm586_vm1, %v3707_v16, 0.0 }
 0x540   : > { %v3711_v43 = vmul.f32 %v9006_v45, %v9006_v45  ;;  %v3713_v16 = vmul.f32 %v8640_v18, %v8640_v18 }
 0x541   : > { %v3808_v49 = vadd.f32 %v3807_v17, %v3806_v22  ;;  %v3709_v22 = vmul.f32 %v8632_v19, %v8632_v19 }
 0x543   : > { %v3810_v47 = vadd.f32 %v3809_v0, %v3808_v49  ;;  %v3815_v49 = vsel %vm586_vm1, %v3708_v29, 0.0  ;;  %v3714_v29 = vmul.f32 %v8644_v56, %v8644_v56 }
 0x545   : > { %v3812_v37 = vadd.f32 %v3811_v14, %v3810_v47  ;;  %v3817_v47 = vsel %vm586_vm1, %v3709_v22, 0.0  ;;  %v3715_v22 = vmul.f32 %v8648_v59, %v8648_v59 }
 0x547   : > { %v3814_v17 = vadd.f32 %v3813_v8, %v3812_v37  ;;  %v3821_v37 = vsel %vm586_vm1, %v3711_v43, 0.0  ;;  %v3829_v43 = vsel %vm586_vm1, %v3715_v22, 0.0  ;;  %v3721_v22 = vmul.f32 %v8667_v21, %v8667_v21 }
 0x549   : > { %v3816_v0 = vadd.f32 %v3815_v49, %v3814_v17  ;;  %v3823_v17 = vsel %vm586_vm1, %v3712_v35, 0.0  ;;  %v3718_v35 = vmul.f32 %v8658_v9, %v8658_v9 }
 0x54b   : > { %v3818_v14 = vadd.f32 %v3817_v47, %v3816_v0  ;;  %v3825_v0 = vsel %vm586_vm1, %v3713_v16, 0.0  ;;  %v3719_v16 = vmul.f32 %v8661_v40, %v8661_v40 }
 0x54d   : > { %v3820_v19 = vadd.f32 %v3819_v13, %v3818_v14  ;;  %v3827_v14 = vsel %vm586_vm1, %v3714_v29, 0.0  ;;  %v3720_v29 = vmul.f32 %v8664_v38, %v8664_v38 }
 0x54f   : > { %v3822_v8 = vadd.f32 %v3821_v37, %v3820_v19  ;;  %v3717_v19 = vmul.f32 %v8654_v3, %v8654_v3 }
 0x551   : > { %v3824_v49 = vadd.f32 %v3823_v17, %v3822_v8  ;;  %v3831_v8 = vsel %vm586_vm1, %v3716_v60, 0.0  ;;  %v3722_v60 = vmul.f32 %v8670_v23, %v8670_v23 }
 0x553   : > { %v3826_v47 = vadd.f32 %v3825_v0, %v3824_v49  ;;  %v3833_v49 = vsel %vm586_vm1, %v3717_v19, 0.0  ;;  %v3723_v19 = vmul.f32 %v8673_v11, %v8673_v11 }
 0x555   : > { %v3828_v13 = vadd.f32 %v3827_v14, %v3826_v47  ;;  %v3835_v47 = vsel %vm586_vm1, %v3718_v35, 0.0  ;;  %v3724_v35 = vmul.f32 %v8676_v41, %v8676_v41 }
 0x557   : > { %v3830_v37 = vadd.f32 %v3829_v43, %v3828_v13  ;;  %v3837_v13 = vsel %vm586_vm1, %v3719_v16, 0.0  ;;  %v3725_v16 = vmul.f32 %v8679_v39, %v8679_v39 }
 0x559   : > { %v3832_v17 = vadd.f32 %v3831_v8, %v3830_v37  ;;  %v3839_v37 = vsel %vm586_vm1, %v3720_v29, 0.0  ;;  %v3726_v29 = vmul.f32 %v8682_v34, %v8682_v34 }
 0x55b   : > { %v3834_v0 = vadd.f32 %v3833_v49, %v3832_v17  ;;  %v3841_v17 = vsel %vm586_vm1, %v3721_v22, 0.0  ;;  %v3727_v22 = vmul.f32 %v8685_v12, %v8685_v12 }
 0x55d   : > { %v3836_v14 = vadd.f32 %v3835_v47, %v3834_v0  ;;  %v3843_v0 = vsel %vm586_vm1, %v3722_v60, 0.0 }
 0x55f   : > { %v3838_v43 = vadd.f32 %v3837_v13, %v3836_v14  ;;  %v3845_v14 = vsel %vm586_vm1, %v3723_v19, 0.0 }
 0x561   : > { %v3840_v8 = vadd.f32 %v3839_v37, %v3838_v43  ;;  %v3847_v43 = vsel %vm586_vm1, %v3724_v35, 0.0 }
 0x563   : > { %v3842_v49 = vadd.f32 %v3841_v17, %v3840_v8  ;;  %v3849_v8 = vsel %vm586_vm1, %v3725_v16, 0.0  ;;  %v3851_v17 = vsel %vm586_vm1, %v3726_v29, 0.0  ;;  %v3464_v16 = vld [vmem:[%s307_s17] sm:$0x1] }
 0x565   : > { %v3844_v47 = vadd.f32 %v3843_v0, %v3842_v49  ;;  %v3853_v0 = vsel %vm586_vm1, %v3727_v22, 0.0 }
 0x567   : > { %v3846_v13 = vadd.f32 %v3845_v14, %v3844_v47 }
 0x569   : > { %v3848_v37 = vadd.f32 %v3847_v43, %v3846_v13 }
 0x56b   : > { %v3850_v60 = vadd.f32 %v3849_v8, %v3848_v37  ;;  %v11198_v8 = vld [vmem:[#allocation14_spill] sm:$0xff] }
 0x56d   : > { %v3852_v49 = vadd.f32 %v3851_v17, %v3850_v60  ;;  %v11199_v60 = vsub.s32 0, %v11198_v8 }
 0x56f   : > { %v3854_v19 = vadd.f32 %v3853_v0, %v3852_v49  ;;  %v11200_v0 = vld [vmem:[#allocation32_spill] sm:$0xff] }
 0x571   : > { %v3855_v47 = vrot.slane %v3854_v19, 4 }
 0x573   : > { %v3856_v14 = vadd.f32 %v3855_v47, %v3854_v19  ;;  %v11201_v19 = vld [vmem:[#allocation9_spill] sm:$0xff]  ;;  %v11202_v47 = vld [vmem:[#allocation31_spill] sm:$0xff] }
 0x575   : > { %v3857_v40 = vrot.slane %v3856_v14, 2 }
 0x577   : > { %v3858_v9 = vadd.f32 %v3857_v40, %v3856_v14  ;;  %v11203_v14 = vld [vmem:[#allocation37_spill] sm:$0xff] }
 0x579   : > { %v3859_v34 = vrot.slane %v3858_v9, 1 }
 0x57b   : > { %v3860_v35 = vadd.f32 %v3859_v34, %v3858_v9 }
 0x57d   : > { %v3861_v13 = vmul.f32 0.001953125, %v3860_v35  ;;  %v11204_v35 = vld [vmem:[#allocation29_spill] sm:$0xff] }
 0x57f   : > { %v3862_v43 = vadd.f32 1e-05, %v3861_v13  ;;  %v11205_v13 = vld [vmem:[#allocation6_spill] sm:$0xff] }
 0x581   : > { %5029 = vrsqrt.f32 %v3862_v43 }
 0x58b   : > { %v5030_v37 = vpop.eup %5029 }
 0x58c   : > { %v3864_v29 = vmul.f32 %v5030_v37, %v3464_v16  ;;  %v11206_v16 = vld [vmem:[#allocation20_spill] sm:$0xff] }
 0x58e   : > { %v9074_v22 = vrot.slane %v3864_v29, %v11199_v60  ;;  %v11208_v29 = vld [vmem:[#allocation21_spill] sm:$0xff]  ;;  %v11210_v60 = vld [vmem:[#allocation23_spill] sm:$0xff] }
 0x590   : > { %v9078_v17 = vmul.f32 %v9074_v22, %v8689_v50  ;;  %v9082_v9 = vmul.f32 %v9074_v22, %v8693_v51  ;;  %v9086_v40 = vmul.f32 %v9074_v22, %v8697_v26  ;;  %v9090_v34 = vmul.f32 %v9074_v22, %v8701_v5 }
 0x591   : > { %v9094_v49 = vmul.f32 %v9074_v22, %v8709_v48  ;;  %v9098_v50 = vmul.f32 %v9074_v22, %v8715_v53  ;;  %v9102_v51 = vmul.f32 %v9074_v22, %v8723_v63  ;;  %v9106_v26 = vmul.f32 %v9074_v22, %v8730_v27 }
 0x592   : > { %v9110_v5 = vmul.f32 %v9074_v22, %v8737_v62  ;;  %v9114_v48 = vmul.f32 %v9074_v22, %v8744_v32  ;;  %v9118_v53 = vmul.f32 %v9074_v22, %v8751_v2  ;;  %v9122_v63 = vmul.f32 %v9074_v22, %v8758_v6 }
 0x593   : > { %v9126_v27 = vmul.f32 %v9074_v22, %v8765_v61  ;;  %v9130_v62 = vmul.f32 %v9074_v22, %v8772_v24  ;;  %v9134_v32 = vmul.f32 %v9074_v22, %v8779_v25  ;;  %v9138_v2 = vmul.f32 %v9074_v22, %v8786_v55 }
 0x594   : > { %v9142_v6 = vmul.f32 %v9074_v22, %v8793_v42  ;;  %v9146_v61 = vmul.f32 %v9074_v22, %v8800_v4  ;;  %v9150_v24 = vmul.f32 %v9074_v22, %v8807_v44  ;;  %v9154_v25 = vmul.f32 %v9074_v22, %v8814_v28 }
 0x595   : > { %v9158_v55 = vmul.f32 %v9074_v22, %v8821_v10  ;;  %v9162_v42 = vmul.f32 %v9074_v22, %v8828_v7  ;;  %v9166_v4 = vmul.f32 %v9074_v22, %v8835_v20  ;;  %v9170_v44 = vmul.f32 %v9074_v22, %v8842_v33 }
 0x596   : > { %v9174_v28 = vmul.f32 %v9074_v22, %v8849_v1  ;;  %v9178_v10 = vmul.f32 %v9074_v22, %v8856_v52  ;;  %v9182_v7 = vmul.f32 %v9074_v22, %v8863_v15  ;;  %v9186_v20 = vmul.f32 %v9074_v22, %v8870_v54 }
 0x597   : > { %v9190_v33 = vmul.f32 %v9074_v22, %v8877_v46  ;;  %v9194_v1 = vmul.f32 %v9074_v22, %v11200_v0  ;;  %v9198_v52 = vmul.f32 %v9074_v22, %v11201_v19  ;;  %v9202_v15 = vmul.f32 %v9074_v22, %v11202_v47  ;;  %v11211_v19 = vld [vmem:[#allocation42_spill] sm:$0xff] }
 0x598   : > { %v9206_v54 = vmul.f32 %v9074_v22, %v11203_v14  ;;  %v9210_v46 = vmul.f32 %v9074_v22, %v11204_v35  ;;  %v9214_v43 = vmul.f32 %v9074_v22, %v11205_v13  ;;  %v9218_v37 = vmul.f32 %v9074_v22, %v11206_v16  ;;  %v11212_v14 = vld [vmem:[#allocation26_spill] sm:$0xff]  ;;  %v11214_v13 = vld [vmem:[#allocation16_spill] sm:$0xff] }
 0x599   : > { %v9222_v8 = vmul.f32 %v9074_v22, %v11208_v29  ;;  %v9226_v0 = vmul.f32 %v9074_v22, %v11210_v60  ;;  %v9230_v47 = vmul.f32 %v9074_v22, %v11211_v19  ;;  %v9234_v35 = vmul.f32 %v9074_v22, %v11212_v14 }
 0x59a   : > { %11207 = vst [vmem:[#allocation33_spill] sm:$0xff] %v9218_v37  ;;  %v9238_v16 = vmul.f32 %v9074_v22, %v11214_v13  ;;  %v11215_v37 = vld [vmem:[#allocation18_spill] sm:$0xff]  ;;  %v9250_v19 = vmul.f32 %v9074_v22, %v8982_v36  ;;  %v9254_v14 = vmul.f32 %v9074_v22, %v8989_v30  ;;  %v9270_v36 = vmul.f32 %v9074_v22, %v8636_v57 }
 0x59b   : > { %11209 = vst [vmem:[#allocation11_spill] sm:$0xff] %v9222_v8  ;;  %11213 = vst [vmem:[#allocation13_spill] sm:$0xff] %v9234_v35  ;;  %v9242_v29 = vmul.f32 %v9074_v22, %v11215_v37  ;;  %v11216_v8 = vld [vmem:[#allocation8_spill] sm:$0xff]  ;;  %v11217_v35 = vld [vmem:[#allocation30_spill] sm:$0xff]  ;;  %v9262_v37 = vmul.f32 %v9074_v22, %v8999_v31  ;;  %v9274_v30 = vmul.f32 %v9074_v22, %v8640_v18 }
 0x59c   : > { %v9246_v60 = vmul.f32 %v9074_v22, %v11216_v8  ;;  %v9258_v13 = vmul.f32 %v9074_v22, %v11217_v35  ;;  %v9266_v8 = vmul.f32 %v9074_v22, %v9006_v45  ;;  %v9281_v35 = vld [vmem:[%s310_s20] ss:$0 sm:$0xff]  ;;  %v9285_v31 = vmul.f32 %v9074_v22, %v8644_v56 }
 0x59d   : > { %11218 = vst [vmem:[#allocation35_spill] sm:$0xff] %v9274_v30  ;;  %v9289_v45 = vmul.f32 %v9074_v22, %v8648_v59  ;;  %v9293_v57 = vmul.f32 %v9074_v22, %v8651_v58  ;;  %v9297_v18 = vmul.f32 %v9074_v22, %v8654_v3  ;;  %v9301_v30 = vmul.f32 %v9074_v22, %v8664_v38 }
 0x59e   : > { %v9305_v56 = vmul.f32 %v9074_v22, %v8667_v21  ;;  %v9309_v59 = vmul.f32 %v9074_v22, %v8670_v23  ;;  %v9313_v58 = vmul.f32 %v9074_v22, %v8673_v11  ;;  %v9317_v3 = vmul.f32 %v9074_v22, %v8676_v41 }
 0x59f   : > { %11219 = vst [vmem:[#allocation10_spill] sm:$0xff] %v9301_v30  ;;  %v9321_v38 = vmul.f32 %v9074_v22, %v8679_v39  ;;  %v11223_v30 = vld [vmem:[#allocation15_spill] sm:$0xff]  ;;  %v9329_v23 = vmul.f32 %v9074_v22, %v8685_v12  ;;  %v9337_v41 = vadd.f32 %v9281_v35, %v9078_v17  ;;  %v9341_v39 = vadd.f32 %v9281_v35, %v9082_v9 }
 0x5a0   : > { %11220 = vst [vmem:[#allocation36_spill] sm:$0xff] %v9305_v56  ;;  %11221 = vst [vmem:[#allocation12_spill] sm:$0xff] %v9309_v59  ;;  %v9325_v21 = vmul.f32 %v9074_v22, %v11223_v30  ;;  %v11224_v59 = vld [vmem:[#allocation7_spill] sm:$0xff]  ;;  %v9345_v30 = vadd.f32 %v9281_v35, %v9086_v40  ;;  %v9349_v12 = vadd.f32 %v9281_v35, %v9090_v34 }
 0x5a1   : > { %11222 = vst [vmem:[#allocation27_spill] sm:$0xff] %v9313_v58  ;;  %v3925_v11 = vmul.f32 %v9074_v22, %v11224_v59  ;;  %v11225_v58 = vld [vmem:[#allocation34_spill] sm:$0xff]  ;;  %11226 = vst [vmem:[#allocation38_spill] sm:$0xff] %v9337_v41  ;;  %v9353_v59 = vadd.f32 %v9281_v35, %v9094_v49  ;;  %v9361_v17 = vadd.f32 %v9281_v35, %v9102_v51 }
 0x5a2   : > { %v3926_v56 = vmul.f32 %v9074_v22, %v11225_v58  ;;  %11227 = vst [vmem:[#allocation22_spill] sm:$0xff] %v9341_v39  ;;  %11228 = vst [vmem:[#allocation17_spill] sm:$0xff] %v9345_v30  ;;  %v9357_v22 = vadd.f32 %v9281_v35, %v9098_v50  ;;  %v9365_v9 = vadd.f32 %v9281_v35, %v9106_v26  ;;  %v11253_v58 = vld [vmem:[#allocation11_spill] sm:$0xff] }
 0x5a3   : > { %11229 = vst [vmem:[#allocation39_spill] sm:$0xff] %v9349_v12  ;;  %11230 = vst [vmem:[#allocation40_spill] sm:$0xff] %v9353_v59  ;;  %v9369_v40 = vadd.f32 %v9281_v35, %v9110_v5  ;;  %v9373_v34 = vadd.f32 %v9281_v35, %v9114_v48  ;;  %v9377_v49 = vadd.f32 %v9281_v35, %v9118_v53 }
 0x5a4   : > { %11231 = vst [vmem:[#allocation25_spill] sm:$0xff] %v9357_v22  ;;  %11232 = vst [vmem:[#allocation24_spill] sm:$0xff] %v9361_v17  ;;  %v9381_v50 = vadd.f32 %v9281_v35, %v9122_v63  ;;  %v9385_v51 = vadd.f32 %v9281_v35, %v9126_v27  ;;  %v9389_v26 = vadd.f32 %v9281_v35, %v9130_v62 }
 0x5a5   : > { %11233 = vst [vmem:[#allocation41_spill] sm:$0xff] %v9365_v9  ;;  %11234 = vst [vmem:[#allocation28_spill] sm:$0xff] %v9369_v40  ;;  %v9393_v5 = vadd.f32 %v9281_v35, %v9134_v32  ;;  %v9397_v48 = vadd.f32 %v9281_v35, %v9138_v2  ;;  %v9401_v53 = vadd.f32 %v9281_v35, %v9142_v6 }
 0x5a6   : > { %11235 = vst [vmem:[#allocation19_spill] sm:$0xff] %v9373_v34  ;;  %11236 = vst [vmem:[#allocation43_spill] sm:$0xff] %v9377_v49  ;;  %v9405_v63 = vadd.f32 %v9281_v35, %v9146_v61  ;;  %v9409_v27 = vadd.f32 %v9281_v35, %v9150_v24  ;;  %v9413_v62 = vadd.f32 %v9281_v35, %v9154_v25 }
 0x5a7   : > { %11237 = vst [vmem:[#allocation5_spill] sm:$0xff] %v9381_v50  ;;  %11238 = vst [vmem:[#allocation44_spill] sm:$0xff] %v9385_v51  ;;  %v9417_v32 = vadd.f32 %v9281_v35, %v9158_v55  ;;  %v9421_v2 = vadd.f32 %v9281_v35, %v9162_v42  ;;  %v9425_v6 = vadd.f32 %v9281_v35, %v9166_v4 }
 0x5a8   : > { %11239 = vst [vmem:[#allocation45_spill] sm:$0xff] %v9389_v26  ;;  %11240 = vst [vmem:[#allocation14_spill] sm:$0xff] %v9393_v5  ;;  %v9429_v61 = vadd.f32 %v9281_v35, %v9170_v44  ;;  %v9433_v24 = vadd.f32 %v9281_v35, %v9174_v28  ;;  %v9437_v25 = vadd.f32 %v9281_v35, %v9178_v10 }
 0x5a9   : > { %11241 = vst [vmem:[#allocation32_spill] sm:$0xff] %v9397_v48  ;;  %11242 = vst [vmem:[#allocation9_spill] sm:$0xff] %v9401_v53  ;;  %v9441_v55 = vadd.f32 %v9281_v35, %v9182_v7  ;;  %v9445_v42 = vadd.f32 %v9281_v35, %v9186_v20  ;;  %v9449_v4 = vadd.f32 %v9281_v35, %v9190_v33 }
 0x5aa   : > { %11243 = vst [vmem:[#allocation31_spill] sm:$0xff] %v9405_v63  ;;  %11244 = vst [vmem:[#allocation37_spill] sm:$0xff] %v9417_v32  ;;  %v9453_v44 = vadd.f32 %v9281_v35, %v9194_v1  ;;  %v9457_v28 = vadd.f32 %v9281_v35, %v9198_v52  ;;  %v9461_v10 = vadd.f32 %v9281_v35, %v9202_v15  ;;  %v11251_v1 = vld [vmem:[#allocation33_spill] sm:$0xff] }
 0x5ab   : > { %11245 = vst [vmem:[#allocation29_spill] sm:$0xff] %v9429_v61  ;;  %11246 = vst [vmem:[#allocation6_spill] sm:$0xff] %v9441_v55  ;;  %v9465_v7 = vadd.f32 %v9281_v35, %v9206_v54  ;;  %v9469_v20 = vadd.f32 %v9281_v35, %v9210_v46  ;;  %v9473_v33 = vadd.f32 %v9281_v35, %v9214_v43 }
 0x5ac   : > { %11247 = vst [vmem:[#allocation20_spill] sm:$0xff] %v9449_v4  ;;  %11248 = vst [vmem:[#allocation21_spill] sm:$0xff] %v9453_v44  ;;  %v9477_v52 = vadd.f32 %v9281_v35, %v11251_v1  ;;  %v9481_v15 = vadd.f32 %v9281_v35, %v11253_v58  ;;  %v9485_v54 = vadd.f32 %v9281_v35, %v9226_v0 }
 0x5ad   : > { %11249 = vst [vmem:[#allocation23_spill] sm:$0xff] %v9465_v7  ;;  %11250 = vst [vmem:[#allocation42_spill] sm:$0xff] %v9469_v20  ;;  %v9489_v46 = vadd.f32 %v9281_v35, %v9230_v47  ;;  %v11256_v20 = vld [vmem:[#allocation13_spill] sm:$0xff]  ;;  %v9497_v1 = vadd.f32 %v9281_v35, %v9238_v16  ;;  %v9501_v58 = vadd.f32 %v9281_v35, %v9242_v29 }
 0x5ae   : > { %11252 = vst [vmem:[#allocation26_spill] sm:$0xff] %v9477_v52  ;;  %11254 = vst [vmem:[#allocation16_spill] sm:$0xff] %v9481_v15  ;;  %v9493_v43 = vadd.f32 %v9281_v35, %v11256_v20  ;;  %v9505_v0 = vadd.f32 %v9281_v35, %v9246_v60  ;;  %v9509_v47 = vadd.f32 %v9281_v35, %v9250_v19 }
 0x5af   : > { %11255 = vst [vmem:[#allocation18_spill] sm:$0xff] %v9489_v46  ;;  %11258 = vst [vmem:[#allocation30_spill] sm:$0xff] %v9501_v58  ;;  %v9513_v20 = vadd.f32 %v9281_v35, %v9254_v14  ;;  %v9517_v16 = vadd.f32 %v9281_v35, %v9258_v13  ;;  %v9521_v29 = vadd.f32 %v9281_v35, %v9262_v37 }
 0x5b0   : > { %11257 = vst [vmem:[#allocation8_spill] sm:$0xff] %v9493_v43  ;;  %11259 = vst [vmem:[#allocation15_spill] sm:$0xff] %v9505_v0  ;;  %v9525_v60 = vadd.f32 %v9281_v35, %v9266_v8  ;;  %v9529_v19 = vadd.f32 %v9281_v35, %v9270_v36  ;;  %v9537_v13 = vadd.f32 %v9281_v35, %v9285_v31  ;;  %v11274_v31 = vld [vmem:[#allocation10_spill] sm:$0xff] }
 0x5b1   : > { %11260 = vst [vmem:[#allocation7_spill] sm:$0xff] %v9509_v47  ;;  %11261 = vst [vmem:[#allocation34_spill] sm:$0xff] %v9513_v20  ;;  %v11266_v47 = vld [vmem:[#allocation35_spill] sm:$0xff]  ;;  %v9541_v37 = vadd.f32 %v9281_v35, %v9289_v45  ;;  %v9545_v8 = vadd.f32 %v9281_v35, %v9293_v57  ;;  %v9549_v36 = vadd.f32 %v9281_v35, %v9297_v18  ;;  %v11276_v45 = vld [vmem:[#allocation36_spill] sm:$0xff] }
 0x5b2   : > { %11262 = vst [vmem:[#allocation33_spill] sm:$0xff] %v9517_v16  ;;  %11263 = vst [vmem:[#allocation11_spill] sm:$0xff] %v9521_v29  ;;  %v9533_v14 = vadd.f32 %v9281_v35, %v11266_v47  ;;  %v9555_v47 = vadd.f32 %v9281_v35, %v3926_v56  ;;  %v11278_v57 = vld [vmem:[#allocation12_spill] sm:$0xff]  ;;  %v11280_v18 = vld [vmem:[#allocation27_spill] sm:$0xff]  ;;  %v9575_v56 = vadd.f32 %v9281_v35, %v9317_v3 }
 0x5b3   : > { %11264 = vst [vmem:[#allocation13_spill] sm:$0xff] %v9525_v60  ;;  %11265 = vst [vmem:[#allocation46_spill] sm:$0xff] %v9529_v19  ;;  %v9552_v19 = vadd.f32 %v9281_v35, %v3925_v11  ;;  %v9579_v11 = vadd.f32 %v9281_v35, %v9321_v38  ;;  %v9596_v3 = vadd.f32 %v9281_v35, %v9329_v23  ;;  %v9599_v38 = vmul.f32 0.1, %v9349_v12 }
 0x5b4   : > { %11267 = vst [vmem:[#allocation35_spill] sm:$0xff] %v9533_v14  ;;  %11268 = vst [vmem:[#allocation47_spill] sm:$0xff] %v9537_v13  ;;  %v9559_v13 = vadd.f32 %v9281_v35, %v11274_v31  ;;  %v9583_v31 = vadd.f32 %v9281_v35, %v9325_v21  ;;  %v9605_v21 = vmul.f32 0.1, %v9357_v22  ;;  %v9619_v23 = vmul.f32 0.1, %v9373_v34 }
 0x5b5   : > { %11269 = vst [vmem:[#allocation48_spill] sm:$0xff] %v9541_v37  ;;  %11270 = vst [vmem:[#allocation49_spill] sm:$0xff] %v9545_v8  ;;  %v9563_v37 = vadd.f32 %v9281_v35, %v11276_v45  ;;  %v9567_v8 = vadd.f32 %v9281_v35, %v11278_v57  ;;  %v9586_v45 = vmul.f32 0.1, %v9337_v41  ;;  %v9589_v57 = vmul.f32 0.1, %v9341_v39 }
 0x5b6   : > { %11271 = vst [vmem:[#allocation50_spill] sm:$0xff] %v9549_v36  ;;  %11272 = vst [vmem:[#allocation51_spill] sm:$0xff] %v9552_v19  ;;  %v9571_v36 = vadd.f32 %v9281_v35, %v11280_v18  ;;  %v9592_v18 = vmul.f32 0.1, %v9345_v30  ;;  %v9636_v35 = vmul.f32 0.1, %v9393_v5 }
 0x5b7   : > { %11273 = vst [vmem:[#allocation52_spill] sm:$0xff] %v9555_v47  ;;  %11275 = vst [vmem:[#allocation10_spill] sm:$0xff] %v9559_v13  ;;  %v9630_v13 = vmul.f32 0.1, %v9385_v51  ;;  %v9633_v47 = vmul.f32 0.1, %v9389_v26 }
 0x5b8   : > { %11277 = vst [vmem:[#allocation36_spill] sm:$0xff] %v9563_v37  ;;  %11279 = vst [vmem:[#allocation12_spill] sm:$0xff] %v9567_v8  ;;  %v9625_v8 = vmul.f32 0.1, %v9381_v50  ;;  %v9641_v41 = vmul.f32 0.1, %v9397_v48 }
 0x5b9   : > { %11281 = vst [vmem:[#allocation27_spill] sm:$0xff] %v9571_v36  ;;  %11282 = vst [vmem:[#allocation53_spill] sm:$0xff] %v9575_v56  ;;  %v9611_v56 = vmul.f32 0.1, %v9365_v9  ;;  %v9614_v36 = vmul.f32 0.1, %v9369_v40 }
 0x5ba   : > { %11283 = vst [vmem:[#allocation54_spill] sm:$0xff] %v9579_v11  ;;  %11284 = vst [vmem:[#allocation55_spill] sm:$0xff] %v9583_v31  ;;  %v9602_v11 = vmul.f32 0.1, %v9353_v59  ;;  %v9608_v31 = vmul.f32 0.1, %v9361_v17 }
 0x5bb   : > { %11285 = vst [vmem:[#allocation56_spill] sm:$0xff] %v9586_v45  ;;  %11286 = vst [vmem:[#allocation57_spill] sm:$0xff] %v9589_v57  ;;  %v9644_v19 = vmul.f32 0.1, %v9401_v53  ;;  %v9647_v37 = vmul.f32 0.1, %v9405_v63 }
 0x5bc   : > { %11287 = vst [vmem:[#allocation58_spill] sm:$0xff] %v9592_v18  ;;  %11288 = vst [vmem:[#allocation59_spill] sm:$0xff] %v9596_v3  ;;  %v9622_v3 = vmul.f32 0.1, %v9377_v49  ;;  %v9652_v39 = vmul.f32 0.1, %v9409_v27 }
 0x5bd   : > { %11289 = vst [vmem:[#allocation60_spill] sm:$0xff] %v9599_v38  ;;  %11290 = vst [vmem:[#allocation61_spill] sm:$0xff] %v9602_v11  ;;  %v9655_v5 = vmul.f32 0.1, %v9413_v62  ;;  %v9658_v45 = vmul.f32 0.1, %v9417_v32 }
 0x5be   : > { %11291 = vst [vmem:[#allocation62_spill] sm:$0xff] %v9605_v21  ;;  %11292 = vst [vmem:[#allocation63_spill] sm:$0xff] %v9608_v31  ;;  %v9663_v30 = vmul.f32 0.1, %v9421_v2  ;;  %v9666_v63 = vmul.f32 0.1, %v9425_v6 }
 0x5bf   : > { %11293 = vst [vmem:[#allocation64_spill] sm:$0xff] %v9611_v56  ;;  %11294 = vst [vmem:[#allocation65_spill] sm:$0xff] %v9614_v36  ;;  %v9669_v57 = vmul.f32 0.1, %v9429_v61  ;;  %v9674_v12 = vmul.f32 0.1, %v9433_v24 }
 0x5c0   : > { %11295 = vst [vmem:[#allocation66_spill] sm:$0xff] %v9619_v23  ;;  %11296 = vst [vmem:[#allocation67_spill] sm:$0xff] %v9622_v3  ;;  %v9677_v32 = vmul.f32 0.1, %v9437_v25  ;;  %v9680_v18 = vmul.f32 0.1, %v9441_v55 }
 0x5c1   : > { %11297 = vst [vmem:[#allocation68_spill] sm:$0xff] %v9625_v8  ;;  %11298 = vst [vmem:[#allocation69_spill] sm:$0xff] %v9630_v13  ;;  %v9685_v59 = vmul.f32 0.1, %v9445_v42  ;;  %v9688_v61 = vmul.f32 0.1, %v9449_v4 }
 0x5c2   : > { %11299 = vst [vmem:[#allocation70_spill] sm:$0xff] %v9633_v47  ;;  %11300 = vst [vmem:[#allocation71_spill] sm:$0xff] %v9636_v35  ;;  %v9691_v38 = vmul.f32 0.1, %v9453_v44  ;;  %v9696_v22 = vmul.f32 0.1, %v9457_v28 }
 0x5c3   : > { %11301 = vst [vmem:[#allocation72_spill] sm:$0xff] %v9641_v41  ;;  %11302 = vst [vmem:[#allocation73_spill] sm:$0xff] %v9644_v19  ;;  %v9699_v55 = vmul.f32 0.1, %v9461_v10  ;;  %v9702_v11 = vmul.f32 0.1, %v9465_v7 }
 0x5c4   : > { %11303 = vst [vmem:[#allocation74_spill] sm:$0xff] %v9647_v37  ;;  %11304 = vst [vmem:[#allocation75_spill] sm:$0xff] %v9652_v39  ;;  %v11312_v17 = vld [vmem:[#allocation42_spill] sm:$0xff]  ;;  %v9710_v44 = vmul.f32 0.1, %v9473_v33  ;;  %v11339_v26 = vld [vmem:[#allocation51_spill] sm:$0xff] }
 0x5c5   : > { %11305 = vst [vmem:[#allocation76_spill] sm:$0xff] %v9655_v5  ;;  %11306 = vst [vmem:[#allocation77_spill] sm:$0xff] %v9663_v30  ;;  %v9707_v4 = vmul.f32 0.1, %v11312_v17  ;;  %v9713_v21 = vmul.f32 0.1, %v9477_v52 }
 0x5c6   : > { %11307 = vst [vmem:[#allocation78_spill] sm:$0xff] %v9666_v63  ;;  %11308 = vst [vmem:[#allocation79_spill] sm:$0xff] %v9677_v32  ;;  %v9718_v9 = vmul.f32 0.1, %v9481_v15  ;;  %v9721_v7 = vmul.f32 0.1, %v9485_v54 }
 0x5c7   : > { %11309 = vst [vmem:[#allocation80_spill] sm:$0xff] %v9688_v61  ;;  %11310 = vst [vmem:[#allocation81_spill] sm:$0xff] %v9696_v22  ;;  %v9724_v31 = vmul.f32 0.1, %v9489_v46  ;;  %v9729_v40 = vmul.f32 0.1, %v9493_v43 }
 0x5c8   : > { %11311 = vst [vmem:[#allocation82_spill] sm:$0xff] %v9699_v55  ;;  %11313 = vst [vmem:[#allocation42_spill] sm:$0xff] %v9710_v44  ;;  %v9732_v52 = vmul.f32 0.1, %v9497_v1  ;;  %v9735_v56 = vmul.f32 0.1, %v9501_v58 }
 0x5c9   : > { %11314 = vst [vmem:[#allocation83_spill] sm:$0xff] %v9718_v9  ;;  %11315 = vst [vmem:[#allocation84_spill] sm:$0xff] %v9721_v7  ;;  %v9740_v34 = vmul.f32 0.1, %v9505_v0  ;;  %v11321_v46 = vld [vmem:[#allocation7_spill] sm:$0xff]  ;;  %v11327_v50 = vld [vmem:[#allocation46_spill] sm:$0xff] }
 0x5ca   : > { %11316 = vst [vmem:[#allocation85_spill] sm:$0xff] %v9724_v31  ;;  %11317 = vst [vmem:[#allocation86_spill] sm:$0xff] %v9729_v40  ;;  %v9743_v31 = vmul.f32 0.1, %v11321_v46  ;;  %v9746_v36 = vmul.f32 0.1, %v9513_v20 }
 0x5cb   : > { %11318 = vst [vmem:[#allocation87_spill] sm:$0xff] %v9732_v52  ;;  %11319 = vst [vmem:[#allocation88_spill] sm:$0xff] %v9735_v56  ;;  %v9751_v49 = vmul.f32 0.1, %v9517_v16  ;;  %v9754_v58 = vmul.f32 0.1, %v9521_v29 }
 0x5cc   : > { %11320 = vst [vmem:[#allocation89_spill] sm:$0xff] %v9740_v34  ;;  %11322 = vst [vmem:[#allocation90_spill] sm:$0xff] %v9743_v31  ;;  %v9757_v23 = vmul.f32 0.1, %v9525_v60  ;;  %v9762_v46 = vmul.f32 0.1, %v11327_v50 }
 0x5cd   : > { %11323 = vst [vmem:[#allocation91_spill] sm:$0xff] %v9746_v36  ;;  %11324 = vst [vmem:[#allocation92_spill] sm:$0xff] %v9751_v49  ;;  %v9765_v20 = vmul.f32 0.1, %v9533_v14  ;;  %v11330_v36 = vld [vmem:[#allocation47_spill] sm:$0xff]  ;;  %v11333_v29 = vld [vmem:[#allocation48_spill] sm:$0xff] }
 0x5ce   : > { %11325 = vst [vmem:[#allocation93_spill] sm:$0xff] %v9754_v58  ;;  %11326 = vst [vmem:[#allocation94_spill] sm:$0xff] %v9757_v23  ;;  %v9768_v3 = vmul.f32 0.1, %v11330_v36  ;;  %v9773_v58 = vmul.f32 0.1, %v11333_v29 }
 0x5cf   : > { %11328 = vst [vmem:[#allocation95_spill] sm:$0xff] %v9762_v46  ;;  %11329 = vst [vmem:[#allocation96_spill] sm:$0xff] %v9765_v20  ;;  %v11335_v60 = vld [vmem:[#allocation49_spill] sm:$0xff]  ;;  %v11337_v16 = vld [vmem:[#allocation50_spill] sm:$0xff]  ;;  %v9784_v14 = vmul.f32 0.1, %v11339_v26 }
 0x5d0   : > { %11331 = vst [vmem:[#allocation97_spill] sm:$0xff] %v9768_v3  ;;  %11334 = vst [vmem:[#allocation48_spill] sm:$0xff] %v9773_v58  ;;  %v9776_v23 = vmul.f32 0.1, %v11335_v60  ;;  %v9779_v8 = vmul.f32 0.1, %v11337_v16 }
 0x5d1   : > { %11340 = vst [vmem:[#allocation100_spill] sm:$0xff] %v9784_v14  ;;  %v11341_v36 = vld [vmem:[#allocation52_spill] sm:$0xff]  ;;  %v11343_v20 = vld [vmem:[#allocation10_spill] sm:$0xff]  ;;  %v11356_v26 = vld [vmem:[#allocation55_spill] sm:$0xff] }
 0x5d2   : > { %11336 = vst [vmem:[#allocation98_spill] sm:$0xff] %v9776_v23  ;;  %11338 = vst [vmem:[#allocation99_spill] sm:$0xff] %v9779_v8  ;;  %v9787_v3 = vmul.f32 0.1, %v11341_v36  ;;  %v9790_v51 = vmul.f32 0.1, %v11343_v20 }
 0x5d3   : > { %v11345_v13 = vld [vmem:[#allocation36_spill] sm:$0xff]  ;;  %v11349_v23 = vld [vmem:[#allocation27_spill] sm:$0xff]  ;;  %v11352_v36 = vld [vmem:[#allocation53_spill] sm:$0xff]  ;;  %v9812_v35 = vmul.f32 0.1, %v11356_v26 }
 0x5d4   : > { %11342 = vst [vmem:[#allocation101_spill] sm:$0xff] %v9787_v3  ;;  %11344 = vst [vmem:[#allocation102_spill] sm:$0xff] %v9790_v51  ;;  %v9795_v60 = vmul.f32 0.1, %v11345_v13  ;;  %v11347_v16 = vld [vmem:[#allocation12_spill] sm:$0xff]  ;;  %v11354_v20 = vld [vmem:[#allocation54_spill] sm:$0xff] }
 0x5d5   : > { %v9798_v8 = vmul.f32 0.1, %v11347_v16  ;;  %v9801_v47 = vmul.f32 0.1, %v11349_v23  ;;  %v9806_v3 = vmul.f32 0.1, %v11352_v36 }
 0x5d6   : > { %11346 = vst [vmem:[#allocation103_spill] sm:$0xff] %v9795_v60  ;;  %v9809_v51 = vmul.f32 0.1, %v11354_v20  ;;  %11357 = vst [vmem:[#allocation108_spill] sm:$0xff] %v9812_v35  ;;  %v11358_v53 = vld [vmem:[#allocation59_spill] sm:$0xff]  ;;  %v11360_v48 = vld [vmem:[#allocation37_spill] sm:$0xff] }
 0x5d7   : > { %11348 = vst [vmem:[#allocation104_spill] sm:$0xff] %v9798_v8  ;;  %11350 = vst [vmem:[#allocation105_spill] sm:$0xff] %v9801_v47  ;;  %v9817_v16 = vmul.f32 0.1, %v11358_v53  ;;  %v11361_v26 = vld [vmem:[#allocation29_spill] sm:$0xff]  ;;  %v11362_v23 = vld [vmem:[#allocation6_spill] sm:$0xff] }
 0x5d8   : > { %11353 = vst [vmem:[#allocation106_spill] sm:$0xff] %v9806_v3  ;;  %11355 = vst [vmem:[#allocation107_spill] sm:$0xff] %v9809_v51  ;;  %v11363_v41 = vld [vmem:[#allocation20_spill] sm:$0xff]  ;;  %v11364_v20 = vld [vmem:[#allocation21_spill] sm:$0xff] }
 0x5d9   : > { %11359 = vst [vmem:[#allocation109_spill] sm:$0xff] %v9817_v16  ;;  %v11365_v39 = vld [vmem:[#allocation23_spill] sm:$0xff]  ;;  %v11366_v30 = vld [vmem:[#allocation26_spill] sm:$0xff]  ;;  %v11380_v0 = vld [vmem:[#allocation97_spill] sm:$0xff] }
 0x5da   : > { %v11369_v37 = vld [vmem:[#allocation30_spill] sm:$0xff]  ;;  %v11370_v63 = vld [vmem:[#allocation7_spill] sm:$0xff]  ;;  %v11383_v22 = vld [vmem:[#allocation49_spill] sm:$0xff] }
 0x5db   : > { %v11372_v35 = vld [vmem:[#allocation34_spill] sm:$0xff]  ;;  %v11375_v32 = vld [vmem:[#allocation11_spill] sm:$0xff]  ;;  %v5031_v31 = vld [vmem:[%s10559_s7] sm:$0xff] }
 0x5dc   : > { %v11379_v61 = vld [vmem:[#allocation35_spill] sm:$0xff]  ;;  %v11385_v40 = vld [vmem:[#allocation50_spill] sm:$0xff]  ;;  %v11397_v8 = vld [vmem:[#allocation56_spill] sm:$0xff] }
 0x5dd   : > { %v11381_v9 = vld [vmem:[#allocation47_spill] sm:$0xff]  ;;  %v11396_v58 = vld [vmem:[#allocation38_spill] sm:$0xff]  ;;  %v11400_v14 = vld [vmem:[#allocation57_spill] sm:$0xff] }
 0x5de   : > { %v11384_v55 = vld [vmem:[#allocation99_spill] sm:$0xff]  ;;  %v11398_v7 = vmax.f32 %v11396_v58, %v11397_v8  ;;  %v5032_v19 = vld [vmem:[%s10559_s7 + $0x8] sm:$0xff]  ;;  %v11402_v5 = vld [vmem:[#allocation17_spill] sm:$0xff] }
 0x5df   : > { %v11399_v3 = vld [vmem:[#allocation22_spill] sm:$0xff]  ;;  %v5033_v56 = vld [vmem:[%s10559_s7 + $0x10] sm:$0xff]  ;;  %v11406_v8 = vld [vmem:[#allocation60_spill] sm:$0xff] }
 0x5e0   : > { %v4133_v15 = vadd.f32 %v5031_v31, %v11398_v7  ;;  %v11401_v51 = vmax.f32 %v11399_v3, %v11400_v14  ;;  %v11403_v16 = vld [vmem:[#allocation58_spill] sm:$0xff]  ;;  %v5034_v7 = vld [vmem:[%s10559_s7 + $0x18] sm:$0xff]  ;;  %v11405_v58 = vld [vmem:[#allocation39_spill] sm:$0xff] }
 0x5e1   : > { %v11404_v53 = vmax.f32 %v11402_v5, %v11403_v16  ;;  %v11407_v31 = vmax.f32 %v11405_v58, %v11406_v8  ;;  %v11409_v14 = vld [vmem:[#allocation61_spill] sm:$0xff]  ;;  %v5036_v5 = vld [vmem:[%s10559_s7 + $0x28] sm:$0xff]  ;;  %v11414_v58 = vld [vmem:[#allocation24_spill] sm:$0xff] }
 0x5e2   : > { %v4134_v43 = vadd.f32 %v5032_v19, %v11401_v51  ;;  %v5035_v51 = vld [vmem:[%s10559_s7 + $0x20] sm:$0xff]  ;;  %v11408_v19 = vld [vmem:[#allocation40_spill] sm:$0xff]  ;;  %v11412_v16 = vld [vmem:[#allocation62_spill] sm:$0xff]  ;;  %4197 = vst.msk [vmem:[%s10559_s7] sm:$0xff] %vm586_vm1, %v4133_v15 }
 0x5e3   : > { %v4135_v52 = vadd.f32 %v5033_v56, %v11404_v53  ;;  %v4136_v46 = vadd.f32 %v5034_v7, %v11407_v31  ;;  %v11410_v3 = vmax.f32 %v11408_v19, %v11409_v14  ;;  %v11411_v53 = vld [vmem:[#allocation25_spill] sm:$0xff]  ;;  %v5037_v7 = vld [vmem:[%s10559_s7 + $0x30] sm:$0xff]  ;;  %v11418_v14 = vld [vmem:[#allocation64_spill] sm:$0xff] }
 0x5e4   : > { %v11413_v56 = vmax.f32 %v11411_v53, %v11412_v16  ;;  %v11415_v8 = vld [vmem:[#allocation63_spill] sm:$0xff]  ;;  %v11417_v19 = vld [vmem:[#allocation41_spill] sm:$0xff]  ;;  %v11420_v53 = vld [vmem:[#allocation28_spill] sm:$0xff]  ;;  %4198 = vst.msk [vmem:[%s10559_s7 + $0x8] sm:$0xff] %vm586_vm1, %v4134_v43 }
 0x5e5   : > { %v4137_v36 = vadd.f32 %v5035_v51, %v11410_v3  ;;  %v11416_v31 = vmax.f32 %v11414_v58, %v11415_v8  ;;  %v5038_v51 = vld [vmem:[%s10559_s7 + $0x38] sm:$0xff]  ;;  %v11419_v3 = vmax.f32 %v11417_v19, %v11418_v14  ;;  %v11421_v16 = vld [vmem:[#allocation65_spill] sm:$0xff]  ;;  %v11423_v58 = vld [vmem:[#allocation19_spill] sm:$0xff]  ;;  %4199 = vst.msk [vmem:[%s10559_s7 + $0x10] sm:$0xff] %vm586_vm1, %v4135_v52 }
 0x5e6   : > { %v4138_v47 = vadd.f32 %v5036_v5, %v11413_v56  ;;  %v5039_v5 = vld [vmem:[%s10559_s7 + $0x40] sm:$0xff]  ;;  %v11422_v56 = vmax.f32 %v11420_v53, %v11421_v16  ;;  %v11424_v8 = vld [vmem:[#allocation66_spill] sm:$0xff]  ;;  %v11426_v19 = vld [vmem:[#allocation43_spill] sm:$0xff]  ;;  %4200 = vst.msk [vmem:[%s10559_s7 + $0x18] sm:$0xff] %vm586_vm1, %v4136_v46 }
 0x5e7   : > { %v4139_v49 = vadd.f32 %v5037_v7, %v11416_v31  ;;  %v4140_v60 = vadd.f32 %v5038_v51, %v11419_v3  ;;  %v5040_v7 = vld [vmem:[%s10559_s7 + $0x48] sm:$0xff]  ;;  %v11425_v31 = vmax.f32 %v11423_v58, %v11424_v8  ;;  %v5041_v51 = vld [vmem:[%s10559_s7 + $0x50] sm:$0xff]  ;;  %v5042_v53 = vld [vmem:[%s10559_s7 + $0x58] sm:$0xff]  ;;  %4201 = vst.msk [vmem:[%s10559_s7 + $0x20] sm:$0xff] %vm586_vm1, %v4137_v36 }
 0x5e8   : > { %v4141_v13 = vadd.f32 %v5039_v5, %v11422_v56  ;;  %v11427_v14 = vld [vmem:[#allocation67_spill] sm:$0xff]  ;;  %v11429_v16 = vld [vmem:[#allocation5_spill] sm:$0xff]  ;;  %v11430_v56 = vld [vmem:[#allocation68_spill] sm:$0xff]  ;;  %4202 = vst.msk [vmem:[%s10559_s7 + $0x28] sm:$0xff] %vm586_vm1, %v4138_v47 }
 0x5e9   : > { %v4142_v50 = vadd.f32 %v5040_v7, %v11425_v31  ;;  %v11428_v3 = vmax.f32 %v11426_v19, %v11427_v14  ;;  %v11431_v15 = vmax.f32 %v11429_v16, %v11430_v56  ;;  %v5043_v43 = vld [vmem:[%s10559_s7 + $0x60] sm:$0xff]  ;;  %v11432_v58 = vld [vmem:[#allocation44_spill] sm:$0xff]  ;;  %v11436_v14 = vld [vmem:[#allocation70_spill] sm:$0xff]  ;;  %4203 = vst.msk [vmem:[%s10559_s7 + $0x30] sm:$0xff] %vm586_vm1, %v4139_v49 }
 0x5ea   : > { %v11433_v8 = vld [vmem:[#allocation69_spill] sm:$0xff]  ;;  %v11438_v52 = vld [vmem:[#allocation14_spill] sm:$0xff]  ;;  %v11439_v16 = vld [vmem:[#allocation71_spill] sm:$0xff]  ;;  %4204 = vst.msk [vmem:[%s10559_s7 + $0x38] sm:$0xff] %vm586_vm1, %v4140_v60 }
 0x5eb   : > { %v4143_v5 = vadd.f32 %v5041_v51, %v11428_v3  ;;  %v4144_v7 = vadd.f32 %v5042_v53, %v11431_v15  ;;  %v11434_v31 = vmax.f32 %v11432_v58, %v11433_v8  ;;  %v5044_v51 = vld [vmem:[%s10559_s7 + $0x68] sm:$0xff]  ;;  %v11435_v19 = vld [vmem:[#allocation45_spill] sm:$0xff]  ;;  %v5045_v53 = vld [vmem:[%s10559_s7 + $0x70] sm:$0xff]  ;;  %v11440_v56 = vmax.f32 %v11438_v52, %v11439_v16  ;;  %4205 = vst.msk [vmem:[%s10559_s7 + $0x40] sm:$0xff] %vm586_vm1, %v4141_v13 }
 0x5ec   : > { %v11437_v3 = vmax.f32 %v11435_v19, %v11436_v14  ;;  %v5046_v46 = vld [vmem:[%s10559_s7 + $0x78] sm:$0xff]  ;;  %v5047_v47 = vld [vmem:[%s10559_s7 + $0x80] sm:$0xff]  ;;  %v11448_v52 = vld [vmem:[#allocation74_spill] sm:$0xff]  ;;  %4206 = vst.msk [vmem:[%s10559_s7 + $0x48] sm:$0xff] %vm586_vm1, %v4142_v50 }
 0x5ed   : > { %v4145_v34 = vadd.f32 %v5043_v43, %v11434_v31  ;;  %v4147_v15 = vadd.f32 %v5045_v53, %v11440_v56  ;;  %v11441_v43 = vld [vmem:[#allocation32_spill] sm:$0xff]  ;;  %v11444_v31 = vld [vmem:[#allocation9_spill] sm:$0xff]  ;;  %v11447_v53 = vld [vmem:[#allocation31_spill] sm:$0xff]  ;;  %4207 = vst.msk [vmem:[%s10559_s7 + $0x50] sm:$0xff] %vm586_vm1, %v4143_v5 }
 0x5ee   : > { %v4146_v44 = vadd.f32 %v5044_v51, %v11437_v3  ;;  %v11442_v58 = vld [vmem:[#allocation72_spill] sm:$0xff]  ;;  %v11445_v51 = vld [vmem:[#allocation73_spill] sm:$0xff]  ;;  %v5048_v3 = vld [vmem:[%s10559_s7 + $0x88] sm:$0xff]  ;;  %v11449_v16 = vmax.f32 %v11447_v53, %v11448_v52  ;;  %4208 = vst.msk [vmem:[%s10559_s7 + $0x58] sm:$0xff] %vm586_vm1, %v4144_v7  ;;  %v11460_v52 = vmax.f32 %v9433_v24, %v9674_v12 }
 0x5ef   : > { %v11443_v36 = vmax.f32 %v11441_v43, %v11442_v58  ;;  %v11446_v19 = vmax.f32 %v11444_v31, %v11445_v51  ;;  %v11450_v49 = vld [vmem:[#allocation75_spill] sm:$0xff]  ;;  %v5050_v60 = vld [vmem:[%s10559_s7 + $0x98] sm:$0xff]  ;;  %v5051_v50 = vld [vmem:[%s10559_s7 + $0xa0] sm:$0xff]  ;;  %v11454_v31 = vmax.f32 %v11360_v48, %v9658_v45  ;;  %4209 = vst.msk [vmem:[%s10559_s7 + $0x60] sm:$0xff] %vm586_vm1, %v4145_v34  ;;  %v11459_v34 = vmax.f32 %v11361_v26, %v9669_v57 }
 0x5f0   : > { %v4150_v56 = vadd.f32 %v5048_v3, %v11449_v16  ;;  %v11451_v43 = vmax.f32 %v9409_v27, %v11450_v49  ;;  %v5052_v27 = vld [vmem:[%s10559_s7 + $0xa8] sm:$0xff]  ;;  %4210 = vst.msk [vmem:[%s10559_s7 + $0x68] sm:$0xff] %vm586_vm1, %v4146_v44  ;;  %v5053_v48 = vld [vmem:[%s10559_s7 + $0xb0] sm:$0xff]  ;;  %v5054_v5 = vld [vmem:[%s10559_s7 + $0xb8] sm:$0xff]  ;;  %v11463_v26 = vmax.f32 %v11362_v23, %v9680_v18  ;;  %v11464_v57 = vmax.f32 %v9445_v42, %v9685_v59 }
 0x5f1   : > { %v4148_v8 = vadd.f32 %v5046_v46, %v11443_v36  ;;  %v4149_v14 = vadd.f32 %v5047_v47, %v11446_v19  ;;  %v5049_v46 = vld [vmem:[%s10559_s7 + $0x90] sm:$0xff]  ;;  %v11452_v36 = vld [vmem:[#allocation76_spill] sm:$0xff]  ;;  %v4153_v51 = vadd.f32 %v5051_v50, %v11454_v31  ;;  %v11455_v19 = vld [vmem:[#allocation77_spill] sm:$0xff]  ;;  %v4156_v7 = vadd.f32 %v5054_v5, %v11459_v34  ;;  %4211 = vst.msk [vmem:[%s10559_s7 + $0x70] sm:$0xff] %vm586_vm1, %v4147_v15 }
 0x5f2   : > { %v4151_v58 = vadd.f32 %v5049_v46, %v11451_v43  ;;  %v11453_v13 = vmax.f32 %v9413_v62, %v11452_v36  ;;  %v11456_v3 = vmax.f32 %v9421_v2, %v11455_v19  ;;  %v11457_v62 = vld [vmem:[#allocation78_spill] sm:$0xff]  ;;  %v5055_v44 = vld [vmem:[%s10559_s7 + $0xc0] sm:$0xff]  ;;  %v11461_v46 = vld [vmem:[#allocation79_spill] sm:$0xff]  ;;  %4214 = vst.msk [vmem:[%s10559_s7 + $0x88] sm:$0xff] %vm586_vm1, %v4150_v56  ;;  %v11467_v23 = vmax.f32 %v11364_v20, %v9691_v38 }
 0x5f3   : > { %v11458_v2 = vmax.f32 %v9425_v6, %v11457_v62  ;;  %v4157_v16 = vadd.f32 %v5055_v44, %v11460_v52  ;;  %v5056_v6 = vld [vmem:[%s10559_s7 + $0xc8] sm:$0xff]  ;;  %v11462_v49 = vmax.f32 %v9437_v25, %v11461_v46  ;;  %4212 = vst.msk [vmem:[%s10559_s7 + $0x78] sm:$0xff] %vm586_vm1, %v4148_v8  ;;  %4213 = vst.msk [vmem:[%s10559_s7 + $0x80] sm:$0xff] %vm586_vm1, %v4149_v14  ;;  %v5057_v12 = vld [vmem:[%s10559_s7 + $0xd0] sm:$0xff] }
 0x5f4   : > { %v4152_v47 = vadd.f32 %v5050_v60, %v11453_v13  ;;  %v4154_v53 = vadd.f32 %v5052_v27, %v11456_v3  ;;  %v4159_v24 = vadd.f32 %v5057_v12, %v11463_v26  ;;  %v5058_v25 = vld [vmem:[%s10559_s7 + $0xd8] sm:$0xff]  ;;  %v5059_v8 = vld [vmem:[%s10559_s7 + $0xe0] sm:$0xff]  ;;  %v5060_v18 = vld [vmem:[%s10559_s7 + $0xe8] sm:$0xff]  ;;  %4215 = vst.msk [vmem:[%s10559_s7 + $0x90] sm:$0xff] %vm586_vm1, %v4151_v58  ;;  %v11472_v31 = vmax.f32 %v11365_v39, %v9702_v11 }
 0x5f5   : > { %v4155_v45 = vadd.f32 %v5053_v48, %v11458_v2  ;;  %v4158_v43 = vadd.f32 %v5056_v6, %v11462_v49  ;;  %v4160_v15 = vadd.f32 %v5058_v25, %v11464_v57  ;;  %v11465_v14 = vld [vmem:[#allocation80_spill] sm:$0xff]  ;;  %v4162_v36 = vadd.f32 %v5060_v18, %v11467_v23  ;;  %4217 = vst.msk [vmem:[%s10559_s7 + $0xa0] sm:$0xff] %vm586_vm1, %v4153_v51  ;;  %v11468_v59 = vld [vmem:[#allocation81_spill] sm:$0xff]  ;;  %v11470_v58 = vld [vmem:[#allocation82_spill] sm:$0xff] }
 0x5f6   : > { %v11466_v56 = vmax.f32 %v11363_v41, %v11465_v14  ;;  %4216 = vst.msk [vmem:[%s10559_s7 + $0x98] sm:$0xff] %vm586_vm1, %v4152_v47  ;;  %4218 = vst.msk [vmem:[%s10559_s7 + $0xa8] sm:$0xff] %vm586_vm1, %v4154_v53  ;;  %v5061_v41 = vld [vmem:[%s10559_s7 + $0xf0] sm:$0xff]  ;;  %v11469_v42 = vmax.f32 %v9457_v28, %v11468_v59  ;;  %v5062_v38 = vld [vmem:[%s10559_s7 + $0xf8] sm:$0xff]  ;;  %v11471_v13 = vmax.f32 %v9461_v10, %v11470_v58 }
 0x5f7   : > { %v5063_v50 = vld [vmem:[%s10559_s7 + $0x100] sm:$0xff]  ;;  %v5064_v28 = vld [vmem:[%s10559_s7 + $0x108] sm:$0xff]  ;;  %v11473_v27 = vmax.f32 %v11312_v17, %v9707_v4  ;;  %4219 = vst.msk [vmem:[%s10559_s7 + $0xb0] sm:$0xff] %vm586_vm1, %v4155_v45  ;;  %4220 = vst.msk [vmem:[%s10559_s7 + $0xb8] sm:$0xff] %vm586_vm1, %v4156_v7  ;;  %v11476_v3 = vmax.f32 %v11366_v30, %v9713_v21 }
 0x5f8   : > { %v4161_v60 = vadd.f32 %v5059_v8, %v11466_v56  ;;  %v4163_v20 = vadd.f32 %v5061_v41, %v11469_v42  ;;  %v4164_v47 = vadd.f32 %v5062_v38, %v11471_v13  ;;  %v4165_v51 = vadd.f32 %v5063_v50, %v11472_v31  ;;  %4221 = vst.msk [vmem:[%s10559_s7 + $0xc0] sm:$0xff] %vm586_vm1, %v4157_v16  ;;  %v5065_v39 = vld [vmem:[%s10559_s7 + $0x110] sm:$0xff]  ;;  %v11474_v17 = vld [vmem:[#allocation42_spill] sm:$0xff]  ;;  %v5066_v11 = vld [vmem:[%s10559_s7 + $0x118] sm:$0xff] }
 0x5f9   : > { %v4166_v19 = vadd.f32 %v5064_v28, %v11473_v27  ;;  %4222 = vst.msk [vmem:[%s10559_s7 + $0xc8] sm:$0xff] %vm586_vm1, %v4158_v43  ;;  %v11475_v4 = vmax.f32 %v9473_v33, %v11474_v17  ;;  %v4168_v53 = vadd.f32 %v5066_v11, %v11476_v3  ;;  %v5067_v48 = vld [vmem:[%s10559_s7 + $0x120] sm:$0xff]  ;;  %v11477_v62 = vld [vmem:[#allocation16_spill] sm:$0xff]  ;;  %v11478_v2 = vld [vmem:[#allocation83_spill] sm:$0xff] }
 0x5fa   : > { %v11479_v45 = vmax.f32 %v11477_v62, %v11478_v2  ;;  %v5068_v33 = vld [vmem:[%s10559_s7 + $0x128] sm:$0xff]  ;;  %v11480_v34 = vld [vmem:[#allocation84_spill] sm:$0xff]  ;;  %4223 = vst.msk [vmem:[%s10559_s7 + $0xd0] sm:$0xff] %vm586_vm1, %v4159_v24  ;;  %4224 = vst.msk [vmem:[%s10559_s7 + $0xd8] sm:$0xff] %vm586_vm1, %v4160_v15 }
 0x5fb   : > { %v4167_v10 = vadd.f32 %v5065_v39, %v11475_v4  ;;  %v11481_v7 = vmax.f32 %v9485_v54, %v11480_v34  ;;  %4225 = vst.msk [vmem:[%s10559_s7 + $0xe0] sm:$0xff] %vm586_vm1, %v4161_v60  ;;  %4226 = vst.msk [vmem:[%s10559_s7 + $0xe8] sm:$0xff] %vm586_vm1, %v4162_v36  ;;  %v5069_v30 = vld [vmem:[%s10559_s7 + $0x130] sm:$0xff]  ;;  %v11482_v54 = vld [vmem:[#allocation18_spill] sm:$0xff]  ;;  %v11512_v34 = vmax.f32 %v11381_v9, %v11380_v0 }
 0x5fc   : > { %v4169_v5 = vadd.f32 %v5067_v48, %v11479_v45  ;;  %v11483_v21 = vld [vmem:[#allocation85_spill] sm:$0xff]  ;;  %v5070_v6 = vld [vmem:[%s10559_s7 + $0x138] sm:$0xff]  ;;  %v11486_v49 = vld [vmem:[#allocation86_spill] sm:$0xff]  ;;  %4227 = vst.msk [vmem:[%s10559_s7 + $0xf0] sm:$0xff] %vm586_vm1, %v4163_v20  ;;  %v11517_v0 = vmax.f32 %v11385_v40, %v11384_v55 }
 0x5fd   : > { %v4170_v44 = vadd.f32 %v5068_v33, %v11481_v7  ;;  %v11484_v52 = vmax.f32 %v11482_v54, %v11483_v21  ;;  %v11485_v46 = vld [vmem:[#allocation8_spill] sm:$0xff]  ;;  %v5071_v26 = vld [vmem:[%s10559_s7 + $0x140] sm:$0xff]  ;;  %v11488_v24 = vld [vmem:[#allocation87_spill] sm:$0xff]  ;;  %4228 = vst.msk [vmem:[%s10559_s7 + $0xf8] sm:$0xff] %vm586_vm1, %v4164_v47 }
 0x5fe   : > { %v11487_v43 = vmax.f32 %v11485_v46, %v11486_v49  ;;  %v11489_v25 = vmax.f32 %v9497_v1, %v11488_v24  ;;  %v5072_v15 = vld [vmem:[%s10559_s7 + $0x148] sm:$0xff]  ;;  %v11490_v8 = vld [vmem:[#allocation88_spill] sm:$0xff]  ;;  %4229 = vst.msk [vmem:[%s10559_s7 + $0x100] sm:$0xff] %vm586_vm1, %v4165_v51  ;;  %4230 = vst.msk [vmem:[%s10559_s7 + $0x108] sm:$0xff] %vm586_vm1, %v4166_v19 }
 0x5ff   : > { %v4171_v16 = vadd.f32 %v5069_v30, %v11484_v52  ;;  %v11491_v14 = vmax.f32 %v11369_v37, %v11490_v8  ;;  %v5073_v1 = vld [vmem:[%s10559_s7 + $0x150] sm:$0xff]  ;;  %v11493_v60 = vld [vmem:[#allocation89_spill] sm:$0xff]  ;;  %v5074_v36 = vld [vmem:[%s10559_s7 + $0x158] sm:$0xff]  ;;  %4231 = vst.msk [vmem:[%s10559_s7 + $0x110] sm:$0xff] %vm586_vm1, %v4167_v10 }
 0x600   : > { %v4172_v12 = vadd.f32 %v5070_v6, %v11487_v43  ;;  %v4173_v57 = vadd.f32 %v5071_v26, %v11489_v25  ;;  %v11492_v37 = vld [vmem:[#allocation15_spill] sm:$0xff]  ;;  %v11495_v41 = vld [vmem:[#allocation90_spill] sm:$0xff]  ;;  %v5075_v20 = vld [vmem:[%s10559_s7 + $0x160] sm:$0xff]  ;;  %4232 = vst.msk [vmem:[%s10559_s7 + $0x118] sm:$0xff] %vm586_vm1, %v4168_v53 }
 0x601   : > { %v4174_v56 = vadd.f32 %v5072_v15, %v11491_v14  ;;  %v11494_v18 = vmax.f32 %v11492_v37, %v11493_v60  ;;  %v11496_v59 = vmax.f32 %v11370_v63, %v11495_v41  ;;  %v11497_v38 = vld [vmem:[#allocation91_spill] sm:$0xff]  ;;  %v5076_v47 = vld [vmem:[%s10559_s7 + $0x168] sm:$0xff]  ;;  %v11499_v50 = vld [vmem:[#allocation33_spill] sm:$0xff]  ;;  %4233 = vst.msk [vmem:[%s10559_s7 + $0x120] sm:$0xff] %vm586_vm1, %v4169_v5 }
 0x602   : > { %v11498_v58 = vmax.f32 %v11372_v35, %v11497_v38  ;;  %v11500_v31 = vld [vmem:[#allocation92_spill] sm:$0xff]  ;;  %4234 = vst.msk [vmem:[%s10559_s7 + $0x128] sm:$0xff] %vm586_vm1, %v4170_v44  ;;  %v5077_v63 = vld [vmem:[%s10559_s7 + $0x170] sm:$0xff]  ;;  %v11502_v35 = vld [vmem:[#allocation93_spill] sm:$0xff] }
 0x603   : > { %v4175_v23 = vadd.f32 %v5073_v1, %v11494_v18  ;;  %v4176_v42 = vadd.f32 %v5074_v36, %v11496_v59  ;;  %v11501_v51 = vmax.f32 %v11499_v50, %v11500_v31  ;;  %v11503_v27 = vmax.f32 %v11375_v32, %v11502_v35  ;;  %v5078_v39 = vld [vmem:[%s10559_s7 + $0x178] sm:$0xff]  ;;  %v11504_v17 = vld [vmem:[#allocation13_spill] sm:$0xff]  ;;  %v11505_v4 = vld [vmem:[#allocation94_spill] sm:$0xff]  ;;  %4235 = vst.msk [vmem:[%s10559_s7 + $0x130] sm:$0xff] %vm586_vm1, %v4171_v16 }
 0x604   : > { %v4177_v13 = vadd.f32 %v5075_v20, %v11498_v58  ;;  %v11506_v10 = vmax.f32 %v11504_v17, %v11505_v4  ;;  %v5079_v3 = vld [vmem:[%s10559_s7 + $0x180] sm:$0xff]  ;;  %v11507_v53 = vld [vmem:[#allocation46_spill] sm:$0xff]  ;;  %v11508_v48 = vld [vmem:[#allocation95_spill] sm:$0xff]  ;;  %4236 = vst.msk [vmem:[%s10559_s7 + $0x138] sm:$0xff] %vm586_vm1, %v4172_v12 }
 0x605   : > { %v4178_v28 = vadd.f32 %v5076_v47, %v11501_v51  ;;  %v4179_v19 = vadd.f32 %v5077_v63, %v11503_v27  ;;  %v11509_v62 = vmax.f32 %v11507_v53, %v11508_v48  ;;  %v5080_v32 = vld [vmem:[%s10559_s7 + $0x188] sm:$0xff]  ;;  %v11510_v45 = vld [vmem:[#allocation96_spill] sm:$0xff]  ;;  %4237 = vst.msk [vmem:[%s10559_s7 + $0x140] sm:$0xff] %vm586_vm1, %v4173_v57  ;;  %4238 = vst.msk [vmem:[%s10559_s7 + $0x148] sm:$0xff] %vm586_vm1, %v4174_v56 }
 0x606   : > { %v4180_v11 = vadd.f32 %v5078_v39, %v11506_v10  ;;  %v11511_v5 = vmax.f32 %v11379_v61, %v11510_v45  ;;  %v5081_v61 = vld [vmem:[%s10559_s7 + $0x190] sm:$0xff]  ;;  %v5082_v44 = vld [vmem:[%s10559_s7 + $0x198] sm:$0xff]  ;;  %v5083_v52 = vld [vmem:[%s10559_s7 + $0x1a0] sm:$0xff]  ;;  %4239 = vst.msk [vmem:[%s10559_s7 + $0x150] sm:$0xff] %vm586_vm1, %v4175_v23 }
 0x607   : > { %v4181_v2 = vadd.f32 %v5079_v3, %v11509_v62  ;;  %v4183_v7 = vadd.f32 %v5081_v61, %v11512_v34  ;;  %v11513_v30 = vld [vmem:[#allocation48_spill] sm:$0xff]  ;;  %v11515_v16 = vld [vmem:[#allocation98_spill] sm:$0xff]  ;;  %4240 = vst.msk [vmem:[%s10559_s7 + $0x158] sm:$0xff] %vm586_vm1, %v4176_v42  ;;  %4241 = vst.msk [vmem:[%s10559_s7 + $0x160] sm:$0xff] %vm586_vm1, %v4177_v13 }
 0x608   : > { %v4182_v33 = vadd.f32 %v5080_v32, %v11511_v5  ;;  %v11514_v54 = vmax.f32 %v11333_v29, %v11513_v30  ;;  %v11516_v6 = vmax.f32 %v11383_v22, %v11515_v16  ;;  %v5084_v9 = vld [vmem:[%s10559_s7 + $0x1a8] sm:$0xff]  ;;  %4242 = vst.msk [vmem:[%s10559_s7 + $0x168] sm:$0xff] %vm586_vm1, %v4178_v28  ;;  %v5085_v22 = vld [vmem:[%s10559_s7 + $0x1b0] sm:$0xff]  ;;  %v11519_v55 = vld [vmem:[#allocation100_spill] sm:$0xff] }
 0x609   : > { %v4186_v49 = vadd.f32 %v5084_v9, %v11517_v0  ;;  %v11518_v40 = vld [vmem:[#allocation51_spill] sm:$0xff]  ;;  %v5086_v12 = vld [vmem:[%s10559_s7 + $0x1b8] sm:$0xff]  ;;  %v11522_v24 = vld [vmem:[#allocation101_spill] sm:$0xff]  ;;  %4243 = vst.msk [vmem:[%s10559_s7 + $0x170] sm:$0xff] %vm586_vm1, %v4179_v19 }
 0x60a   : > { %v4184_v21 = vadd.f32 %v5082_v44, %v11514_v54  ;;  %v4185_v46 = vadd.f32 %v5083_v52, %v11516_v6  ;;  %v11520_v29 = vmax.f32 %v11518_v40, %v11519_v55  ;;  %v11521_v26 = vld [vmem:[#allocation52_spill] sm:$0xff]  ;;  %v5087_v15 = vld [vmem:[%s10559_s7 + $0x1c0] sm:$0xff]  ;;  %v11524_v8 = vld [vmem:[#allocation10_spill] sm:$0xff]  ;;  %4244 = vst.msk [vmem:[%s10559_s7 + $0x178] sm:$0xff] %vm586_vm1, %v4180_v11 }
 0x60b   : > { %v11523_v25 = vmax.f32 %v11521_v26, %v11522_v24  ;;  %v11525_v14 = vld [vmem:[#allocation102_spill] sm:$0xff]  ;;  %v11527_v60 = vld [vmem:[#allocation36_spill] sm:$0xff]  ;;  %v11528_v18 = vld [vmem:[#allocation103_spill] sm:$0xff]  ;;  %4245 = vst.msk [vmem:[%s10559_s7 + $0x180] sm:$0xff] %vm586_vm1, %v4181_v2 }
 0x60c   : > { %v4187_v43 = vadd.f32 %v5085_v22, %v11520_v29  ;;  %v11526_v56 = vmax.f32 %v11524_v8, %v11525_v14  ;;  %v5088_v37 = vld [vmem:[%s10559_s7 + $0x1c8] sm:$0xff]  ;;  %v11529_v23 = vmax.f32 %v11527_v60, %v11528_v18  ;;  %4246 = vst.msk [vmem:[%s10559_s7 + $0x188] sm:$0xff] %vm586_vm1, %v4182_v33  ;;  %v5089_v41 = vld [vmem:[%s10559_s7 + $0x1d0] sm:$0xff]  ;;  %v11530_v59 = vld [vmem:[#allocation12_spill] sm:$0xff] }
 0x60d   : > { %v4188_v57 = vadd.f32 %v5086_v12, %v11523_v25  ;;  %v11531_v42 = vld [vmem:[#allocation104_spill] sm:$0xff]  ;;  %v11533_v13 = vld [vmem:[#allocation27_spill] sm:$0xff]  ;;  %v11534_v47 = vld [vmem:[#allocation105_spill] sm:$0xff]  ;;  %4247 = vst.msk [vmem:[%s10559_s7 + $0x190] sm:$0xff] %vm586_vm1, %v4183_v7 }
 0x60e   : > { %v4189_v1 = vadd.f32 %v5087_v15, %v11526_v56  ;;  %v4190_v36 = vadd.f32 %v5088_v37, %v11529_v23  ;;  %v11532_v20 = vmax.f32 %v11530_v59, %v11531_v42  ;;  %v5090_v58 = vld [vmem:[%s10559_s7 + $0x1d8] sm:$0xff]  ;;  %v11535_v50 = vmax.f32 %v11533_v13, %v11534_v47  ;;  %v5091_v51 = vld [vmem:[%s10559_s7 + $0x1e0] sm:$0xff]  ;;  %v11537_v63 = vld [vmem:[#allocation106_spill] sm:$0xff]  ;;  %4248 = vst.msk [vmem:[%s10559_s7 + $0x198] sm:$0xff] %vm586_vm1, %v4184_v21 }
 0x60f   : > { %v11536_v28 = vld [vmem:[#allocation53_spill] sm:$0xff]  ;;  %v5092_v19 = vld [vmem:[%s10559_s7 + $0x1e8] sm:$0xff]  ;;  %v11540_v17 = vld [vmem:[#allocation107_spill] sm:$0xff]  ;;  %4249 = vst.msk [vmem:[%s10559_s7 + $0x1a0] sm:$0xff] %vm586_vm1, %v4185_v46 }
 0x610   : > { %v4191_v38 = vadd.f32 %v5089_v41, %v11532_v20  ;;  %v4192_v31 = vadd.f32 %v5090_v58, %v11535_v50  ;;  %v11538_v35 = vmax.f32 %v11536_v28, %v11537_v63  ;;  %v11539_v39 = vld [vmem:[#allocation54_spill] sm:$0xff]  ;;  %4250 = vst.msk [vmem:[%s10559_s7 + $0x1a8] sm:$0xff] %vm586_vm1, %v4186_v49  ;;  %v5093_v11 = vld [vmem:[%s10559_s7 + $0x1f0] sm:$0xff]  ;;  %v11543_v53 = vld [vmem:[#allocation108_spill] sm:$0xff] }
 0x611   : > { %v11541_v4 = vmax.f32 %v11539_v39, %v11540_v17  ;;  %v11542_v3 = vld [vmem:[#allocation55_spill] sm:$0xff]  ;;  %v5094_v2 = vld [vmem:[%s10559_s7 + $0x1f8] sm:$0xff]  ;;  %v11546_v45 = vld [vmem:[#allocation109_spill] sm:$0xff]  ;;  %4251 = vst.msk [vmem:[%s10559_s7 + $0x1b0] sm:$0xff] %vm586_vm1, %v4187_v43 }
 0x612   : > { %v4193_v27 = vadd.f32 %v5091_v51, %v11538_v35  ;;  %v11544_v48 = vmax.f32 %v11542_v3, %v11543_v53  ;;  %v11545_v32 = vld [vmem:[#allocation59_spill] sm:$0xff]  ;;  %4252 = vst.msk [vmem:[%s10559_s7 + $0x1b8] sm:$0xff] %vm586_vm1, %v4188_v57  ;;  %4253 = vst.msk [vmem:[%s10559_s7 + $0x1c0] sm:$0xff] %vm586_vm1, %v4189_v1 }
 0x613   : > { %v4194_v10 = vadd.f32 %v5092_v19, %v11541_v4  ;;  %v11547_v5 = vmax.f32 %v11545_v32, %v11546_v45  ;;  %4254 = vst.msk [vmem:[%s10559_s7 + $0x1c8] sm:$0xff] %vm586_vm1, %v4190_v36  ;;  %4255 = vst.msk [vmem:[%s10559_s7 + $0x1d0] sm:$0xff] %vm586_vm1, %v4191_v38 }
 0x614   : > { %v4195_v62 = vadd.f32 %v5093_v11, %v11544_v48  ;;  %4256 = vst.msk [vmem:[%s10559_s7 + $0x1d8] sm:$0xff] %vm586_vm1, %v4192_v31  ;;  %4257 = vst.msk [vmem:[%s10559_s7 + $0x1e0] sm:$0xff] %vm586_vm1, %v4193_v27 }
 0x615   : > { %v4196_v33 = vadd.f32 %v5094_v2, %v11547_v5  ;;  %4258 = vst.msk [vmem:[%s10559_s7 + $0x1e8] sm:$0xff] %vm586_vm1, %v4194_v10 }
 0x616   : > { %4259 = vst.msk [vmem:[%s10559_s7 + $0x1f0] sm:$0xff] %vm586_vm1, %v4195_v62 }
 0x617   : > { %4260 = vst.msk [vmem:[%s10559_s7 + $0x1f8] sm:$0xff] %vm586_vm1, %v4196_v33 }
 0x618 PF: > { %s17_s24 = sadd.s32 1, %s5103_s24  }
 0x619   : > { %p14_p5 = scmp.ge.s32.totalorder %s17_s24, 4  }
 0x61b   :  { %16 = sbr.rel (!%p14_p5) target bundleno = 1 (0x1), region = 131 }
 0x622   :  { %4272 = vsyncmov [#allocation2] }
 0x625   :  { %s4273_s8 = vpop.sfrf %4272 }
 0x626   :  { %p4486_p6 = scmp.ne.s32.totalorder %s4273_s8, 0 }
 0x628   :  { %4277 = shalt.err (%p4486_p6)  }

</bundles_post_ra>
